<compile_context>
chip_gen: v6e
topology: v6e:2x2x1
jax: 0.10.0
libtpu: 0.0.40
codegen_flags: <defaults>
</compile_context>

<pallas_src>
import functools
import math

import jax
import jax.numpy as jnp
from jax import lax
from jax.experimental import pallas as pl
from jax.experimental.pallas import tpu as pltpu

LANE = 128
_VMEM_LIMIT = 32 * 1024 * 1024  # raise v5e's 16 MiB scoped default; < v7x physical


def _round_up(n, m):
    return ((n + m - 1) // m) * m


# ---------------------------------------------------------------------------
# Pallas kernels
# ---------------------------------------------------------------------------

def conv3x3_kernel(x_ref, w_ref, scale_ref, shift_ref,
                   y_ref, sum_ref, ssq_ref, xpad_scr, *, apply_act):
    """3x3 same-padding conv on one (H, W, Cip) image block.

    x_ref:     (1, H, W, Cip)  activation block (channel-padded, NHWC)
    w_ref:     (9*Cip, Cop)    im2col-flattened weights, (kh, kw, ci) x co
    scale_ref: (1, Cip)        fused BN scale for the *input* (conv2 path)
    shift_ref: (1, Cip)        fused BN shift for the *input* (conv2 path)
    y_ref:     (1, H, W, Cop)  raw conv output (bias dropped: cancels under BN)
    sum_ref:   (1, 8, Cop)     per-image sum of y   (broadcast over the 8 rows)
    ssq_ref:   (1, 8, Cop)     per-image sum of y*y
    xpad_scr:  (H+2, W+2, Cip) VMEM halo scratch
    """
    _, H, W, Cop = y_ref.shape
    Cip = x_ref.shape[-1]

    x = x_ref[0]                                           # (H, W, Cip)
    if apply_act:
        # Fused BatchNorm+ReLU of the previous layer applied to this kernel's
        # input tile (saves a full HBM round-trip of the activation).
        x = jnp.maximum(x * scale_ref[...] + shift_ref[...], 0.0)

    # Build the 1-pixel zero halo in VMEM (no state carried across grid steps,
    # so the "parallel" grid axis stays safe on multi-core parts).
    xpad_scr[...] = jnp.zeros_like(xpad_scr)
    xpad_scr[1:H + 1, 1:W + 1, :] = x

    # im2col: the 9 shifted taps concatenated along channels -> one MXU matmul
    # with K = 9*Cip and N = Cop (both lane-dense multiples of 128).
    taps = [xpad_scr[kh:kh + H, kw:kw + W, :]
            for kh in range(3) for kw in range(3)]         # 9 x (H, W, Cip)
    patch = jnp.concatenate(taps, axis=-1).reshape(H * W, 9 * Cip)
    acc = jnp.dot(patch, w_ref[...], preferred_element_type=jnp.float32)

    y_ref[...] = acc.reshape(1, H, W, Cop)

    # Partial sums for training-mode BatchNorm of *this* conv's output,
    # emitted here so the wrapper never re-reads the activation for stats.
    s = jnp.sum(acc, axis=0, keepdims=True)                # (1, Cop)
    q = jnp.sum(acc * acc, axis=0, keepdims=True)          # (1, Cop)
    sum_ref[...] = jnp.broadcast_to(s.reshape(1, 1, Cop), (1, 8, Cop))
    ssq_ref[...] = jnp.broadcast_to(q.reshape(1, 1, Cop), (1, 8, Cop))


def bn_relu_kernel(x_ref, scale_ref, shift_ref, o_ref):
    # x_ref/o_ref: (1, H, W, C), lane-dense (C is a multiple of 128).
    o_ref[...] = jnp.maximum(x_ref[...] * scale_ref[...] + shift_ref[...], 0.0)


# ---------------------------------------------------------------------------
# Wrappers
# ---------------------------------------------------------------------------

def conv3x3(x, w_flat, scale, shift, cop, *, apply_act):
    N, H, W, cip = x.shape
    kernel = functools.partial(conv3x3_kernel, apply_act=apply_act)
    flops = 2 * N * H * W * w_flat.shape[0] * cop
    bytes_accessed = 4 * (x.size + w_flat.size + N * H * W * cop)
    y, s, q = pl.pallas_call(
        kernel,
        out_shape=(
            jax.ShapeDtypeStruct((N, H, W, cop), jnp.float32),
            jax.ShapeDtypeStruct((N, 8, cop), jnp.float32),
            jax.ShapeDtypeStruct((N, 8, cop), jnp.float32),
        ),
        grid_spec=pltpu.PrefetchScalarGridSpec(
            num_scalar_prefetch=0,
            grid=(N,),
            in_specs=[
                pl.BlockSpec((1, H, W, cip), lambda n: (n, 0, 0, 0)),
                pl.BlockSpec(w_flat.shape, lambda n: (0, 0)),
                pl.BlockSpec((1, cip), lambda n: (0, 0)),
                pl.BlockSpec((1, cip), lambda n: (0, 0)),
            ],
            out_specs=(
                pl.BlockSpec((1, H, W, cop), lambda n: (n, 0, 0, 0)),
                pl.BlockSpec((1, 8, cop), lambda n: (n, 0, 0)),
                pl.BlockSpec((1, 8, cop), lambda n: (n, 0, 0)),
            ),
            scratch_shapes=[pltpu.VMEM((H + 2, W + 2, cip), jnp.float32)],
        ),
        compiler_params=pltpu.CompilerParams(
            dimension_semantics=("parallel",),
            vmem_limit_bytes=_VMEM_LIMIT,
        ),
        cost_estimate=pl.CostEstimate(
            flops=flops, transcendentals=0, bytes_accessed=bytes_accessed),
    )(x, w_flat, scale, shift)
    return y, s[:, 0, :], q[:, 0, :]


def bn_relu(x, scale, shift):
    N, H, W, C = x.shape
    return pl.pallas_call(
        bn_relu_kernel,
        out_shape=jax.ShapeDtypeStruct((N, H, W, C), jnp.float32),
        grid_spec=pltpu.PrefetchScalarGridSpec(
            num_scalar_prefetch=0,
            grid=(N,),
            in_specs=[
                pl.BlockSpec((1, H, W, C), lambda n: (n, 0, 0, 0)),
                pl.BlockSpec((1, C), lambda n: (0, 0)),
                pl.BlockSpec((1, C), lambda n: (0, 0)),
            ],
            out_specs=pl.BlockSpec((1, H, W, C), lambda n: (n, 0, 0, 0)),
        ),
        compiler_params=pltpu.CompilerParams(
            dimension_semantics=("parallel",),
            vmem_limit_bytes=_VMEM_LIMIT,
        ),
        cost_estimate=pl.CostEstimate(
            flops=3 * x.size, transcendentals=0, bytes_accessed=8 * x.size),
    )(x, scale, shift)


def _bn_affine(s, q, gamma, beta, count, eps=1e-5):
    # s, q: (N, C) per-image partial sums of y and y*y.
    mean = jnp.sum(s, axis=0) / count
    var = jnp.maximum(jnp.sum(q, axis=0) / count - mean * mean, 0.0)
    scale = gamma * lax.rsqrt(var + eps)
    shift = beta - mean * scale
    return scale, shift


def conv_block_forward(params, x_nchw, eps=1e-5):
    """Pallas implementation of conv_block.forward (training-mode BatchNorm).

    Input/output are NCHW to match the PyTorch module.
    """
    N, ci, H, W = x_nchw.shape
    co = params["g1"].shape[0]
    cip = _round_up(ci, LANE)
    cop = _round_up(co, LANE)

    # NCHW -> NHWC and zero-pad channels to a lane-dense multiple of 128.
    x = jnp.transpose(x_nchw, (0, 2, 3, 1))
    x = jnp.pad(x, ((0, 0), (0, 0), (0, 0), (0, cip - ci)))

    # Weights: HWIO, channel-padded, flattened to (9*Cin, Cout) for im2col.
    w1 = jnp.pad(params["w1"],
                 ((0, 0), (0, 0), (0, cip - ci), (0, cop - co))).reshape(9 * cip, cop)
    w2 = jnp.pad(params["w2"],
                 ((0, 0), (0, 0), (0, cop - co), (0, cop - co))).reshape(9 * cop, cop)
    g1 = jnp.pad(params["g1"], (0, cop - co))
    be1 = jnp.pad(params["be1"], (0, cop - co))
    g2 = jnp.pad(params["g2"], (0, cop - co))
    be2 = jnp.pad(params["be2"], (0, cop - co))
    # Conv biases (params["b1"], params["b2"]) cancel exactly under the
    # training-mode BatchNorm that follows each conv, so they are dropped.

    count = N * H * W
    ones = jnp.ones((1, cip), jnp.float32)
    zeros = jnp.zeros((1, cip), jnp.float32)

    # conv1 (+ per-image BN1 partial statistics).
    y1, s1, q1 = conv3x3(x, w1, ones, zeros, cop, apply_act=False)
    scale1, shift1 = _bn_affine(s1, q1, g1, be1, count, eps)

    # BN1 + ReLU fused into conv2's input path; conv2 emits BN2 partial stats.
    y2, s2, q2 = conv3x3(y1, w2, scale1.reshape(1, cop), shift1.reshape(1, cop),
                         cop, apply_act=True)
    scale2, shift2 = _bn_affine(s2, q2, g2, be2, count, eps)

    # BN2 + ReLU tiled, lane-dense epilogue.
    y = bn_relu(y2, scale2.reshape(1, cop), shift2.reshape(1, cop))

    # Drop channel padding, NHWC -> NCHW.
    return jnp.transpose(y[..., :co], (0, 3, 1, 2))


# ---------------------------------------------------------------------------
# Parameter init (deterministic, mimics PyTorch defaults)
# ---------------------------------------------------------------------------

def init_params(key, ch_in, ch_out):
    k1, k2, k3, k4 = jax.random.split(key, 4)

    def conv_init(kw, kb, ci, co):
        bound = 1.0 / math.sqrt(ci * 9)
        # PyTorch stores OIHW; convert to HWIO for the NHWC kernels.
        w_oihw = jax.random.uniform(kw, (co, ci, 3, 3), jnp.float32, -bound, bound)
        w_hwio = jnp.transpose(w_oihw, (2, 3, 1, 0))
        b = jax.random.uniform(kb, (co,), jnp.float32, -bound, bound)
        return w_hwio, b

    w1, b1 = conv_init(k1, k2, ch_in, ch_out)
    w2, b2 = conv_init(k3, k4, ch_out, ch_out)
    return {
        "w1": w1, "b1": b1,
        "g1": jnp.ones((ch_out,), jnp.float32),    # BatchNorm2d default weight
        "be1": jnp.zeros((ch_out,), jnp.float32),  # BatchNorm2d default bias
        "w2": w2, "b2": b2,
        "g2": jnp.ones((ch_out,), jnp.float32),
        "be2": jnp.zeros((ch_out,), jnp.float32),
    }


# ---------------------------------------------------------------------------
# Pure-JAX reference (for correctness check)
# ---------------------------------------------------------------------------

def reference_forward(params, x_nchw, eps=1e-5):
    x = jnp.transpose(x_nchw, (0, 2, 3, 1))

    def conv(x, w, b):
        y = lax.conv_general_dilated(
            x, w, window_strides=(1, 1), padding="SAME",
            dimension_numbers=("NHWC", "HWIO", "NHWC"))
        return y + b

    def bnr(x, g, be):
        m = jnp.mean(x, axis=(0, 1, 2))
        v = jnp.mean((x - m) ** 2, axis=(0, 1, 2))
        return jnp.maximum((x - m) / jnp.sqrt(v + eps) * g + be, 0.0)

    x = bnr(conv(x, params["w1"], params["b1"]), params["g1"], params["be1"])
    x = bnr(conv(x, params["w2"], params["b2"]), params["g2"], params["be2"])
    return jnp.transpose(x, (0, 3, 1, 2))


# ---------------------------------------------------------------------------

if __name__ == "__main__":
    ch_in, ch_out = 4, 8
    N, H, W = 2, 16, 16

    key = jax.random.PRNGKey(0)
    kx, kp = jax.random.split(key)
    x = jax.random.normal(kx, (N, ch_in, H, W), jnp.float32)   # NCHW like PyTorch
    params = init_params(kp, ch_in, ch_out)

    out = jax.jit(conv_block_forward)(params, x)
    out = jax.block_until_ready(out)

    ref = reference_forward(params, x)
    assert out.shape == (N, ch_out, H, W)
    assert jnp.allclose(out, ref, atol=1e-4, rtol=1e-4), (
        float(jnp.max(jnp.abs(out - ref))))

    print("KERNEL_OK")
</pallas_src>

<mosaic_0001>
module attributes {stable_mosaic.version = 11 : i64} {
  func.func @bn_relu_kernel(%arg0: i32, %arg1: memref<1x16x16x128xf32, #tpu.memory_space<vmem>>, %arg2: memref<1x128xf32, #tpu.memory_space<vmem>>, %arg3: memref<1x128xf32, #tpu.memory_space<vmem>>, %arg4: memref<1x16x16x128xf32, #tpu.memory_space<vmem>>) attributes {dimension_semantics = [#tpu.dimension_semantics<parallel>], iteration_bounds = array<i64: 2>, scalar_prefetch = 0 : i64, scratch_operands = 0 : i64, tpu.core_type = #tpu.core_type<tc>, window_params = [{transform_indices = @transform_0, window_bounds = array<i64: 1, 16, 16, 128>}, {pipeline_mode = #tpu.pipeline_mode<synchronous>, transform_indices = @transform_1, window_bounds = array<i64: 1, 128>}, {pipeline_mode = #tpu.pipeline_mode<synchronous>, transform_indices = @transform_2, window_bounds = array<i64: 1, 128>}, {transform_indices = @transform_3, window_bounds = array<i64: 1, 16, 16, 128>}]} {
    %c0 = arith.constant 0 : index
    %c0_0 = arith.constant 0 : index
    %c0_1 = arith.constant 0 : index
    %c0_2 = arith.constant 0 : index
    %0 = vector.load %arg1[%c0, %c0_0, %c0_1, %c0_2] : memref<1x16x16x128xf32, #tpu.memory_space<vmem>>, vector<1x16x16x128xf32>
    %c0_3 = arith.constant 0 : index
    %c0_4 = arith.constant 0 : index
    %1 = vector.load %arg2[%c0_3, %c0_4] : memref<1x128xf32, #tpu.memory_space<vmem>>, vector<1x128xf32>
    %2 = vector.shape_cast %1 : vector<1x128xf32> to vector<1x1x1x128xf32>
    %3 = vector.broadcast %2 : vector<1x1x1x128xf32> to vector<1x16x16x128xf32>
    %4 = arith.mulf %0, %3 : vector<1x16x16x128xf32>
    %c0_5 = arith.constant 0 : index
    %c0_6 = arith.constant 0 : index
    %5 = vector.load %arg3[%c0_5, %c0_6] : memref<1x128xf32, #tpu.memory_space<vmem>>, vector<1x128xf32>
    %6 = vector.shape_cast %5 : vector<1x128xf32> to vector<1x1x1x128xf32>
    %7 = vector.broadcast %6 : vector<1x1x1x128xf32> to vector<1x16x16x128xf32>
    %8 = arith.addf %4, %7 : vector<1x16x16x128xf32>
    %cst = arith.constant 0.000000e+00 : f32
    %9 = vector.broadcast %cst : f32 to vector<1x16x16x128xf32>
    %10 = arith.maximumf %8, %9 : vector<1x16x16x128xf32>
    %c0_7 = arith.constant 0 : index
    %c0_8 = arith.constant 0 : index
    %c0_9 = arith.constant 0 : index
    %c0_10 = arith.constant 0 : index
    %11 = vector.load %arg4[%c0_7, %c0_8, %c0_9, %c0_10] : memref<1x16x16x128xf32, #tpu.memory_space<vmem>>, vector<1x16x16x128xf32>
    tpu.vector_store %arg4[%c0_7, %c0_8, %c0_9, %c0_10], %10 {strides = array<i32>} : memref<1x16x16x128xf32, #tpu.memory_space<vmem>>, vector<1x16x16x128xf32>,
    return
  }
  func.func @transform_0(%arg0: i32) -> (i32, i32, i32, i32) {
    %c0_i32 = arith.constant 0 : i32
    %c0_i32_0 = arith.constant 0 : i32
    %c0_i32_1 = arith.constant 0 : i32
    %c0_i32_2 = arith.constant 0 : i32
    return %arg0, %c0_i32, %c0_i32_0, %c0_i32_1 : i32, i32, i32, i32
  }
  func.func @transform_1(%arg0: i32) -> (i32, i32) {
    %c0_i32 = arith.constant 0 : i32
    %c0_i32_0 = arith.constant 0 : i32
    %c0_i32_1 = arith.constant 0 : i32
    return %c0_i32, %c0_i32_0 : i32, i32
  }
  func.func @transform_2(%arg0: i32) -> (i32, i32) {
    %c0_i32 = arith.constant 0 : i32
    %c0_i32_0 = arith.constant 0 : i32
    %c0_i32_1 = arith.constant 0 : i32
    return %c0_i32, %c0_i32_0 : i32, i32
  }
  func.func @transform_3(%arg0: i32) -> (i32, i32, i32, i32) {
    %c0_i32 = arith.constant 0 : i32
    %c0_i32_0 = arith.constant 0 : i32
    %c0_i32_1 = arith.constant 0 : i32
    %c0_i32_2 = arith.constant 0 : i32
    return %arg0, %c0_i32, %c0_i32_0, %c0_i32_1 : i32, i32, i32, i32
  }
}

module attributes {stable_mosaic.version = 11 : i64} {
  func.func @conv3x3_kernel(%arg0: i32, %arg1: memref<1x16x16x128xf32, #tpu.memory_space<vmem>>, %arg2: memref<1152x128xf32, #tpu.memory_space<vmem>>, %arg3: memref<1x128xf32, #tpu.memory_space<vmem>>, %arg4: memref<1x128xf32, #tpu.memory_space<vmem>>, %arg5: memref<1x16x16x128xf32, #tpu.memory_space<vmem>>, %arg6: memref<1x8x128xf32, #tpu.memory_space<vmem>>, %arg7: memref<1x8x128xf32, #tpu.memory_space<vmem>>, %arg8: memref<18x18x128xf32, #tpu.memory_space<vmem>>) attributes {dimension_semantics = [#tpu.dimension_semantics<parallel>], iteration_bounds = array<i64: 2>, scalar_prefetch = 0 : i64, scratch_operands = 1 : i64, tpu.core_type = #tpu.core_type<tc>, window_params = [{transform_indices = @transform_0, window_bounds = array<i64: 1, 16, 16, 128>}, {pipeline_mode = #tpu.pipeline_mode<synchronous>, transform_indices = @transform_1, window_bounds = array<i64: 1152, 128>}, {pipeline_mode = #tpu.pipeline_mode<synchronous>, transform_indices = @transform_2, window_bounds = array<i64: 1, 128>}, {pipeline_mode = #tpu.pipeline_mode<synchronous>, transform_indices = @transform_3, window_bounds = array<i64: 1, 128>}, {transform_indices = @transform_4, window_bounds = array<i64: 1, 16, 16, 128>}, {transform_indices = @transform_5, window_bounds = array<i64: 1, 8, 128>}, {transform_indices = @transform_6, window_bounds = array<i64: 1, 8, 128>}]} {
    %c0 = arith.constant 0 : index
    %c0_0 = arith.constant 0 : index
    %c0_1 = arith.constant 0 : index
    %c0_2 = arith.constant 0 : index
    %0 = vector.load %arg1[%c0, %c0_0, %c0_1, %c0_2] : memref<1x16x16x128xf32, #tpu.memory_space<vmem>>, vector<1x16x16x128xf32>
    %1 = vector.shape_cast %0 : vector<1x16x16x128xf32> to vector<16x16x128xf32>
    %cst = arith.constant 0.000000e+00 : f32
    %2 = vector.broadcast %cst : f32 to vector<18x18x128xf32>
    %c0_3 = arith.constant 0 : index
    %c0_4 = arith.constant 0 : index
    %c0_5 = arith.constant 0 : index
    %3 = vector.load %arg8[%c0_3, %c0_4, %c0_5] : memref<18x18x128xf32, #tpu.memory_space<vmem>>, vector<18x18x128xf32>
    tpu.vector_store %arg8[%c0_3, %c0_4, %c0_5], %2 {strides = array<i32>} : memref<18x18x128xf32, #tpu.memory_space<vmem>>, vector<18x18x128xf32>,
    %c1 = arith.constant 1 : index
    %c1_6 = arith.constant 1 : index
    %c0_7 = arith.constant 0 : index
    %4 = vector.load %arg8[%c1, %c1_6, %c0_7] : memref<18x18x128xf32, #tpu.memory_space<vmem>>, vector<16x16x128xf32>
    tpu.vector_store %arg8[%c1, %c1_6, %c0_7], %1 {strides = array<i32>} : memref<18x18x128xf32, #tpu.memory_space<vmem>>, vector<16x16x128xf32>,
    %c0_8 = arith.constant 0 : index
    %c0_9 = arith.constant 0 : index
    %c0_10 = arith.constant 0 : index
    %5 = vector.load %arg8[%c0_8, %c0_9, %c0_10] : memref<18x18x128xf32, #tpu.memory_space<vmem>>, vector<16x16x128xf32>
    %c0_11 = arith.constant 0 : index
    %c1_12 = arith.constant 1 : index
    %c0_13 = arith.constant 0 : index
    %6 = vector.load %arg8[%c0_11, %c1_12, %c0_13] : memref<18x18x128xf32, #tpu.memory_space<vmem>>, vector<16x16x128xf32>
    %c0_14 = arith.constant 0 : index
    %c2 = arith.constant 2 : index
    %c0_15 = arith.constant 0 : index
    %7 = vector.load %arg8[%c0_14, %c2, %c0_15] : memref<18x18x128xf32, #tpu.memory_space<vmem>>, vector<16x16x128xf32>
    %c1_16 = arith.constant 1 : index
    %c0_17 = arith.constant 0 : index
    %c0_18 = arith.constant 0 : index
    %8 = vector.load %arg8[%c1_16, %c0_17, %c0_18] : memref<18x18x128xf32, #tpu.memory_space<vmem>>, vector<16x16x128xf32>
    %c1_19 = arith.constant 1 : index
    %c1_20 = arith.constant 1 : index
    %c0_21 = arith.constant 0 : index
    %9 = vector.load %arg8[%c1_19, %c1_20, %c0_21] : memref<18x18x128xf32, #tpu.memory_space<vmem>>, vector<16x16x128xf32>
    %c1_22 = arith.constant 1 : index
    %c2_23 = arith.constant 2 : index
    %c0_24 = arith.constant 0 : index
    %10 = vector.load %arg8[%c1_22, %c2_23, %c0_24] : memref<18x18x128xf32, #tpu.memory_space<vmem>>, vector<16x16x128xf32>
    %c2_25 = arith.constant 2 : index
    %c0_26 = arith.constant 0 : index
    %c0_27 = arith.constant 0 : index
    %11 = vector.load %arg8[%c2_25, %c0_26, %c0_27] : memref<18x18x128xf32, #tpu.memory_space<vmem>>, vector<16x16x128xf32>
    %c2_28 = arith.constant 2 : index
    %c1_29 = arith.constant 1 : index
    %c0_30 = arith.constant 0 : index
    %12 = vector.load %arg8[%c2_28, %c1_29, %c0_30] : memref<18x18x128xf32, #tpu.memory_space<vmem>>, vector<16x16x128xf32>
    %c2_31 = arith.constant 2 : index
    %c2_32 = arith.constant 2 : index
    %c0_33 = arith.constant 0 : index
    %13 = vector.load %arg8[%c2_31, %c2_32, %c0_33] : memref<18x18x128xf32, #tpu.memory_space<vmem>>, vector<16x16x128xf32>
    %14 = tpu.concatenate %5, %6, %7, %8, %9, %10, %11, %12, %13 in 2 : vector<16x16x128xf32>, vector<16x16x128xf32>, vector<16x16x128xf32>, vector<16x16x128xf32>, vector<16x16x128xf32>, vector<16x16x128xf32>, vector<16x16x128xf32>, vector<16x16x128xf32>, vector<16x16x128xf32> -> vector<16x16x1152xf32>
    %15 = vector.shape_cast %14 : vector<16x16x1152xf32> to vector<256x1152xf32>
    %c0_34 = arith.constant 0 : index
    %c0_35 = arith.constant 0 : index
    %16 = vector.load %arg2[%c0_34, %c0_35] : memref<1152x128xf32, #tpu.memory_space<vmem>>, vector<1152x128xf32>
    %cst_36 = arith.constant dense<0.000000e+00> : vector<256x128xf32>
    %17 = tpu.matmul %15, %16, %cst_36 {dimension_numbers = #tpu.dot_dimension_numbers<[1], [0], [0], [1], [0, 0, 1, 1], [], []>} : vector<256x1152xf32>, vector<1152x128xf32>, vector<256x128xf32> -> vector<256x128xf32>
    %18 = vector.shape_cast %17 : vector<256x128xf32> to vector<1x16x16x128xf32>
    %c0_37 = arith.constant 0 : index
    %c0_38 = arith.constant 0 : index
    %c0_39 = arith.constant 0 : index
    %c0_40 = arith.constant 0 : index
    %19 = vector.load %arg5[%c0_37, %c0_38, %c0_39, %c0_40] : memref<1x16x16x128xf32, #tpu.memory_space<vmem>>, vector<1x16x16x128xf32>
    tpu.vector_store %arg5[%c0_37, %c0_38, %c0_39, %c0_40], %18 {strides = array<i32>} : memref<1x16x16x128xf32, #tpu.memory_space<vmem>>, vector<1x16x16x128xf32>,
    %cst_41 = arith.constant dense<0.000000e+00> : vector<128xf32>
    %20 = vector.multi_reduction <add>, %17, %cst_41 [0] : vector<256x128xf32> to vector<128xf32>
    %21 = vector.shape_cast %20 : vector<128xf32> to vector<1x128xf32>
    %22 = arith.mulf %17, %17 : vector<256x128xf32>
    %cst_42 = arith.constant dense<0.000000e+00> : vector<128xf32>
    %23 = vector.multi_reduction <add>, %22, %cst_42 [0] : vector<256x128xf32> to vector<128xf32>
    %24 = vector.shape_cast %23 : vector<128xf32> to vector<1x128xf32>
    %25 = vector.shape_cast %21 : vector<1x128xf32> to vector<1x1x128xf32>
    %26 = vector.shape_cast %25 : vector<1x1x128xf32> to vector<1x1x128xf32>
    %27 = vector.broadcast %26 : vector<1x1x128xf32> to vector<1x8x128xf32>
    %c0_43 = arith.constant 0 : index
    %c0_44 = arith.constant 0 : index
    %c0_45 = arith.constant 0 : index
    %28 = vector.load %arg6[%c0_43, %c0_44, %c0_45] : memref<1x8x128xf32, #tpu.memory_space<vmem>>, vector<1x8x128xf32>
    tpu.vector_store %arg6[%c0_43, %c0_44, %c0_45], %27 {strides = array<i32>} : memref<1x8x128xf32, #tpu.memory_space<vmem>>, vector<1x8x128xf32>,
    %29 = vector.shape_cast %24 : vector<1x128xf32> to vector<1x1x128xf32>
    %30 = vector.shape_cast %29 : vector<1x1x128xf32> to vector<1x1x128xf32>
    %31 = vector.broadcast %30 : vector<1x1x128xf32> to vector<1x8x128xf32>
    %c0_46 = arith.constant 0 : index
    %c0_47 = arith.constant 0 : index
    %c0_48 = arith.constant 0 : index
    %32 = vector.load %arg7[%c0_46, %c0_47, %c0_48] : memref<1x8x128xf32, #tpu.memory_space<vmem>>, vector<1x8x128xf32>
    tpu.vector_store %arg7[%c0_46, %c0_47, %c0_48], %31 {strides = array<i32>} : memref<1x8x128xf32, #tpu.memory_space<vmem>>, vector<1x8x128xf32>,
    return
  }
  func.func @transform_0(%arg0: i32) -> (i32, i32, i32, i32) {
    %c0_i32 = arith.constant 0 : i32
    %c0_i32_0 = arith.constant 0 : i32
    %c0_i32_1 = arith.constant 0 : i32
    %c0_i32_2 = arith.constant 0 : i32
    return %arg0, %c0_i32, %c0_i32_0, %c0_i32_1 : i32, i32, i32, i32
  }
  func.func @transform_1(%arg0: i32) -> (i32, i32) {
    %c0_i32 = arith.constant 0 : i32
    %c0_i32_0 = arith.constant 0 : i32
    %c0_i32_1 = arith.constant 0 : i32
    return %c0_i32, %c0_i32_0 : i32, i32
  }
  func.func @transform_2(%arg0: i32) -> (i32, i32) {
    %c0_i32 = arith.constant 0 : i32
    %c0_i32_0 = arith.constant 0 : i32
    %c0_i32_1 = arith.constant 0 : i32
    return %c0_i32, %c0_i32_0 : i32, i32
  }
  func.func @transform_3(%arg0: i32) -> (i32, i32) {
    %c0_i32 = arith.constant 0 : i32
    %c0_i32_0 = arith.constant 0 : i32
    %c0_i32_1 = arith.constant 0 : i32
    return %c0_i32, %c0_i32_0 : i32, i32
  }
  func.func @transform_4(%arg0: i32) -> (i32, i32, i32, i32) {
    %c0_i32 = arith.constant 0 : i32
    %c0_i32_0 = arith.constant 0 : i32
    %c0_i32_1 = arith.constant 0 : i32
    %c0_i32_2 = arith.constant 0 : i32
    return %arg0, %c0_i32, %c0_i32_0, %c0_i32_1 : i32, i32, i32, i32
  }
  func.func @transform_5(%arg0: i32) -> (i32, i32, i32) {
    %c0_i32 = arith.constant 0 : i32
    %c0_i32_0 = arith.constant 0 : i32
    %c0_i32_1 = arith.constant 0 : i32
    return %arg0, %c0_i32, %c0_i32_0 : i32, i32, i32
  }
  func.func @transform_6(%arg0: i32) -> (i32, i32, i32) {
    %c0_i32 = arith.constant 0 : i32
    %c0_i32_0 = arith.constant 0 : i32
    %c0_i32_1 = arith.constant 0 : i32
    return %arg0, %c0_i32, %c0_i32_0 : i32, i32, i32
  }
}

module attributes {stable_mosaic.version = 11 : i64} {
  func.func @conv3x3_kernel(%arg0: i32, %arg1: memref<1x16x16x128xf32, #tpu.memory_space<vmem>>, %arg2: memref<1152x128xf32, #tpu.memory_space<vmem>>, %arg3: memref<1x128xf32, #tpu.memory_space<vmem>>, %arg4: memref<1x128xf32, #tpu.memory_space<vmem>>, %arg5: memref<1x16x16x128xf32, #tpu.memory_space<vmem>>, %arg6: memref<1x8x128xf32, #tpu.memory_space<vmem>>, %arg7: memref<1x8x128xf32, #tpu.memory_space<vmem>>, %arg8: memref<18x18x128xf32, #tpu.memory_space<vmem>>) attributes {dimension_semantics = [#tpu.dimension_semantics<parallel>], iteration_bounds = array<i64: 2>, scalar_prefetch = 0 : i64, scratch_operands = 1 : i64, tpu.core_type = #tpu.core_type<tc>, window_params = [{transform_indices = @transform_0, window_bounds = array<i64: 1, 16, 16, 128>}, {pipeline_mode = #tpu.pipeline_mode<synchronous>, transform_indices = @transform_1, window_bounds = array<i64: 1152, 128>}, {pipeline_mode = #tpu.pipeline_mode<synchronous>, transform_indices = @transform_2, window_bounds = array<i64: 1, 128>}, {pipeline_mode = #tpu.pipeline_mode<synchronous>, transform_indices = @transform_3, window_bounds = array<i64: 1, 128>}, {transform_indices = @transform_4, window_bounds = array<i64: 1, 16, 16, 128>}, {transform_indices = @transform_5, window_bounds = array<i64: 1, 8, 128>}, {transform_indices = @transform_6, window_bounds = array<i64: 1, 8, 128>}]} {
    %c0 = arith.constant 0 : index
    %c0_0 = arith.constant 0 : index
    %c0_1 = arith.constant 0 : index
    %c0_2 = arith.constant 0 : index
    %0 = vector.load %arg1[%c0, %c0_0, %c0_1, %c0_2] : memref<1x16x16x128xf32, #tpu.memory_space<vmem>>, vector<1x16x16x128xf32>
    %1 = vector.shape_cast %0 : vector<1x16x16x128xf32> to vector<16x16x128xf32>
    %c0_3 = arith.constant 0 : index
    %c0_4 = arith.constant 0 : index
    %2 = vector.load %arg3[%c0_3, %c0_4] : memref<1x128xf32, #tpu.memory_space<vmem>>, vector<1x128xf32>
    %3 = vector.shape_cast %2 : vector<1x128xf32> to vector<1x1x128xf32>
    %4 = vector.broadcast %3 : vector<1x1x128xf32> to vector<16x16x128xf32>
    %5 = arith.mulf %1, %4 : vector<16x16x128xf32>
    %c0_5 = arith.constant 0 : index
    %c0_6 = arith.constant 0 : index
    %6 = vector.load %arg4[%c0_5, %c0_6] : memref<1x128xf32, #tpu.memory_space<vmem>>, vector<1x128xf32>
    %7 = vector.shape_cast %6 : vector<1x128xf32> to vector<1x1x128xf32>
    %8 = vector.broadcast %7 : vector<1x1x128xf32> to vector<16x16x128xf32>
    %9 = arith.addf %5, %8 : vector<16x16x128xf32>
    %cst = arith.constant 0.000000e+00 : f32
    %10 = vector.broadcast %cst : f32 to vector<16x16x128xf32>
    %11 = arith.maximumf %9, %10 : vector<16x16x128xf32>
    %cst_7 = arith.constant 0.000000e+00 : f32
    %12 = vector.broadcast %cst_7 : f32 to vector<18x18x128xf32>
    %c0_8 = arith.constant 0 : index
    %c0_9 = arith.constant 0 : index
    %c0_10 = arith.constant 0 : index
    %13 = vector.load %arg8[%c0_8, %c0_9, %c0_10] : memref<18x18x128xf32, #tpu.memory_space<vmem>>, vector<18x18x128xf32>
    tpu.vector_store %arg8[%c0_8, %c0_9, %c0_10], %12 {strides = array<i32>} : memref<18x18x128xf32, #tpu.memory_space<vmem>>, vector<18x18x128xf32>,
    %c1 = arith.constant 1 : index
    %c1_11 = arith.constant 1 : index
    %c0_12 = arith.constant 0 : index
    %14 = vector.load %arg8[%c1, %c1_11, %c0_12] : memref<18x18x128xf32, #tpu.memory_space<vmem>>, vector<16x16x128xf32>
    tpu.vector_store %arg8[%c1, %c1_11, %c0_12], %11 {strides = array<i32>} : memref<18x18x128xf32, #tpu.memory_space<vmem>>, vector<16x16x128xf32>,
    %c0_13 = arith.constant 0 : index
    %c0_14 = arith.constant 0 : index
    %c0_15 = arith.constant 0 : index
    %15 = vector.load %arg8[%c0_13, %c0_14, %c0_15] : memref<18x18x128xf32, #tpu.memory_space<vmem>>, vector<16x16x128xf32>
    %c0_16 = arith.constant 0 : index
    %c1_17 = arith.constant 1 : index
    %c0_18 = arith.constant 0 : index
    %16 = vector.load %arg8[%c0_16, %c1_17, %c0_18] : memref<18x18x128xf32, #tpu.memory_space<vmem>>, vector<16x16x128xf32>
    %c0_19 = arith.constant 0 : index
    %c2 = arith.constant 2 : index
    %c0_20 = arith.constant 0 : index
    %17 = vector.load %arg8[%c0_19, %c2, %c0_20] : memref<18x18x128xf32, #tpu.memory_space<vmem>>, vector<16x16x128xf32>
    %c1_21 = arith.constant 1 : index
    %c0_22 = arith.constant 0 : index
    %c0_23 = arith.constant 0 : index
    %18 = vector.load %arg8[%c1_21, %c0_22, %c0_23] : memref<18x18x128xf32, #tpu.memory_space<vmem>>, vector<16x16x128xf32>
    %c1_24 = arith.constant 1 : index
    %c1_25 = arith.constant 1 : index
    %c0_26 = arith.constant 0 : index
    %19 = vector.load %arg8[%c1_24, %c1_25, %c0_26] : memref<18x18x128xf32, #tpu.memory_space<vmem>>, vector<16x16x128xf32>
    %c1_27 = arith.constant 1 : index
    %c2_28 = arith.constant 2 : index
    %c0_29 = arith.constant 0 : index
    %20 = vector.load %arg8[%c1_27, %c2_28, %c0_29] : memref<18x18x128xf32, #tpu.memory_space<vmem>>, vector<16x16x128xf32>
    %c2_30 = arith.constant 2 : index
    %c0_31 = arith.constant 0 : index
    %c0_32 = arith.constant 0 : index
    %21 = vector.load %arg8[%c2_30, %c0_31, %c0_32] : memref<18x18x128xf32, #tpu.memory_space<vmem>>, vector<16x16x128xf32>
    %c2_33 = arith.constant 2 : index
    %c1_34 = arith.constant 1 : index
    %c0_35 = arith.constant 0 : index
    %22 = vector.load %arg8[%c2_33, %c1_34, %c0_35] : memref<18x18x128xf32, #tpu.memory_space<vmem>>, vector<16x16x128xf32>
    %c2_36 = arith.constant 2 : index
    %c2_37 = arith.constant 2 : index
    %c0_38 = arith.constant 0 : index
    %23 = vector.load %arg8[%c2_36, %c2_37, %c0_38] : memref<18x18x128xf32, #tpu.memory_space<vmem>>, vector<16x16x128xf32>
    %24 = tpu.concatenate %15, %16, %17, %18, %19, %20, %21, %22, %23 in 2 : vector<16x16x128xf32>, vector<16x16x128xf32>, vector<16x16x128xf32>, vector<16x16x128xf32>, vector<16x16x128xf32>, vector<16x16x128xf32>, vector<16x16x128xf32>, vector<16x16x128xf32>, vector<16x16x128xf32> -> vector<16x16x1152xf32>
    %25 = vector.shape_cast %24 : vector<16x16x1152xf32> to vector<256x1152xf32>
    %c0_39 = arith.constant 0 : index
    %c0_40 = arith.constant 0 : index
    %26 = vector.load %arg2[%c0_39, %c0_40] : memref<1152x128xf32, #tpu.memory_space<vmem>>, vector<1152x128xf32>
    %cst_41 = arith.constant dense<0.000000e+00> : vector<256x128xf32>
    %27 = tpu.matmul %25, %26, %cst_41 {dimension_numbers = #tpu.dot_dimension_numbers<[1], [0], [0], [1], [0, 0, 1, 1], [], []>} : vector<256x1152xf32>, vector<1152x128xf32>, vector<256x128xf32> -> vector<256x128xf32>
    %28 = vector.shape_cast %27 : vector<256x128xf32> to vector<1x16x16x128xf32>
    %c0_42 = arith.constant 0 : index
    %c0_43 = arith.constant 0 : index
    %c0_44 = arith.constant 0 : index
    %c0_45 = arith.constant 0 : index
    %29 = vector.load %arg5[%c0_42, %c0_43, %c0_44, %c0_45] : memref<1x16x16x128xf32, #tpu.memory_space<vmem>>, vector<1x16x16x128xf32>
    tpu.vector_store %arg5[%c0_42, %c0_43, %c0_44, %c0_45], %28 {strides = array<i32>} : memref<1x16x16x128xf32, #tpu.memory_space<vmem>>, vector<1x16x16x128xf32>,
    %cst_46 = arith.constant dense<0.000000e+00> : vector<128xf32>
    %30 = vector.multi_reduction <add>, %27, %cst_46 [0] : vector<256x128xf32> to vector<128xf32>
    %31 = vector.shape_cast %30 : vector<128xf32> to vector<1x128xf32>
    %32 = arith.mulf %27, %27 : vector<256x128xf32>
    %cst_47 = arith.constant dense<0.000000e+00> : vector<128xf32>
    %33 = vector.multi_reduction <add>, %32, %cst_47 [0] : vector<256x128xf32> to vector<128xf32>
    %34 = vector.shape_cast %33 : vector<128xf32> to vector<1x128xf32>
    %35 = vector.shape_cast %31 : vector<1x128xf32> to vector<1x1x128xf32>
    %36 = vector.shape_cast %35 : vector<1x1x128xf32> to vector<1x1x128xf32>
    %37 = vector.broadcast %36 : vector<1x1x128xf32> to vector<1x8x128xf32>
    %c0_48 = arith.constant 0 : index
    %c0_49 = arith.constant 0 : index
    %c0_50 = arith.constant 0 : index
    %38 = vector.load %arg6[%c0_48, %c0_49, %c0_50] : memref<1x8x128xf32, #tpu.memory_space<vmem>>, vector<1x8x128xf32>
    tpu.vector_store %arg6[%c0_48, %c0_49, %c0_50], %37 {strides = array<i32>} : memref<1x8x128xf32, #tpu.memory_space<vmem>>, vector<1x8x128xf32>,
    %39 = vector.shape_cast %34 : vector<1x128xf32> to vector<1x1x128xf32>
    %40 = vector.shape_cast %39 : vector<1x1x128xf32> to vector<1x1x128xf32>
    %41 = vector.broadcast %40 : vector<1x1x128xf32> to vector<1x8x128xf32>
    %c0_51 = arith.constant 0 : index
    %c0_52 = arith.constant 0 : index
    %c0_53 = arith.constant 0 : index
    %42 = vector.load %arg7[%c0_51, %c0_52, %c0_53] : memref<1x8x128xf32, #tpu.memory_space<vmem>>, vector<1x8x128xf32>
    tpu.vector_store %arg7[%c0_51, %c0_52, %c0_53], %41 {strides = array<i32>} : memref<1x8x128xf32, #tpu.memory_space<vmem>>, vector<1x8x128xf32>,
    return
  }
  func.func @transform_0(%arg0: i32) -> (i32, i32, i32, i32) {
    %c0_i32 = arith.constant 0 : i32
    %c0_i32_0 = arith.constant 0 : i32
    %c0_i32_1 = arith.constant 0 : i32
    %c0_i32_2 = arith.constant 0 : i32
    return %arg0, %c0_i32, %c0_i32_0, %c0_i32_1 : i32, i32, i32, i32
  }
  func.func @transform_1(%arg0: i32) -> (i32, i32) {
    %c0_i32 = arith.constant 0 : i32
    %c0_i32_0 = arith.constant 0 : i32
    %c0_i32_1 = arith.constant 0 : i32
    return %c0_i32, %c0_i32_0 : i32, i32
  }
  func.func @transform_2(%arg0: i32) -> (i32, i32) {
    %c0_i32 = arith.constant 0 : i32
    %c0_i32_0 = arith.constant 0 : i32
    %c0_i32_1 = arith.constant 0 : i32
    return %c0_i32, %c0_i32_0 : i32, i32
  }
  func.func @transform_3(%arg0: i32) -> (i32, i32) {
    %c0_i32 = arith.constant 0 : i32
    %c0_i32_0 = arith.constant 0 : i32
    %c0_i32_1 = arith.constant 0 : i32
    return %c0_i32, %c0_i32_0 : i32, i32
  }
  func.func @transform_4(%arg0: i32) -> (i32, i32, i32, i32) {
    %c0_i32 = arith.constant 0 : i32
    %c0_i32_0 = arith.constant 0 : i32
    %c0_i32_1 = arith.constant 0 : i32
    %c0_i32_2 = arith.constant 0 : i32
    return %arg0, %c0_i32, %c0_i32_0, %c0_i32_1 : i32, i32, i32, i32
  }
  func.func @transform_5(%arg0: i32) -> (i32, i32, i32) {
    %c0_i32 = arith.constant 0 : i32
    %c0_i32_0 = arith.constant 0 : i32
    %c0_i32_1 = arith.constant 0 : i32
    return %arg0, %c0_i32, %c0_i32_0 : i32, i32, i32
  }
  func.func @transform_6(%arg0: i32) -> (i32, i32, i32) {
    %c0_i32 = arith.constant 0 : i32
    %c0_i32_0 = arith.constant 0 : i32
    %c0_i32_1 = arith.constant 0 : i32
    return %arg0, %c0_i32, %c0_i32_0 : i32, i32, i32
  }
}

</mosaic_0001>

<bundles_post_ra>
// kernel: conv_block_forward.5
= control target key start
LH: loop header
LB: loop body
LE: loop exit
PB: predicated region body
PF: predicated region fallthrough
CT: control target
= control target key end

     0   :  { %s451_s12 = smov 0   ;;  %s610_s0 = inlined_call_operand.vmem [shape: f32[2,16,16,128], index: 0, kind: input, shape index: {}]   ;;  %s611_s1 = inlined_call_operand.vmem [shape: f32[1,128], index: 1, kind: input, shape index: {}]   ;;  %s612_s2 = inlined_call_operand.vmem [shape: f32[1,128], index: 2, kind: input, shape index: {}]   ;;  %s613_s3 = inlined_call_operand.vmem [shape: f32[2,16,16,128], index: 3, kind: output, shape index: {}]  }
   0x1 LB: > { %s400_s13 = sadd.s32 4294967295, %s429_s12   ;;  %p404_p0 = scmp.ge.s32.totalorder %s429_s12, 1  ;;  %s429_s12 = sphi %s451_s12, %s13_s12  }
   0x2   : > { %p137_p1 = scmp.lt.s32.totalorder %s429_s12, 3 }
   0x4   : > { %p138_p2 = pnand %p404_p0, %p137_p1 }
   0x5   : > { %p161_p3 = scmp.lt.s32.totalorder (!%p138_p2), %s400_s13, 1 }
   0x6   : > { %141 = sbr.rel (%p138_p2) target bundleno = 44 (0x2c), region = 32 }
   0xb   : > { %s615_s13 = smov (!%p161_p3, %s400_s13), 1  ;;  %v462_v0 = vld [vmem:[%s611_s1] ss:$0 sm:$0xff] }
   0xc   : > { %s413_s14 = sshll.u32 %s615_s13, 8  ;;  %v472_v1 = vld [vmem:[%s612_s2] ss:$0 sm:$0xff] }
   0xd   : > { %s467_s19 = scalar_lea.vmem %s610_s0, %s413_s14  ;;  %s495_s24 = scalar_lea.vmem %s613_s3, %s413_s14 }
   0xe   : > { %v171_v2 = vld [vmem:[%s467_s19] sm:$0xff]  ;;  %v172_v3 = vld [vmem:[%s467_s19 + $0x8] sm:$0xff]  ;;  %v173_v4 = vld [vmem:[%s467_s19 + $0x10] sm:$0xff] }
   0xf   : > { %v210_v5 = vmul.f32 %v462_v0, %v171_v2  ;;  %v211_v6 = vmul.f32 %v462_v0, %v172_v3  ;;  %v212_v7 = vmul.f32 %v462_v0, %v173_v4  ;;  %v174_v8 = vld [vmem:[%s467_s19 + $0x18] sm:$0xff]  ;;  %v175_v9 = vld [vmem:[%s467_s19 + $0x20] sm:$0xff]  ;;  %v176_v10 = vld [vmem:[%s467_s19 + $0x28] sm:$0xff] }
  0x10   : > { %v213_v11 = vmul.f32 %v462_v0, %v174_v8  ;;  %v214_v12 = vmul.f32 %v462_v0, %v175_v9  ;;  %v215_v13 = vmul.f32 %v462_v0, %v176_v10  ;;  %v177_v14 = vld [vmem:[%s467_s19 + $0x30] sm:$0xff]  ;;  %v178_v15 = vld [vmem:[%s467_s19 + $0x38] sm:$0xff]  ;;  %v179_v24 = vld [vmem:[%s467_s19 + $0x40] sm:$0xff] }
  0x11   : > { %v249_v16 = vadd.f32 %v472_v1, %v210_v5  ;;  %v250_v17 = vadd.f32 %v472_v1, %v211_v6  ;;  %v251_v18 = vadd.f32 %v472_v1, %v212_v7  ;;  %v216_v19 = vmul.f32 %v462_v0, %v177_v14  ;;  %v180_v25 = vld [vmem:[%s467_s19 + $0x48] sm:$0xff]  ;;  %v181_v26 = vld [vmem:[%s467_s19 + $0x50] sm:$0xff]  ;;  %v182_v31 = vld [vmem:[%s467_s19 + $0x58] sm:$0xff] }
  0x12   : > { %v252_v20 = vadd.f32 %v472_v1, %v213_v11  ;;  %v253_v21 = vadd.f32 %v472_v1, %v214_v12  ;;  %v254_v22 = vadd.f32 %v472_v1, %v215_v13  ;;  %v217_v23 = vmul.f32 %v462_v0, %v178_v15  ;;  %v183_v32 = vld [vmem:[%s467_s19 + $0x60] sm:$0xff]  ;;  %v184_v33 = vld [vmem:[%s467_s19 + $0x68] sm:$0xff]  ;;  %v185_v38 = vld [vmem:[%s467_s19 + $0x70] sm:$0xff] }
  0x13   : > { %v281_v27 = vmax.f32 %v249_v16, 0.0  ;;  %v282_v28 = vmax.f32 %v250_v17, 0.0  ;;  %v283_v29 = vmax.f32 %v251_v18, 0.0  ;;  %v255_v30 = vadd.f32 %v472_v1, %v216_v19  ;;  %v186_v43 = vld [vmem:[%s467_s19 + $0x78] sm:$0xff]  ;;  %v187_v56 = vld [vmem:[%s467_s19 + $0x80] sm:$0xff]  ;;  %v188_v57 = vld [vmem:[%s467_s19 + $0x88] sm:$0xff] }
  0x14   : > { %v284_v34 = vmax.f32 %v252_v20, 0.0  ;;  %v285_v35 = vmax.f32 %v253_v21, 0.0  ;;  %v286_v36 = vmax.f32 %v254_v22, 0.0  ;;  %v256_v37 = vadd.f32 %v472_v1, %v217_v23  ;;  %v189_v58 = vld [vmem:[%s467_s19 + $0x90] sm:$0xff]  ;;  %v190_v63 = vld [vmem:[%s467_s19 + $0x98] sm:$0xff]  ;;  %v191_v2 = vld [vmem:[%s467_s19 + $0xa0] sm:$0xff] }
  0x15   : > { %313 = vst [vmem:[%s495_s24] sm:$0xff] %v281_v27  ;;  %314 = vst [vmem:[%s495_s24 + $0x8] sm:$0xff] %v282_v28  ;;  %v287_v39 = vmax.f32 %v255_v30, 0.0  ;;  %v218_v40 = vmul.f32 %v462_v0, %v179_v24  ;;  %v219_v41 = vmul.f32 %v462_v0, %v180_v25  ;;  %v220_v42 = vmul.f32 %v462_v0, %v181_v26  ;;  %v192_v3 = vld [vmem:[%s467_s19 + $0xa8] sm:$0xff]  ;;  %v193_v8 = vld [vmem:[%s467_s19 + $0xb0] sm:$0xff] }
  0x16   : > { %315 = vst [vmem:[%s495_s24 + $0x10] sm:$0xff] %v283_v29  ;;  %316 = vst [vmem:[%s495_s24 + $0x18] sm:$0xff] %v284_v34  ;;  %v288_v44 = vmax.f32 %v256_v37, 0.0  ;;  %v221_v45 = vmul.f32 %v462_v0, %v182_v31  ;;  %v222_v46 = vmul.f32 %v462_v0, %v183_v32  ;;  %v223_v47 = vmul.f32 %v462_v0, %v184_v33  ;;  %v194_v13 = vld [vmem:[%s467_s19 + $0xb8] sm:$0xff]  ;;  %v195_v26 = vld [vmem:[%s467_s19 + $0xc0] sm:$0xff] }
  0x17   : > { %317 = vst [vmem:[%s495_s24 + $0x20] sm:$0xff] %v285_v35  ;;  %318 = vst [vmem:[%s495_s24 + $0x28] sm:$0xff] %v286_v36  ;;  %v257_v48 = vadd.f32 %v472_v1, %v218_v40  ;;  %v258_v49 = vadd.f32 %v472_v1, %v219_v41  ;;  %v259_v50 = vadd.f32 %v472_v1, %v220_v42  ;;  %v196_v27 = vld [vmem:[%s467_s19 + $0xc8] sm:$0xff]  ;;  %v197_v28 = vld [vmem:[%s467_s19 + $0xd0] sm:$0xff] }
  0x18   : > { %319 = vst [vmem:[%s495_s24 + $0x30] sm:$0xff] %v287_v39  ;;  %v224_v51 = vmul.f32 %v462_v0, %v185_v38  ;;  %320 = vst [vmem:[%s495_s24 + $0x38] sm:$0xff] %v288_v44  ;;  %v260_v52 = vadd.f32 %v472_v1, %v221_v45  ;;  %v261_v53 = vadd.f32 %v472_v1, %v222_v46  ;;  %v198_v33 = vld [vmem:[%s467_s19 + $0xd8] sm:$0xff]  ;;  %v199_v34 = vld [vmem:[%s467_s19 + $0xe0] sm:$0xff] }
  0x19   : > { %v262_v54 = vadd.f32 %v472_v1, %v223_v47  ;;  %v225_v55 = vmul.f32 %v462_v0, %v186_v43  ;;  %v289_v59 = vmax.f32 %v257_v48, 0.0  ;;  %v290_v60 = vmax.f32 %v258_v49, 0.0  ;;  %v200_v35 = vld [vmem:[%s467_s19 + $0xe8] sm:$0xff]  ;;  %v201_v40 = vld [vmem:[%s467_s19 + $0xf0] sm:$0xff]  ;;  %v202_v45 = vld [vmem:[%s467_s19 + $0xf8] sm:$0xff] }
  0x1a   : > { %v291_v61 = vmax.f32 %v259_v50, 0.0  ;;  %v263_v62 = vadd.f32 %v472_v1, %v224_v51  ;;  %v292_v4 = vmax.f32 %v260_v52, 0.0  ;;  %v293_v5 = vmax.f32 %v261_v53, 0.0 }
  0x1b   : > { %v294_v6 = vmax.f32 %v262_v54, 0.0  ;;  %v264_v7 = vadd.f32 %v472_v1, %v225_v55  ;;  %321 = vst [vmem:[%s495_s24 + $0x40] sm:$0xff] %v289_v59  ;;  %322 = vst [vmem:[%s495_s24 + $0x48] sm:$0xff] %v290_v60  ;;  %v226_v10 = vmul.f32 %v462_v0, %v187_v56  ;;  %v227_v11 = vmul.f32 %v462_v0, %v188_v57 }
  0x1c   : > { %323 = vst [vmem:[%s495_s24 + $0x50] sm:$0xff] %v291_v61  ;;  %v295_v9 = vmax.f32 %v263_v62, 0.0  ;;  %v228_v12 = vmul.f32 %v462_v0, %v189_v58  ;;  %324 = vst [vmem:[%s495_s24 + $0x58] sm:$0xff] %v292_v4  ;;  %v229_v15 = vmul.f32 %v462_v0, %v190_v63  ;;  %v230_v16 = vmul.f32 %v462_v0, %v191_v2 }
  0x1d   : > { %325 = vst [vmem:[%s495_s24 + $0x60] sm:$0xff] %v293_v5  ;;  %326 = vst [vmem:[%s495_s24 + $0x68] sm:$0xff] %v294_v6  ;;  %v296_v14 = vmax.f32 %v264_v7, 0.0  ;;  %v231_v17 = vmul.f32 %v462_v0, %v192_v3  ;;  %v265_v18 = vadd.f32 %v472_v1, %v226_v10  ;;  %v266_v19 = vadd.f32 %v472_v1, %v227_v11 }
  0x1e   : > { %327 = vst [vmem:[%s495_s24 + $0x70] sm:$0xff] %v295_v9  ;;  %v267_v20 = vadd.f32 %v472_v1, %v228_v12  ;;  %v232_v21 = vmul.f32 %v462_v0, %v193_v8  ;;  %v268_v22 = vadd.f32 %v472_v1, %v229_v15  ;;  %v269_v23 = vadd.f32 %v472_v1, %v230_v16 }
  0x1f   : > { %328 = vst [vmem:[%s495_s24 + $0x78] sm:$0xff] %v296_v14  ;;  %v270_v24 = vadd.f32 %v472_v1, %v231_v17  ;;  %v233_v25 = vmul.f32 %v462_v0, %v194_v13  ;;  %v297_v29 = vmax.f32 %v265_v18, 0.0  ;;  %v298_v30 = vmax.f32 %v266_v19, 0.0 }
  0x20   : > { %v299_v31 = vmax.f32 %v267_v20, 0.0  ;;  %v271_v32 = vadd.f32 %v472_v1, %v232_v21  ;;  %v300_v36 = vmax.f32 %v268_v22, 0.0  ;;  %v301_v37 = vmax.f32 %v269_v23, 0.0 }
  0x21   : > { %v302_v38 = vmax.f32 %v270_v24, 0.0  ;;  %v272_v39 = vadd.f32 %v472_v1, %v233_v25  ;;  %329 = vst [vmem:[%s495_s24 + $0x80] sm:$0xff] %v297_v29  ;;  %330 = vst [vmem:[%s495_s24 + $0x88] sm:$0xff] %v298_v30  ;;  %v234_v42 = vmul.f32 %v462_v0, %v195_v26  ;;  %v235_v43 = vmul.f32 %v462_v0, %v196_v27 }
  0x22   : > { %331 = vst [vmem:[%s495_s24 + $0x90] sm:$0xff] %v299_v31  ;;  %v303_v41 = vmax.f32 %v271_v32, 0.0  ;;  %v236_v44 = vmul.f32 %v462_v0, %v197_v28  ;;  %332 = vst [vmem:[%s495_s24 + $0x98] sm:$0xff] %v300_v36  ;;  %v237_v47 = vmul.f32 %v462_v0, %v198_v33  ;;  %v238_v48 = vmul.f32 %v462_v0, %v199_v34 }
  0x23   : > { %333 = vst [vmem:[%s495_s24 + $0xa0] sm:$0xff] %v301_v37  ;;  %334 = vst [vmem:[%s495_s24 + $0xa8] sm:$0xff] %v302_v38  ;;  %v304_v46 = vmax.f32 %v272_v39, 0.0  ;;  %v239_v49 = vmul.f32 %v462_v0, %v200_v35  ;;  %v273_v50 = vadd.f32 %v472_v1, %v234_v42  ;;  %v274_v51 = vadd.f32 %v472_v1, %v235_v43 }
  0x24   : > { %335 = vst [vmem:[%s495_s24 + $0xb0] sm:$0xff] %v303_v41  ;;  %v275_v52 = vadd.f32 %v472_v1, %v236_v44  ;;  %v240_v53 = vmul.f32 %v462_v0, %v201_v40  ;;  %v276_v54 = vadd.f32 %v472_v1, %v237_v47  ;;  %v277_v55 = vadd.f32 %v472_v1, %v238_v48 }
  0x25   : > { %336 = vst [vmem:[%s495_s24 + $0xb8] sm:$0xff] %v304_v46  ;;  %v278_v56 = vadd.f32 %v472_v1, %v239_v49  ;;  %v241_v57 = vmul.f32 %v462_v0, %v202_v45  ;;  %v305_v58 = vmax.f32 %v273_v50, 0.0  ;;  %v306_v59 = vmax.f32 %v274_v51, 0.0 }
  0x26   : > { %v307_v60 = vmax.f32 %v275_v52, 0.0  ;;  %v279_v61 = vadd.f32 %v472_v1, %v240_v53  ;;  %v308_v62 = vmax.f32 %v276_v54, 0.0  ;;  %v309_v63 = vmax.f32 %v277_v55, 0.0 }
  0x27   : > { %v310_v2 = vmax.f32 %v278_v56, 0.0  ;;  %v280_v3 = vadd.f32 %v472_v1, %v241_v57  ;;  %337 = vst [vmem:[%s495_s24 + $0xc0] sm:$0xff] %v305_v58  ;;  %338 = vst [vmem:[%s495_s24 + $0xc8] sm:$0xff] %v306_v59 }
  0x28   : > { %339 = vst [vmem:[%s495_s24 + $0xd0] sm:$0xff] %v307_v60  ;;  %v311_v4 = vmax.f32 %v279_v61, 0.0  ;;  %340 = vst [vmem:[%s495_s24 + $0xd8] sm:$0xff] %v308_v62 }
  0x29   : > { %341 = vst [vmem:[%s495_s24 + $0xe0] sm:$0xff] %v309_v63  ;;  %342 = vst [vmem:[%s495_s24 + $0xe8] sm:$0xff] %v310_v2  ;;  %v312_v0 = vmax.f32 %v280_v3, 0.0 }
  0x2a   : > { %343 = vst [vmem:[%s495_s24 + $0xf0] sm:$0xff] %v311_v4 }
  0x2b   : > { %344 = vst [vmem:[%s495_s24 + $0xf8] sm:$0xff] %v312_v0 }
  0x2c PF: > { %s13_s12 = sadd.s32 1, %s429_s12  }
  0x2d   : > { %p10_p4 = scmp.ge.s32.totalorder %s13_s12, 4  }
  0x2f   :  { %12 = sbr.rel (!%p10_p4) target bundleno = 1 (0x1), region = 62 }

// kernel: conv_block_forward.3
= control target key start
LH: loop header
LB: loop body
LE: loop exit
PB: predicated region body
PF: predicated region fallthrough
CT: control target
= control target key end

     0   :  { %s2467_s21 = smov 0   ;;  %s3899_s0 = inlined_call_operand.vmem [shape: f32[2,16,16,128], index: 0, kind: input, shape index: {}]   ;;  %s3900_s1 = inlined_call_operand.vmem [shape: f32[1152,128], index: 1, kind: input, shape index: {}]   ;;  %s3901_s2 = inlined_call_operand.vmem [shape: f32[1,128], index: 2, kind: input, shape index: {}]   ;;  %s3902_s3 = inlined_call_operand.vmem [shape: f32[1,128], index: 3, kind: input, shape index: {}]   ;;  %s3903_s4 = inlined_call_operand.vmem [shape: f32[2,16,16,128], index: 4, kind: output, shape index: {0}]   ;;  %s3904_s5 = inlined_call_operand.vmem [shape: f32[2,8,128], index: 5, kind: output, shape index: {1}]   ;;  %s3905_s6 = inlined_call_operand.vmem [shape: f32[2,8,128], index: 6, kind: output, shape index: {2}]  }
   0x1 LB: > { %s2207_s2 = sadd.s32 4294967295, %s2429_s21   ;;  %p2211_p0 = scmp.ge.s32.totalorder %s2429_s21, 1  ;;  %s2429_s21 = sphi %s2467_s21, %s17_s21  }
   0x2   : > { %p217_p1 = scmp.lt.s32.totalorder %s2429_s21, 3 }
   0x4   : > { %p218_p2 = pnand %p2211_p0, %p217_p1 }
   0x6   : > { %221 = sbr.rel (%p218_p2) target bundleno = 609 (0x261), region = 36 }
   0xb   : > { %v696_v0 = vld [vmem:[%s3900_s1 + $0x78] sm:$0xff]  ;;  %v2431_v2 = vmov 0.0   ;;  %v695_v3 = vld [vmem:[%s3900_s1 + $0x70] sm:$0xff]  ;;  %v694_v5 = vld [vmem:[%s3900_s1 + $0x68] sm:$0xff]  ;;  %p255_p3 = scmp.lt.s32.totalorder %s2207_s2, 1 }
   0xc   : > { %v728_v1 = vld [vmem:[%s3900_s1 + $0x178] sm:$0xff]  ;;  %825 = vmatprep.subr.mxu0 %v2431_v2  ;;  %305 = vst [vmem:[#allocation2] sm:$0xff] %v2431_v2  ;;  %306 = vst [vmem:[#allocation2 + $0x8] sm:$0xff] %v2431_v2  ;;  %1050 = vmatprep.subr.mxu1 %v2431_v2  ;;  %v727_v4 = vld [vmem:[%s3900_s1 + $0x170] sm:$0xff] }
   0xd   : > { %307 = vst [vmem:[#allocation2 + $0x10] sm:$0x3] %v2431_v2  ;;  %308 = vst [vmem:[#allocation2 + $0x18] sm:$0xff] %v2431_v2  ;;  %826 = vmatpush1.msra.mxu0 %v696_v0  ;;  %1051 = vmatpush1.msra.mxu1 %v728_v1  ;;  %v726_v6 = vld [vmem:[%s3900_s1 + $0x168] sm:$0xff]  ;;  %v693_v7 = vld [vmem:[%s3900_s1 + $0x60] sm:$0xff]  ;;  %s3930_s2 = smov (!%p255_p3, %s2207_s2), 1 }
   0xe   : > { %309 = vst [vmem:[#allocation2 + $0x20] sm:$0xff] %v2431_v2  ;;  %310 = vst [vmem:[#allocation2 + $0x28] sm:$0x3] %v2431_v2  ;;  %827 = vmatprep.subr.mxu0 %v2431_v2  ;;  %1052 = vmatprep.subr.mxu1 %v2431_v2  ;;  %v725_v8 = vld [vmem:[%s3900_s1 + $0x160] sm:$0xff]  ;;  %v692_v9 = vld [vmem:[%s3900_s1 + $0x58] sm:$0xff]  ;;  %s2220_s9 = sshll.u32 %s3930_s2, 8 }
   0xf   : > { %311 = vst [vmem:[#allocation2 + $0x30] sm:$0xff] %v2431_v2  ;;  %312 = vst [vmem:[#allocation2 + $0x38] sm:$0xff] %v2431_v2  ;;  %828 = vmatpush1.msra.mxu0 %v695_v3  ;;  %1053 = vmatpush1.msra.mxu1 %v727_v4  ;;  %v724_v10 = vld [vmem:[%s3900_s1 + $0x158] sm:$0xff]  ;;  %v691_v11 = vld [vmem:[%s3900_s1 + $0x50] sm:$0xff]  ;;  %s2619_s16 = scalar_lea.vmem %s3899_s0, %s2220_s9  ;;  %s3711_s18 = scalar_lea.vmem %s3903_s4, %s2220_s9 }
  0x10   : > { %313 = vst [vmem:[#allocation2 + $0x40] sm:$0x3] %v2431_v2  ;;  %314 = vst [vmem:[#allocation2 + $0x48] sm:$0xff] %v2431_v2  ;;  %829 = vmatprep.subr.mxu0 %v2431_v2  ;;  %1054 = vmatprep.subr.mxu1 %v2431_v2  ;;  %v723_v12 = vld [vmem:[%s3900_s1 + $0x150] sm:$0xff]  ;;  %v690_v13 = vld [vmem:[%s3900_s1 + $0x48] sm:$0xff]  ;;  %s2216_s9 = sshll.u32 %s3930_s2, 3 }
  0x11   : > { %315 = vst [vmem:[#allocation2 + $0x50] sm:$0xff] %v2431_v2  ;;  %316 = vst [vmem:[#allocation2 + $0x58] sm:$0x3] %v2431_v2  ;;  %830 = vmatpush1.msra.mxu0 %v694_v5  ;;  %1055 = vmatpush1.msra.mxu1 %v726_v6  ;;  %v722_v14 = vld [vmem:[%s3900_s1 + $0x148] sm:$0xff]  ;;  %v689_v15 = vld [vmem:[%s3900_s1 + $0x40] sm:$0xff]  ;;  %s268_s3 = scalar_lea.vmem %s3904_s5, %s2216_s9  ;;  %s272_s24 = scalar_lea.vmem %s3905_s6, %s2216_s9 }
  0x12   : > { %317 = vst [vmem:[#allocation2 + $0x60] sm:$0xff] %v2431_v2  ;;  %318 = vst [vmem:[#allocation2 + $0x68] sm:$0xff] %v2431_v2  ;;  %831 = vmatprep.subr.mxu0 %v2431_v2  ;;  %1056 = vmatprep.subr.mxu1 %v2431_v2  ;;  %v721_v16 = vld [vmem:[%s3900_s1 + $0x140] sm:$0xff]  ;;  %v688_v17 = vld [vmem:[%s3900_s1 + $0x38] sm:$0xff] }
  0x13   : > { %319 = vst [vmem:[#allocation2 + $0x70] sm:$0x3] %v2431_v2  ;;  %320 = vst [vmem:[#allocation2 + $0x78] sm:$0xff] %v2431_v2  ;;  %832 = vmatpush1.msra.mxu0 %v693_v7  ;;  %1057 = vmatpush1.msra.mxu1 %v725_v8  ;;  %v720_v18 = vld [vmem:[%s3900_s1 + $0x138] sm:$0xff]  ;;  %v687_v19 = vld [vmem:[%s3900_s1 + $0x30] sm:$0xff] }
  0x14   : > { %321 = vst [vmem:[#allocation2 + $0x80] sm:$0xff] %v2431_v2  ;;  %322 = vst [vmem:[#allocation2 + $0x88] sm:$0x3] %v2431_v2  ;;  %833 = vmatprep.subr.mxu0 %v2431_v2  ;;  %1058 = vmatprep.subr.mxu1 %v2431_v2  ;;  %v719_v20 = vld [vmem:[%s3900_s1 + $0x130] sm:$0xff]  ;;  %v686_v21 = vld [vmem:[%s3900_s1 + $0x28] sm:$0xff] }
  0x15   : > { %323 = vst [vmem:[#allocation2 + $0x90] sm:$0xff] %v2431_v2  ;;  %324 = vst [vmem:[#allocation2 + $0x98] sm:$0xff] %v2431_v2  ;;  %834 = vmatpush1.msra.mxu0 %v692_v9  ;;  %1059 = vmatpush1.msra.mxu1 %v724_v10  ;;  %v718_v22 = vld [vmem:[%s3900_s1 + $0x128] sm:$0xff]  ;;  %v685_v23 = vld [vmem:[%s3900_s1 + $0x20] sm:$0xff] }
  0x16   : > { %325 = vst [vmem:[#allocation2 + $0xa0] sm:$0x3] %v2431_v2  ;;  %326 = vst [vmem:[#allocation2 + $0xa8] sm:$0xff] %v2431_v2  ;;  %835 = vmatprep.subr.mxu0 %v2431_v2  ;;  %1060 = vmatprep.subr.mxu1 %v2431_v2  ;;  %v717_v24 = vld [vmem:[%s3900_s1 + $0x120] sm:$0xff]  ;;  %v684_v26 = vld [vmem:[%s3900_s1 + $0x18] sm:$0xff] }
  0x17   : > { %327 = vst [vmem:[#allocation2 + $0xb0] sm:$0xff] %v2431_v2  ;;  %328 = vst [vmem:[#allocation2 + $0xb8] sm:$0x3] %v2431_v2  ;;  %836 = vmatpush1.msra.mxu0 %v691_v11  ;;  %1061 = vmatpush1.msra.mxu1 %v723_v12  ;;  %v2638_v25 = vld [vmem:[%s2619_s16] sm:$0xff]  ;;  %v716_v27 = vld [vmem:[%s3900_s1 + $0x118] sm:$0xff] }
  0x18   : > { %329 = vst [vmem:[#allocation2 + $0xc0] sm:$0xff] %v2431_v2  ;;  %330 = vst [vmem:[#allocation2 + $0xc8] sm:$0xff] %v2431_v2  ;;  %837 = vmatprep.subr.mxu0 %v2431_v2  ;;  %1062 = vmatprep.subr.mxu1 %v2431_v2  ;;  %v2650_v28 = vld [vmem:[%s2619_s16 + $0x8] sm:$0xff]  ;;  %v2654_v29 = vld [vmem:[%s2619_s16 + $0x10] sm:$0xff] }
  0x19   : > { %331 = vst [vmem:[#allocation2 + $0xd0] sm:$0x3] %v2431_v2  ;;  %332 = vst [vmem:[#allocation2 + $0xd8] sm:$0xff] %v2431_v2  ;;  %838 = vmatpush1.msra.mxu0 %v690_v13  ;;  %1063 = vmatpush1.msra.mxu1 %v722_v14  ;;  %v2657_v30 = vld [vmem:[%s2619_s16 + $0x18] sm:$0xff]  ;;  %v683_v31 = vld [vmem:[%s3900_s1 + $0x10] sm:$0xff] }
  0x1a   : > { %333 = vst [vmem:[#allocation2 + $0xe0] sm:$0xff] %v2431_v2  ;;  %334 = vst [vmem:[#allocation2 + $0xe8] sm:$0x3] %v2431_v2  ;;  %839 = vmatprep.subr.mxu0 %v2431_v2  ;;  %1064 = vmatprep.subr.mxu1 %v2431_v2  ;;  %v715_v32 = vld [vmem:[%s3900_s1 + $0x110] sm:$0xff]  ;;  %v2670_v33 = vld [vmem:[%s2619_s16 + $0x20] sm:$0xff] }
  0x1b   : > { %335 = vst [vmem:[#allocation2 + $0xf0] sm:$0xff] %v2431_v2  ;;  %336 = vst [vmem:[#allocation2 + $0xf8] sm:$0xff] %v2431_v2  ;;  %840 = vmatpush1.msra.mxu0 %v689_v15  ;;  %1065 = vmatpush1.msra.mxu1 %v721_v16  ;;  %v2674_v34 = vld [vmem:[%s2619_s16 + $0x28] sm:$0xff]  ;;  %v2677_v35 = vld [vmem:[%s2619_s16 + $0x30] sm:$0xff] }
  0x1c   : > { %337 = vst [vmem:[#allocation2 + $0x100] sm:$0x3] %v2431_v2  ;;  %338 = vst [vmem:[#allocation2 + $0x108] sm:$0xff] %v2431_v2  ;;  %841 = vmatprep.subr.mxu0 %v2431_v2  ;;  %1066 = vmatprep.subr.mxu1 %v2431_v2  ;;  %v682_v36 = vld [vmem:[%s3900_s1 + $0x8] sm:$0xff]  ;;  %v2690_v38 = vld [vmem:[%s2619_s16 + $0x38] sm:$0xff] }
  0x1d   : > { %339 = vst [vmem:[#allocation2 + $0x110] sm:$0xff] %v2431_v2  ;;  %340 = vst [vmem:[#allocation2 + $0x118] sm:$0x3] %v2431_v2  ;;  %842 = vmatpush1.msra.mxu0 %v688_v17  ;;  %1067 = vmatpush1.msra.mxu1 %v720_v18  ;;  %v714_v37 = vld [vmem:[%s3900_s1 + $0x108] sm:$0xff]  ;;  %v2694_v39 = vld [vmem:[%s2619_s16 + $0x40] sm:$0xff] }
  0x1e   : > { %341 = vst [vmem:[#allocation2 + $0x120] sm:$0xff] %v2431_v2  ;;  %342 = vst [vmem:[#allocation2 + $0x128] sm:$0xff] %v2431_v2  ;;  %843 = vmatprep.subr.mxu0 %v2431_v2  ;;  %1068 = vmatprep.subr.mxu1 %v2431_v2  ;;  %v681_v40 = vld [vmem:[%s3900_s1] sm:$0xff]  ;;  %v2706_v42 = vld [vmem:[%s2619_s16 + $0x48] sm:$0xff] }
  0x1f   : > { %343 = vst [vmem:[#allocation2 + $0x130] sm:$0x3] %v2431_v2  ;;  %344 = vst [vmem:[#allocation2 + $0x138] sm:$0xff] %v2431_v2  ;;  %844 = vmatpush1.msra.mxu0 %v687_v19  ;;  %1069 = vmatpush1.msra.mxu1 %v719_v20  ;;  %v713_v41 = vld [vmem:[%s3900_s1 + $0x100] sm:$0xff]  ;;  %v2710_v43 = vld [vmem:[%s2619_s16 + $0x50] sm:$0xff] }
  0x20   : > { %345 = vst [vmem:[#allocation2 + $0x140] sm:$0xff] %v2431_v2  ;;  %346 = vst [vmem:[#allocation2 + $0x148] sm:$0x3] %v2431_v2  ;;  %845 = vmatprep.subr.mxu0 %v2431_v2  ;;  %1070 = vmatprep.subr.mxu1 %v2431_v2  ;;  %v712_v44 = vld [vmem:[%s3900_s1 + $0xf8] sm:$0xff]  ;;  %v711_v46 = vld [vmem:[%s3900_s1 + $0xf0] sm:$0xff] }
  0x21   : > { %347 = vst [vmem:[#allocation2 + $0x150] sm:$0xff] %v2431_v2  ;;  %348 = vst [vmem:[#allocation2 + $0x158] sm:$0xff] %v2431_v2  ;;  %846 = vmatpush1.msra.mxu0 %v686_v21  ;;  %1071 = vmatpush1.msra.mxu1 %v718_v22  ;;  %v744_v45 = vld [vmem:[%s3900_s1 + $0x1f8] sm:$0xff]  ;;  %v743_v47 = vld [vmem:[%s3900_s1 + $0x1f0] sm:$0xff] }
  0x22   : > { %349 = vst [vmem:[#allocation2 + $0x160] sm:$0x3] %v2431_v2  ;;  %350 = vst [vmem:[#allocation2 + $0x168] sm:$0xff] %v2431_v2  ;;  %847 = vmatprep.subr.mxu0 %v2431_v2  ;;  %1072 = vmatprep.subr.mxu1 %v2431_v2  ;;  %v710_v48 = vld [vmem:[%s3900_s1 + $0xe8] sm:$0xff]  ;;  %v2738_v50 = vld [vmem:[%s2619_s16 + $0x58] sm:$0xff] }
  0x23   : > { %351 = vst [vmem:[#allocation2 + $0x170] sm:$0xff] %v2431_v2  ;;  %352 = vst [vmem:[#allocation2 + $0x178] sm:$0x3] %v2431_v2  ;;  %848 = vmatpush1.msra.mxu0 %v685_v23  ;;  %1073 = vmatpush1.msra.mxu1 %v717_v24  ;;  %v742_v49 = vld [vmem:[%s3900_s1 + $0x1e8] sm:$0xff]  ;;  %v709_v51 = vld [vmem:[%s3900_s1 + $0xe0] sm:$0xff] }
  0x24   : > { %353 = vst [vmem:[#allocation2 + $0x180] sm:$0xff] %v2431_v2  ;;  %354 = vst [vmem:[#allocation2 + $0x188] sm:$0xff] %v2431_v2  ;;  %849 = vmatprep.subr.mxu0 %v2431_v2  ;;  %1074 = vmatprep.subr.mxu1 %v2431_v2  ;;  %v741_v52 = vld [vmem:[%s3900_s1 + $0x1e0] sm:$0xff]  ;;  %v708_v53 = vld [vmem:[%s3900_s1 + $0xd8] sm:$0xff] }
  0x25   : > { %355 = vst [vmem:[#allocation2 + $0x190] sm:$0x3] %v2431_v2  ;;  %356 = vst [vmem:[#allocation2 + $0x198] sm:$0xff] %v2431_v2  ;;  %850 = vmatpush1.msra.mxu0 %v684_v26  ;;  %1075 = vmatpush1.msra.mxu1 %v716_v27  ;;  %v740_v54 = vld [vmem:[%s3900_s1 + $0x1d8] sm:$0xff]  ;;  %v2758_v55 = vld [vmem:[%s2619_s16 + $0x60] sm:$0xff] }
  0x26   : > { %357 = vst [vmem:[#allocation2 + $0x1a0] sm:$0xff] %v2431_v2  ;;  %358 = vst [vmem:[#allocation2 + $0x1a8] sm:$0x3] %v2431_v2  ;;  %851 = vmatprep.subr.mxu0 %v2431_v2  ;;  %1076 = vmatprep.subr.mxu1 %v2431_v2  ;;  %v2762_v56 = vld [vmem:[%s2619_s16 + $0x68] sm:$0xff]  ;;  %v707_v57 = vld [vmem:[%s3900_s1 + $0xd0] sm:$0xff] }
  0x27   : > { %360 = vst [vmem:[#allocation2 + $0x19] sm:$0xff] %v2638_v25  ;;  %361 = vst [vmem:[#allocation2 + $0x21] sm:$0xff] %v2650_v28  ;;  %852 = vmatpush1.msra.mxu0 %v683_v31  ;;  %1077 = vmatpush1.msra.mxu1 %v715_v32  ;;  %v739_v58 = vld [vmem:[%s3900_s1 + $0x1d0] sm:$0xff]  ;;  %v2778_v60 = vld [vmem:[%s2619_s16 + $0x78] sm:$0xff] }
  0x28   : > { %362 = vst [vmem:[#allocation2 + $0x31] sm:$0xff] %v2654_v29  ;;  %363 = vst [vmem:[#allocation2 + $0x39] sm:$0xff] %v2657_v30  ;;  %853 = vmatprep.subr.mxu0 %v2431_v2  ;;  %1078 = vmatprep.subr.mxu1 %v2431_v2  ;;  %v2774_v59 = vld [vmem:[%s2619_s16 + $0x70] sm:$0xff]  ;;  %v706_v61 = vld [vmem:[%s3900_s1 + $0xc8] sm:$0xff] }
  0x29   : > { %364 = vst [vmem:[#allocation2 + $0x49] sm:$0xff] %v2670_v33  ;;  %365 = vst [vmem:[#allocation2 + $0x51] sm:$0xff] %v2674_v34  ;;  %854 = vmatpush1.msra.mxu0 %v682_v36  ;;  %1079 = vmatpush1.msra.mxu1 %v714_v37  ;;  %v738_v62 = vld [vmem:[%s3900_s1 + $0x1c8] sm:$0xff]  ;;  %v2790_v63 = vld [vmem:[%s2619_s16 + $0x80] sm:$0xff] }
  0x2a   : > { %366 = vst [vmem:[#allocation2 + $0x61] sm:$0xff] %v2677_v35  ;;  %367 = vst [vmem:[#allocation2 + $0x69] sm:$0xff] %v2690_v38  ;;  %855 = vmatprep.subr.mxu0 %v2431_v2  ;;  %1080 = vmatprep.subr.mxu1 %v2431_v2  ;;  %v705_v0 = vld [vmem:[%s3900_s1 + $0xc0] sm:$0xff]  ;;  %v2802_v3 = vld [vmem:[%s2619_s16 + $0x88] sm:$0xff] }
  0x2b   : > { %368 = vst [vmem:[#allocation2 + $0x79] sm:$0xff] %v2694_v39  ;;  %369 = vst [vmem:[#allocation2 + $0x81] sm:$0xff] %v2706_v42  ;;  %856 = vmatpush1.msra.mxu0 %v681_v40  ;;  %1081 = vmatpush1.msra.mxu1 %v713_v41  ;;  %v737_v1 = vld [vmem:[%s3900_s1 + $0x1c0] sm:$0xff]  ;;  %v2806_v4 = vld [vmem:[%s2619_s16 + $0x90] sm:$0xff] }
  0x2c   : > { %370 = vst [vmem:[#allocation2 + $0x91] sm:$0xff] %v2710_v43  ;;  %857 = vmatprep.subr.mxu0 %v2431_v2  ;;  %1082 = vmatprep.subr.mxu1 %v2431_v2  ;;  %371 = vst [vmem:[#allocation2 + $0x99] sm:$0xff] %v2738_v50  ;;  %v704_v5 = vld [vmem:[%s3900_s1 + $0xb8] sm:$0xff]  ;;  %v703_v8 = vld [vmem:[%s3900_s1 + $0xb0] sm:$0xff] }
  0x2d   : > { %858 = vmatpush2.msra.mxu0 %v712_v44  ;;  %1083 = vmatpush2.msra.mxu1 %v744_v45  ;;  %372 = vst [vmem:[#allocation2 + $0xa9] sm:$0xff] %v2758_v55  ;;  %373 = vst [vmem:[#allocation2 + $0xb1] sm:$0xff] %v2762_v56  ;;  %v736_v6 = vld [vmem:[%s3900_s1 + $0x1b8] sm:$0xff]  ;;  %v735_v9 = vld [vmem:[%s3900_s1 + $0x1b0] sm:$0xff] }
  0x2e   : > { %859 = vmatprep.subr.mxu0 %v2431_v2  ;;  %1084 = vmatprep.subr.mxu1 %v2431_v2  ;;  %374 = vst [vmem:[#allocation2 + $0xc1] sm:$0xff] %v2774_v59  ;;  %375 = vst [vmem:[#allocation2 + $0xc9] sm:$0xff] %v2778_v60  ;;  %v2818_v7 = vld [vmem:[%s2619_s16 + $0x98] sm:$0xff]  ;;  %v2830_v10 = vld [vmem:[%s2619_s16 + $0xa0] sm:$0xff] }
  0x2f   : > { %860 = vmatpush2.msra.mxu0 %v711_v46  ;;  %1085 = vmatpush2.msra.mxu1 %v743_v47  ;;  %376 = vst [vmem:[#allocation2 + $0xd9] sm:$0xff] %v2790_v63  ;;  %377 = vst [vmem:[#allocation2 + $0xe1] sm:$0xff] %v2802_v3  ;;  %v702_v11 = vld [vmem:[%s3900_s1 + $0xa8] sm:$0xff]  ;;  %v701_v14 = vld [vmem:[%s3900_s1 + $0xa0] sm:$0xff] }
  0x30   : > { %861 = vmatprep.subr.mxu0 %v2431_v2  ;;  %1086 = vmatprep.subr.mxu1 %v2431_v2  ;;  %378 = vst [vmem:[#allocation2 + $0xf1] sm:$0xff] %v2806_v4  ;;  %379 = vst [vmem:[#allocation2 + $0xf9] sm:$0xff] %v2818_v7  ;;  %v734_v12 = vld [vmem:[%s3900_s1 + $0x1a8] sm:$0xff]  ;;  %v733_v15 = vld [vmem:[%s3900_s1 + $0x1a0] sm:$0xff] }
  0x31   : > { %862 = vmatpush2.msra.mxu0 %v710_v48  ;;  %1087 = vmatpush2.msra.mxu1 %v742_v49  ;;  %380 = vst [vmem:[#allocation2 + $0x109] sm:$0xff] %v2830_v10  ;;  %v2842_v13 = vld [vmem:[%s2619_s16 + $0xa8] sm:$0xff]  ;;  %v2854_v16 = vld [vmem:[%s2619_s16 + $0xb0] sm:$0xff]  ;;  %v700_v17 = vld [vmem:[%s3900_s1 + $0x98] sm:$0xff] }
  0x32   : > { %863 = vmatprep.subr.mxu0 %v2431_v2  ;;  %1088 = vmatprep.subr.mxu1 %v2431_v2  ;;  %381 = vst [vmem:[#allocation2 + $0x111] sm:$0xff] %v2842_v13  ;;  %v732_v18 = vld [vmem:[%s3900_s1 + $0x198] sm:$0xff]  ;;  %382 = vst [vmem:[#allocation2 + $0x121] sm:$0xff] %v2854_v16  ;;  %v699_v20 = vld [vmem:[%s3900_s1 + $0x90] sm:$0xff] }
  0x33   : > { %864 = vmatpush2.msra.mxu0 %v709_v51  ;;  %1089 = vmatpush2.msra.mxu1 %v741_v52  ;;  %v2866_v19 = vld [vmem:[%s2619_s16 + $0xb8] sm:$0xff]  ;;  %v731_v21 = vld [vmem:[%s3900_s1 + $0x190] sm:$0xff]  ;;  %v2878_v22 = vld [vmem:[%s2619_s16 + $0xc0] sm:$0xff] }
  0x34   : > { %865 = vmatprep.subr.mxu0 %v2431_v2  ;;  %1090 = vmatprep.subr.mxu1 %v2431_v2  ;;  %383 = vst [vmem:[#allocation2 + $0x129] sm:$0xff] %v2866_v19  ;;  %384 = vst [vmem:[#allocation2 + $0x139] sm:$0xff] %v2878_v22  ;;  %v2882_v23 = vld [vmem:[%s2619_s16 + $0xc8] sm:$0xff]  ;;  %v697_v27 = vld [vmem:[%s3900_s1 + $0x80] sm:$0xff] }
  0x35   : > { %866 = vmatpush2.msra.mxu0 %v708_v53  ;;  %1091 = vmatpush2.msra.mxu1 %v740_v54  ;;  %v698_v24 = vld [vmem:[%s3900_s1 + $0x88] sm:$0xff]  ;;  %385 = vst [vmem:[#allocation2 + $0x141] sm:$0xff] %v2882_v23  ;;  %v2899_v32 = vld [vmem:[%s2619_s16 + $0xd0] sm:$0xff]  ;;  %v729_v36 = vld [vmem:[%s3900_s1 + $0x180] sm:$0xff] }
  0x36   : > { %867 = vmatprep.subr.mxu0 %v2431_v2  ;;  %1092 = vmatprep.subr.mxu1 %v2431_v2  ;;  %v730_v26 = vld [vmem:[%s3900_s1 + $0x188] sm:$0xff]  ;;  %v488_v37 = vld [vmem:[#allocation2 + $0x18] sm:$0xff]  ;;  %386 = vst [vmem:[#allocation2 + $0x151] sm:$0xff] %v2899_v32  ;;  %v489_v46 = vld [vmem:[#allocation2 + $0x20] sm:$0xff] }
  0x37   : > { %868 = vmatpush2.msra.mxu0 %v707_v57  ;;  %1093 = vmatpush2.msra.mxu1 %v739_v58  ;;  %v424_v31 = vld [vmem:[#allocation2 + $0x1] sm:$0xff]  ;;  %v2906_v40 = vld [vmem:[%s2619_s16 + $0xd8] sm:$0xff]  ;;  %v425_v44 = vld [vmem:[#allocation2 + $0x9] sm:$0xff] }
  0x38   : > { %869 = vmatprep.subr.mxu0 %v2431_v2  ;;  %1094 = vmatprep.subr.mxu1 %v2431_v2  ;;  %v456_v41 = vld [vmem:[#allocation2 + $0x2] sm:$0xff]  ;;  %387 = vst [vmem:[#allocation2 + $0x159] sm:$0xff] %v2906_v40  ;;  %v760_v45 = vld [vmem:[%s3900_s1 + $0x278] sm:$0xff]  ;;  %v457_v48 = vld [vmem:[#allocation2 + $0xa] sm:$0xff] }
  0x39   : > { %870 = vmatpush2.msra.mxu0 %v706_v61  ;;  %1095 = vmatpush2.msra.mxu1 %v738_v62  ;;  %v2915_v47 = vld [vmem:[%s2619_s16 + $0xe0] sm:$0xff]  ;;  %v2921_v49 = vld [vmem:[%s2619_s16 + $0xe8] sm:$0xff]  ;;  %v759_v51 = vld [vmem:[%s3900_s1 + $0x270] sm:$0xff] }
  0x3a   : > { %871 = vmatprep.subr.mxu0 %v2431_v2  ;;  %1096 = vmatprep.subr.mxu1 %v2431_v2  ;;  %388 = vst [vmem:[#allocation2 + $0x169] sm:$0xff] %v2915_v47  ;;  %389 = vst [vmem:[#allocation2 + $0x171] sm:$0xff] %v2921_v49  ;;  %v2928_v52 = vld [vmem:[#allocation2 + $0x30] sm:$0xff]  ;;  %v758_v54 = vld [vmem:[%s3900_s1 + $0x268] sm:$0xff] }
  0x3b   : > { %872 = vmatpush2.msra.mxu0 %v705_v0  ;;  %1097 = vmatpush2.msra.mxu1 %v737_v1  ;;  %v303_v53 = vld [vmem:[%s2619_s16 + $0xf0] sm:$0xff]  ;;  %v792_v57 = vld [vmem:[%s3900_s1 + $0x378] sm:$0xff]  ;;  %v757_v0 = vld [vmem:[%s3900_s1 + $0x260] sm:$0xff] }
  0x3c   : > { %873 = vmatprep.subr.mxu0 %v2431_v2  ;;  %1098 = vmatprep.subr.mxu1 %v2431_v2  ;;  %390 = vst [vmem:[#allocation2 + $0x181] sm:$0xff] %v303_v53  ;;  %v2940_v58 = vld [vmem:[#allocation2 + $0x1a] sm:$0xff]  ;;  %v2956_v1 = vld [vmem:[#allocation2 + $0x22] sm:$0xff] }
  0x3d   : > { %874 = vmatpush2.msra.mxu0 %v704_v5  ;;  %1099 = vmatpush2.msra.mxu1 %v736_v6  ;;  %v304_v61 = vld [vmem:[%s2619_s16 + $0xf8] sm:$0xff]  ;;  %v2959_v5 = vld [vmem:[#allocation2 + $0x48] sm:$0xff] }
  0x3e   : > { %875 = vmatprep.subr.mxu0 %v2431_v2  ;;  %1100 = vmatprep.subr.mxu1 %v2431_v2  ;;  %v2945_v62 = vld [vmem:[#allocation2 + $0x38] sm:$0xff]  ;;  %391 = vst [vmem:[#allocation2 + $0x189] sm:$0xff] %v304_v61  ;;  %v3086_v53 = vld [vmem:[#allocation2 + $0xa8] sm:$0xff]  ;;  %v3102_v61 = vld [vmem:[#allocation2 + $0xb0] sm:$0xff] }
  0x3f   : > { %876 = vmatpush2.msra.mxu0 %v703_v8  ;;  %1101 = vmatpush2.msra.mxu1 %v735_v9  ;;  %v756_v6 = vld [vmem:[%s3900_s1 + $0x258] sm:$0xff]  ;;  %v2974_v9 = vld [vmem:[#allocation2 + $0x50] sm:$0xff] }
  0x40   : > { %877 = vmatprep.subr.mxu0 %v2431_v2  ;;  %1102 = vmatprep.subr.mxu1 %v2431_v2  ;;  %v2971_v8 = vld [vmem:[#allocation2 + $0x32] sm:$0xff] }
  0x41   : > { %878 = vmatpush2.msra.mxu0 %v702_v11  ;;  %1103 = vmatpush2.msra.mxu1 %v734_v12  ;;  %v789_v11 = vld [vmem:[%s3900_s1 + $0x360] sm:$0xff] }
  0x42   : > { %879 = vmatprep.subr.mxu0 %v2431_v2  ;;  %1104 = vmatprep.subr.mxu1 %v2431_v2  ;;  %v2987_v12 = vld [vmem:[#allocation2 + $0x3a] sm:$0xff] }
  0x43   : > { %880 = vmatpush2.msra.mxu0 %v701_v14  ;;  %1105 = vmatpush2.msra.mxu1 %v733_v15  ;;  %v2990_v14 = vld [vmem:[#allocation2 + $0x60] sm:$0xff]  ;;  %v788_v15 = vld [vmem:[%s3900_s1 + $0x358] sm:$0xff] }
  0x44   : > { %881 = vmatprep.subr.mxu0 %v2431_v2  ;;  %1106 = vmatprep.subr.mxu1 %v2431_v2 }
  0x45   : > { %882 = vmatpush2.msra.mxu0 %v700_v17  ;;  %1107 = vmatpush2.msra.mxu1 %v732_v18  ;;  %v3003_v17 = vld [vmem:[#allocation2 + $0x4a] sm:$0xff] }
  0x46   : > { %883 = vmatprep.subr.mxu0 %v2431_v2  ;;  %1108 = vmatprep.subr.mxu1 %v2431_v2  ;;  %v3006_v18 = vld [vmem:[#allocation2 + $0x68] sm:$0xff] }
  0x47   : > { %884 = vmatpush2.msra.mxu0 %v699_v20  ;;  %1109 = vmatpush2.msra.mxu1 %v731_v21  ;;  %v787_v20 = vld [vmem:[%s3900_s1 + $0x350] sm:$0xff] }
  0x48   : > { %885 = vmatprep.subr.mxu0 %v2431_v2  ;;  %1110 = vmatprep.subr.mxu1 %v2431_v2  ;;  %v3019_v21 = vld [vmem:[#allocation2 + $0x52] sm:$0xff] }
  0x49   : > { %886 = vmatpush2.msra.mxu0 %v698_v24  ;;  %1111 = vmatpush2.msra.mxu1 %v730_v26  ;;  %v3022_v24 = vld [vmem:[#allocation2 + $0x78] sm:$0xff]  ;;  %v786_v26 = vld [vmem:[%s3900_s1 + $0x348] sm:$0xff] }
  0x4a   : > { %887 = vmatprep.subr.mxu0 %v2431_v2  ;;  %1112 = vmatprep.subr.mxu1 %v2431_v2 }
  0x4b   : > { %888 = vmatpush2.msra.mxu0 %v697_v27  ;;  %889 = vmatprep.mubr.f32.mxu0 %v424_v31  ;;  %v3035_v27 = vld [vmem:[#allocation2 + $0x62] sm:$0xff] }
  0x4c   : > { %1113 = vmatpush2.msra.mxu1 %v729_v36  ;;  %1114 = vmatprep.mubr.f32.mxu1 %v488_v37  ;;  %v3038_v31 = vld [vmem:[#allocation2 + $0x80] sm:$0xff] }
  0x4d   : > { %890 = vmatmul.mubr.f32.vlgmr.msra.gmra.mxu0 %v2431_v2  ;;  %1115 = vmatmul.mubr.f32.vlgmr.msra.gmra.mxu1 %v456_v41  ;;  %v785_v36 = vld [vmem:[%s3900_s1 + $0x340] sm:$0xff]  ;;  %v3054_v41 = vld [vmem:[#allocation2 + $0x90] sm:$0xff] }
  0x4e   : > { %1275 = vmatprep.subr.mxu0 %v2431_v2  ;;  %894 = vmatprep.mubr.f32.mxu0 %v425_v44  ;;  %v784_v44 = vld [vmem:[%s3900_s1 + $0x338] sm:$0xff] }
  0x4f   : > { %1276 = vmatpush1.msra.mxu0 %v760_v45  ;;  %1119 = vmatprep.mubr.f32.mxu1 %v489_v46  ;;  %v3067_v45 = vld [vmem:[#allocation2 + $0x7a] sm:$0xff] }
  0x50   : > { %1277 = vmatprep.subr.mxu0 %v2431_v2  ;;  %1500 = vmatprep.subr.mxu1 %v2431_v2 }
  0x51   : > { %895 = vmatmul.mubr.f32.gmra.mxu0 %v2431_v2  ;;  %1120 = vmatmul.mubr.f32.gmra.mxu1 %v457_v48  ;;  %v783_v48 = vld [vmem:[%s3900_s1 + $0x330] sm:$0xff] }
  0x52   : > { %1278 = vmatpush1.msra.mxu0 %v759_v51  ;;  %899 = vmatprep.mubr.f32.mxu0 %v2638_v25  ;;  %v791_v25 = vld [vmem:[%s3900_s1 + $0x370] sm:$0xff]  ;;  %v3083_v51 = vld [vmem:[#allocation2 + $0x82] sm:$0xff] }
  0x53   : > { %1124 = vmatprep.mubr.f32.mxu1 %v2928_v52  ;;  %1279 = vmatprep.subr.mxu0 %v2431_v2 }
  0x54   : > { %1280 = vmatpush1.msra.mxu0 %v758_v54  ;;  %1501 = vmatpush1.msra.mxu1 %v792_v57  ;;  %v782_v54 = vld [vmem:[%s3900_s1 + $0x328] sm:$0xff]  ;;  %v3099_v57 = vld [vmem:[#allocation2 + $0x92] sm:$0xff] }
  0x55   : > { %900 = vmatmul.mubr.f32.gmra.mxu0 %v488_v37  ;;  %1125 = vmatmul.mubr.f32.gmra.mxu1 %v2940_v58  ;;  %v3051_v37 = vld [vmem:[#allocation2 + $0x6a] sm:$0xff] }
  0x56   : > { %904 = vmatprep.mubr.f32.mxu0 %v2650_v28  ;;  %1129 = vmatprep.mubr.f32.mxu1 %v2945_v62  ;;  %v790_v28 = vld [vmem:[%s3900_s1 + $0x368] sm:$0xff] }
  0x57   : > { %1281 = vmatprep.subr.mxu0 %v2431_v2  ;;  %1502 = vmatprep.subr.mxu1 %v2431_v2 }
  0x58   : > { %1282 = vmatpush1.msra.mxu0 %v757_v0  ;;  %1503 = vmatpush1.msra.mxu1 %v791_v25  ;;  %v781_v0 = vld [vmem:[%s3900_s1 + $0x320] sm:$0xff] }
  0x59   : > { %905 = vmatmul.mubr.f32.gmra.mxu0 %v489_v46  ;;  %1130 = vmatmul.mubr.f32.gmra.mxu1 %v2956_v1  ;;  %v3070_v46 = vld [vmem:[#allocation2 + $0x98] sm:$0xff] }
  0x5a   : > { %909 = vmatprep.mubr.f32.mxu0 %v2654_v29  ;;  %1134 = vmatprep.mubr.f32.mxu1 %v2959_v5  ;;  %v755_v29 = vld [vmem:[%s3900_s1 + $0x250] sm:$0xff]  ;;  %v3115_v25 = vld [vmem:[#allocation2 + $0x9a] sm:$0xff] }
  0x5b   : > { %1283 = vmatprep.subr.mxu0 %v2431_v2  ;;  %1504 = vmatprep.subr.mxu1 %v2431_v2 }
  0x5c   : > { %1284 = vmatpush1.msra.mxu0 %v756_v6  ;;  %1505 = vmatpush1.msra.mxu1 %v790_v28  ;;  %v3118_v6 = vld [vmem:[#allocation2 + $0xc0] sm:$0xff]  ;;  %v780_v28 = vld [vmem:[%s3900_s1 + $0x318] sm:$0xff] }
  0x5d   : > { %910 = vmatmul.mubr.f32.gmra.mxu0 %v2928_v52  ;;  %1135 = vmatmul.mubr.f32.gmra.mxu1 %v2971_v8 }
  0x5e   : > { %914 = vmatprep.mubr.f32.mxu0 %v2657_v30  ;;  %1139 = vmatprep.mubr.f32.mxu1 %v2974_v9  ;;  %v754_v30 = vld [vmem:[%s3900_s1 + $0x248] sm:$0xff] }
  0x5f   : > { %1285 = vmatprep.subr.mxu0 %v2431_v2  ;;  %1506 = vmatprep.subr.mxu1 %v2431_v2 }
  0x60   : > { %1286 = vmatpush1.msra.mxu0 %v755_v29  ;;  %1507 = vmatpush1.msra.mxu1 %v789_v11  ;;  %v3131_v29 = vld [vmem:[#allocation2 + $0xaa] sm:$0xff] }
  0x61   : > { %915 = vmatmul.mubr.f32.gmra.mxu0 %v2945_v62  ;;  %1140 = vmatmul.mubr.f32.gmra.mxu1 %v2987_v12  ;;  %v3134_v11 = vld [vmem:[#allocation2 + $0xc8] sm:$0xff] }
  0x62   : > { %919 = vmatprep.mubr.f32.mxu0 %v2670_v33  ;;  %1144 = vmatprep.mubr.f32.mxu1 %v2990_v14  ;;  %v753_v33 = vld [vmem:[%s3900_s1 + $0x240] sm:$0xff] }
  0x63   : > { %1287 = vmatprep.subr.mxu0 %v2431_v2  ;;  %1508 = vmatprep.subr.mxu1 %v2431_v2 }
  0x64   : > { %1288 = vmatpush1.msra.mxu0 %v754_v30  ;;  %1509 = vmatpush1.msra.mxu1 %v788_v15  ;;  %v779_v30 = vld [vmem:[%s3900_s1 + $0x310] sm:$0xff] }
  0x65   : > { %920 = vmatmul.mubr.f32.gmra.mxu0 %v2959_v5  ;;  %1145 = vmatmul.mubr.f32.gmra.mxu1 %v3003_v17  ;;  %v3147_v15 = vld [vmem:[#allocation2 + $0xb2] sm:$0xff] }
  0x66   : > { %924 = vmatprep.mubr.f32.mxu0 %v2674_v34  ;;  %1149 = vmatprep.mubr.f32.mxu1 %v3006_v18  ;;  %v752_v34 = vld [vmem:[%s3900_s1 + $0x238] sm:$0xff] }
  0x67   : > { %1289 = vmatprep.subr.mxu0 %v2431_v2  ;;  %1510 = vmatprep.subr.mxu1 %v2431_v2 }
  0x68   : > { %1290 = vmatpush1.msra.mxu0 %v753_v33  ;;  %1511 = vmatpush1.msra.mxu1 %v787_v20  ;;  %v3150_v33 = vld [vmem:[#allocation2 + $0xd8] sm:$0xff]  ;;  %v778_v20 = vld [vmem:[%s3900_s1 + $0x308] sm:$0xff] }
  0x69   : > { %925 = vmatmul.mubr.f32.gmra.mxu0 %v2974_v9  ;;  %1150 = vmatmul.mubr.f32.gmra.mxu1 %v3019_v21 }
  0x6a   : > { %929 = vmatprep.mubr.f32.mxu0 %v2677_v35  ;;  %1154 = vmatprep.mubr.f32.mxu1 %v3022_v24  ;;  %v751_v35 = vld [vmem:[%s3900_s1 + $0x230] sm:$0xff] }
  0x6b   : > { %1291 = vmatprep.subr.mxu0 %v2431_v2  ;;  %1512 = vmatprep.subr.mxu1 %v2431_v2 }
  0x6c   : > { %1292 = vmatpush1.msra.mxu0 %v752_v34  ;;  %1513 = vmatpush1.msra.mxu1 %v786_v26  ;;  %v3163_v34 = vld [vmem:[#allocation2 + $0xc2] sm:$0xff] }
  0x6d   : > { %930 = vmatmul.mubr.f32.gmra.mxu0 %v2990_v14  ;;  %1155 = vmatmul.mubr.f32.gmra.mxu1 %v3035_v27  ;;  %v3166_v26 = vld [vmem:[#allocation2 + $0xe0] sm:$0xff] }
  0x6e   : > { %934 = vmatprep.mubr.f32.mxu0 %v2690_v38  ;;  %1159 = vmatprep.mubr.f32.mxu1 %v3038_v31  ;;  %v750_v38 = vld [vmem:[%s3900_s1 + $0x228] sm:$0xff] }
  0x6f   : > { %1293 = vmatprep.subr.mxu0 %v2431_v2  ;;  %1514 = vmatprep.subr.mxu1 %v2431_v2 }
  0x70   : > { %1294 = vmatpush1.msra.mxu0 %v751_v35  ;;  %1515 = vmatpush1.msra.mxu1 %v785_v36  ;;  %v777_v35 = vld [vmem:[%s3900_s1 + $0x300] sm:$0xff]  ;;  %v3179_v36 = vld [vmem:[#allocation2 + $0xca] sm:$0xff] }
  0x71   : > { %935 = vmatmul.mubr.f32.gmra.mxu0 %v3006_v18  ;;  %1160 = vmatmul.mubr.f32.gmra.mxu1 %v3051_v37 }
  0x72   : > { %939 = vmatprep.mubr.f32.mxu0 %v2694_v39  ;;  %1164 = vmatprep.mubr.f32.mxu1 %v3054_v41  ;;  %v749_v39 = vld [vmem:[%s3900_s1 + $0x220] sm:$0xff] }
  0x73   : > { %1295 = vmatprep.subr.mxu0 %v2431_v2  ;;  %1516 = vmatprep.subr.mxu1 %v2431_v2 }
  0x74   : > { %1296 = vmatpush1.msra.mxu0 %v750_v38  ;;  %1517 = vmatpush1.msra.mxu1 %v784_v44  ;;  %v3184_v38 = vld [vmem:[#allocation2 + $0xf0] sm:$0xff]  ;;  %v808_v44 = vld [vmem:[%s3900_s1 + $0x3f8] sm:$0xff] }
  0x75   : > { %940 = vmatmul.mubr.f32.gmra.mxu0 %v3022_v24  ;;  %1165 = vmatmul.mubr.f32.gmra.mxu1 %v3067_v45 }
  0x76   : > { %944 = vmatprep.mubr.f32.mxu0 %v2706_v42  ;;  %1169 = vmatprep.mubr.f32.mxu1 %v3070_v46  ;;  %v748_v42 = vld [vmem:[%s3900_s1 + $0x218] sm:$0xff] }
  0x77   : > { %1297 = vmatprep.subr.mxu0 %v2431_v2  ;;  %1518 = vmatprep.subr.mxu1 %v2431_v2 }
  0x78   : > { %1298 = vmatpush1.msra.mxu0 %v749_v39  ;;  %1519 = vmatpush1.msra.mxu1 %v783_v48  ;;  %v3197_v39 = vld [vmem:[#allocation2 + $0xda] sm:$0xff] }
  0x79   : > { %945 = vmatmul.mubr.f32.gmra.mxu0 %v3038_v31  ;;  %1170 = vmatmul.mubr.f32.gmra.mxu1 %v3083_v51  ;;  %v3200_v48 = vld [vmem:[#allocation2 + $0xf8] sm:$0xff] }
  0x7a   : > { %949 = vmatprep.mubr.f32.mxu0 %v2710_v43  ;;  %1174 = vmatprep.mubr.f32.mxu1 %v3086_v53  ;;  %v747_v43 = vld [vmem:[%s3900_s1 + $0x210] sm:$0xff] }
  0x7b   : > { %1299 = vmatprep.subr.mxu0 %v2431_v2  ;;  %1520 = vmatprep.subr.mxu1 %v2431_v2 }
  0x7c   : > { %1300 = vmatpush1.msra.mxu0 %v748_v42  ;;  %1521 = vmatpush1.msra.mxu1 %v782_v54  ;;  %v807_v42 = vld [vmem:[%s3900_s1 + $0x3f0] sm:$0xff]  ;;  %v3213_v54 = vld [vmem:[#allocation2 + $0xe2] sm:$0xff] }
  0x7d   : > { %950 = vmatmul.mubr.f32.gmra.mxu0 %v3054_v41  ;;  %1175 = vmatmul.mubr.f32.gmra.mxu1 %v3099_v57 }
  0x7e   : > { %954 = vmatprep.mubr.f32.mxu0 %v2738_v50  ;;  %1179 = vmatprep.mubr.f32.mxu1 %v3102_v61  ;;  %v746_v50 = vld [vmem:[%s3900_s1 + $0x208] sm:$0xff] }
  0x7f   : > { %1301 = vmatprep.subr.mxu0 %v2431_v2  ;;  %1522 = vmatprep.subr.mxu1 %v2431_v2 }
  0x80   : > { %1302 = vmatpush1.msra.mxu0 %v747_v43  ;;  %1523 = vmatpush1.msra.mxu1 %v781_v0  ;;  %v3216_v43 = vld [vmem:[#allocation2 + $0x108] sm:$0xff] }
  0x81   : > { %955 = vmatmul.mubr.f32.gmra.mxu0 %v3070_v46  ;;  %1180 = vmatmul.mubr.f32.gmra.mxu1 %v3115_v25  ;;  %v806_v0 = vld [vmem:[%s3900_s1 + $0x3e8] sm:$0xff] }
  0x82   : > { %959 = vmatprep.mubr.f32.mxu0 %v2758_v55  ;;  %1184 = vmatprep.mubr.f32.mxu1 %v3118_v6  ;;  %v745_v55 = vld [vmem:[%s3900_s1 + $0x200] sm:$0xff] }
  0x83   : > { %1303 = vmatprep.subr.mxu0 %v2431_v2  ;;  %1524 = vmatprep.subr.mxu1 %v2431_v2 }
  0x84   : > { %1304 = vmatpush1.msra.mxu0 %v746_v50  ;;  %1525 = vmatpush1.msra.mxu1 %v780_v28  ;;  %v3229_v50 = vld [vmem:[#allocation2 + $0xf2] sm:$0xff] }
  0x85   : > { %960 = vmatmul.mubr.f32.gmra.mxu0 %v3086_v53  ;;  %1185 = vmatmul.mubr.f32.gmra.mxu1 %v3131_v29  ;;  %v3232_v28 = vld [vmem:[#allocation2 + $0x110] sm:$0xff] }
  0x86   : > { %964 = vmatprep.mubr.f32.mxu0 %v2762_v56  ;;  %1189 = vmatprep.mubr.f32.mxu1 %v3134_v11  ;;  %v776_v56 = vld [vmem:[%s3900_s1 + $0x2f8] sm:$0xff] }
  0x87   : > { %1305 = vmatprep.subr.mxu0 %v2431_v2  ;;  %1526 = vmatprep.subr.mxu1 %v2431_v2 }
  0x88   : > { %1306 = vmatpush1.msra.mxu0 %v745_v55  ;;  %1527 = vmatpush1.msra.mxu1 %v779_v30  ;;  %v805_v55 = vld [vmem:[%s3900_s1 + $0x3e0] sm:$0xff] }
  0x89   : > { %965 = vmatmul.mubr.f32.gmra.mxu0 %v3102_v61  ;;  %1190 = vmatmul.mubr.f32.gmra.mxu1 %v3147_v15  ;;  %v3245_v30 = vld [vmem:[#allocation2 + $0xfa] sm:$0xff] }
  0x8a   : > { %969 = vmatprep.mubr.f32.mxu0 %v2774_v59  ;;  %1194 = vmatprep.mubr.f32.mxu1 %v3150_v33  ;;  %v775_v59 = vld [vmem:[%s3900_s1 + $0x2f0] sm:$0xff] }
  0x8b   : > { %1307 = vmatprep.subr.mxu0 %v2431_v2  ;;  %1528 = vmatprep.subr.mxu1 %v2431_v2  ;;  %v3181_v2 = vld [vmem:[#allocation2] sm:$0xff] }
  0x8c   : > { %1308 = vmatpush2.msra.mxu0 %v776_v56  ;;  %1529 = vmatpush1.msra.mxu1 %v778_v20  ;;  %v3248_v56 = vld [vmem:[#allocation2 + $0x120] sm:$0xff]  ;;  %v804_v20 = vld [vmem:[%s3900_s1 + $0x3d8] sm:$0xff] }
  0x8d   : > { %970 = vmatmul.mubr.f32.gmra.mxu0 %v3118_v6  ;;  %1195 = vmatmul.mubr.f32.gmra.mxu1 %v3163_v34 }
  0x8e   : > { %974 = vmatprep.mubr.f32.mxu0 %v2778_v60  ;;  %1199 = vmatprep.mubr.f32.mxu1 %v3166_v26  ;;  %v774_v60 = vld [vmem:[%s3900_s1 + $0x2e8] sm:$0xff] }
  0x8f   : > { %1309 = vmatprep.subr.mxu0 %v3181_v2  ;;  %1530 = vmatprep.subr.mxu1 %v3181_v2 }
  0x90   : > { %1310 = vmatpush2.msra.mxu0 %v775_v59  ;;  %1531 = vmatpush1.msra.mxu1 %v777_v35  ;;  %v3261_v59 = vld [vmem:[#allocation2 + $0x10a] sm:$0xff] }
  0x91   : > { %975 = vmatmul.mubr.f32.gmra.mxu0 %v3134_v11  ;;  %1200 = vmatmul.mubr.f32.gmra.mxu1 %v3179_v36  ;;  %v3264_v35 = vld [vmem:[#allocation2 + $0x128] sm:$0xff] }
  0x92   : > { %979 = vmatprep.mubr.f32.mxu0 %v2790_v63  ;;  %1204 = vmatprep.mubr.f32.mxu1 %v3184_v38  ;;  %v773_v63 = vld [vmem:[%s3900_s1 + $0x2e0] sm:$0xff] }
  0x93   : > { %1311 = vmatprep.subr.mxu0 %v3181_v2  ;;  %1532 = vmatprep.subr.mxu1 %v3181_v2 }
  0x94   : > { %1312 = vmatpush2.msra.mxu0 %v774_v60  ;;  %1533 = vmatpush2.msra.mxu1 %v808_v44  ;;  %v803_v60 = vld [vmem:[%s3900_s1 + $0x3d0] sm:$0xff] }
  0x95   : > { %980 = vmatmul.mubr.f32.gmra.mxu0 %v3150_v33  ;;  %1205 = vmatmul.mubr.f32.gmra.mxu1 %v3197_v39  ;;  %v3277_v44 = vld [vmem:[#allocation2 + $0x112] sm:$0xff] }
  0x96   : > { %984 = vmatprep.mubr.f32.mxu0 %v2802_v3  ;;  %1209 = vmatprep.mubr.f32.mxu1 %v3200_v48  ;;  %v772_v3 = vld [vmem:[%s3900_s1 + $0x2d8] sm:$0xff] }
  0x97   : > { %1313 = vmatprep.subr.mxu0 %v3181_v2  ;;  %1534 = vmatprep.subr.mxu1 %v3181_v2 }
  0x98   : > { %1314 = vmatpush2.msra.mxu0 %v773_v63  ;;  %1535 = vmatpush2.msra.mxu1 %v807_v42  ;;  %v3280_v63 = vld [vmem:[#allocation2 + $0x138] sm:$0xff]  ;;  %v802_v42 = vld [vmem:[%s3900_s1 + $0x3c8] sm:$0xff] }
  0x99   : > { %985 = vmatmul.mubr.f32.gmra.mxu0 %v3166_v26  ;;  %1210 = vmatmul.mubr.f32.gmra.mxu1 %v3213_v54 }
  0x9a   : > { %989 = vmatprep.mubr.f32.mxu0 %v2806_v4  ;;  %1214 = vmatprep.mubr.f32.mxu1 %v3216_v43  ;;  %v771_v4 = vld [vmem:[%s3900_s1 + $0x2d0] sm:$0xff] }
  0x9b   : > { %1315 = vmatprep.subr.mxu0 %v3181_v2  ;;  %1536 = vmatprep.subr.mxu1 %v3181_v2 }
  0x9c   : > { %1316 = vmatpush2.msra.mxu0 %v772_v3  ;;  %1537 = vmatpush2.msra.mxu1 %v806_v0  ;;  %v3293_v3 = vld [vmem:[#allocation2 + $0x122] sm:$0xff] }
  0x9d   : > { %990 = vmatmul.mubr.f32.gmra.mxu0 %v3184_v38  ;;  %1215 = vmatmul.mubr.f32.gmra.mxu1 %v3229_v50  ;;  %v3296_v0 = vld [vmem:[#allocation2 + $0x140] sm:$0xff] }
  0x9e   : > { %994 = vmatprep.mubr.f32.mxu0 %v2818_v7  ;;  %1219 = vmatprep.mubr.f32.mxu1 %v3232_v28  ;;  %v770_v7 = vld [vmem:[%s3900_s1 + $0x2c8] sm:$0xff] }
  0x9f   : > { %1317 = vmatprep.subr.mxu0 %v3181_v2  ;;  %1538 = vmatprep.subr.mxu1 %v3181_v2 }
  0xa0   : > { %1318 = vmatpush2.msra.mxu0 %v771_v4  ;;  %1539 = vmatpush2.msra.mxu1 %v805_v55  ;;  %v801_v4 = vld [vmem:[%s3900_s1 + $0x3c0] sm:$0xff]  ;;  %v3309_v55 = vld [vmem:[#allocation2 + $0x12a] sm:$0xff] }
  0xa1   : > { %995 = vmatmul.mubr.f32.gmra.mxu0 %v3200_v48  ;;  %1220 = vmatmul.mubr.f32.gmra.mxu1 %v3245_v30 }
  0xa2   : > { %999 = vmatprep.mubr.f32.mxu0 %v2830_v10  ;;  %1224 = vmatprep.mubr.f32.mxu1 %v3248_v56  ;;  %v769_v10 = vld [vmem:[%s3900_s1 + $0x2c0] sm:$0xff] }
  0xa3   : > { %1319 = vmatprep.subr.mxu0 %v3181_v2  ;;  %1540 = vmatprep.subr.mxu1 %v3181_v2 }
  0xa4   : > { %1320 = vmatpush2.msra.mxu0 %v770_v7  ;;  %1541 = vmatpush2.msra.mxu1 %v804_v20  ;;  %v3312_v7 = vld [vmem:[#allocation2 + $0x150] sm:$0xff]  ;;  %v800_v20 = vld [vmem:[%s3900_s1 + $0x3b8] sm:$0xff] }
  0xa5   : > { %1000 = vmatmul.mubr.f32.gmra.mxu0 %v3216_v43  ;;  %1225 = vmatmul.mubr.f32.gmra.mxu1 %v3261_v59 }
  0xa6   : > { %1004 = vmatprep.mubr.f32.mxu0 %v2842_v13  ;;  %1229 = vmatprep.mubr.f32.mxu1 %v3264_v35  ;;  %v768_v13 = vld [vmem:[%s3900_s1 + $0x2b8] sm:$0xff] }
  0xa7   : > { %1321 = vmatprep.subr.mxu0 %v3181_v2  ;;  %1542 = vmatprep.subr.mxu1 %v3181_v2 }
  0xa8   : > { %1322 = vmatpush2.msra.mxu0 %v769_v10  ;;  %1543 = vmatpush2.msra.mxu1 %v803_v60  ;;  %v3325_v10 = vld [vmem:[#allocation2 + $0x13a] sm:$0xff] }
  0xa9   : > { %1005 = vmatmul.mubr.f32.gmra.mxu0 %v3232_v28  ;;  %1230 = vmatmul.mubr.f32.gmra.mxu1 %v3277_v44  ;;  %v3328_v60 = vld [vmem:[#allocation2 + $0x158] sm:$0xff] }
  0xaa   : > { %1009 = vmatprep.mubr.f32.mxu0 %v2854_v16  ;;  %1234 = vmatprep.mubr.f32.mxu1 %v3280_v63  ;;  %v767_v16 = vld [vmem:[%s3900_s1 + $0x2b0] sm:$0xff] }
  0xab   : > { %1323 = vmatprep.subr.mxu0 %v3181_v2  ;;  %1544 = vmatprep.subr.mxu1 %v3181_v2 }
  0xac   : > { %1324 = vmatpush2.msra.mxu0 %v768_v13  ;;  %1545 = vmatpush2.msra.mxu1 %v802_v42  ;;  %v799_v13 = vld [vmem:[%s3900_s1 + $0x3b0] sm:$0xff]  ;;  %v3341_v42 = vld [vmem:[#allocation2 + $0x142] sm:$0xff] }
  0xad   : > { %1010 = vmatmul.mubr.f32.gmra.mxu0 %v3248_v56  ;;  %1235 = vmatmul.mubr.f32.gmra.mxu1 %v3293_v3 }
  0xae   : > { %1014 = vmatprep.mubr.f32.mxu0 %v2866_v19  ;;  %1239 = vmatprep.mubr.f32.mxu1 %v3296_v0  ;;  %v766_v19 = vld [vmem:[%s3900_s1 + $0x2a8] sm:$0xff] }
  0xaf   : > { %1325 = vmatprep.subr.mxu0 %v3181_v2  ;;  %1546 = vmatprep.subr.mxu1 %v3181_v2 }
  0xb0   : > { %1326 = vmatpush2.msra.mxu0 %v767_v16  ;;  %1547 = vmatpush2.msra.mxu1 %v801_v4  ;;  %v3344_v16 = vld [vmem:[#allocation2 + $0x168] sm:$0xff] }
  0xb1   : > { %1015 = vmatmul.mubr.f32.gmra.mxu0 %v3264_v35  ;;  %1240 = vmatmul.mubr.f32.gmra.mxu1 %v3309_v55  ;;  %v798_v4 = vld [vmem:[%s3900_s1 + $0x3a8] sm:$0xff] }
  0xb2   : > { %1019 = vmatprep.mubr.f32.mxu0 %v2878_v22  ;;  %1244 = vmatprep.mubr.f32.mxu1 %v3312_v7  ;;  %v765_v22 = vld [vmem:[%s3900_s1 + $0x2a0] sm:$0xff] }
  0xb3   : > { %1327 = vmatprep.subr.mxu0 %v3181_v2  ;;  %1548 = vmatprep.subr.mxu1 %v3181_v2 }
  0xb4   : > { %1328 = vmatpush2.msra.mxu0 %v766_v19  ;;  %1549 = vmatpush2.msra.mxu1 %v800_v20  ;;  %v3357_v19 = vld [vmem:[#allocation2 + $0x152] sm:$0xff] }
  0xb5   : > { %1020 = vmatmul.mubr.f32.gmra.mxu0 %v3280_v63  ;;  %1245 = vmatmul.mubr.f32.gmra.mxu1 %v3325_v10  ;;  %3909 = vst [vmem:[#allocation3_spill] sm:$0xff] %v3357_v19  ;;  %v3360_v20 = vld [vmem:[#allocation2 + $0x170] sm:$0xff] }
  0xb6   : > { %1024 = vmatprep.mubr.f32.mxu0 %v2882_v23  ;;  %1249 = vmatprep.mubr.f32.mxu1 %v3328_v60  ;;  %v764_v23 = vld [vmem:[%s3900_s1 + $0x298] sm:$0xff] }
  0xb7   : > { %1329 = vmatprep.subr.mxu0 %v3181_v2  ;;  %1550 = vmatprep.subr.mxu1 %v3181_v2 }
  0xb8   : > { %1330 = vmatpush2.msra.mxu0 %v765_v22  ;;  %1551 = vmatpush2.msra.mxu1 %v799_v13  ;;  %v797_v22 = vld [vmem:[%s3900_s1 + $0x3a0] sm:$0xff] }
  0xb9   : > { %1025 = vmatmul.mubr.f32.gmra.mxu0 %v3296_v0  ;;  %1250 = vmatmul.mubr.f32.gmra.mxu1 %v3341_v42  ;;  %v3373_v13 = vld [vmem:[#allocation2 + $0x15a] sm:$0xff] }
  0xba   : > { %1029 = vmatprep.mubr.f32.mxu0 %v2899_v32  ;;  %1254 = vmatprep.mubr.f32.mxu1 %v3344_v16  ;;  %v763_v32 = vld [vmem:[%s3900_s1 + $0x290] sm:$0xff] }
  0xbb   : > { %1331 = vmatprep.subr.mxu0 %v3181_v2  ;;  %1552 = vmatprep.subr.mxu1 %v3181_v2 }
  0xbc   : > { %1332 = vmatpush2.msra.mxu0 %v764_v23  ;;  %1553 = vmatpush2.msra.mxu1 %v798_v4  ;;  %v3377_v23 = vld [vmem:[#allocation2 + $0x180] sm:$0xff]  ;;  %v796_v4 = vld [vmem:[%s3900_s1 + $0x398] sm:$0xff] }
  0xbd   : > { %1030 = vmatmul.mubr.f32.gmra.mxu0 %v3312_v7  ;;  %1255 = vmatmul.mubr.f32.gmra.mxu1 %v3357_v19  ;;  %3910 = vst [vmem:[#allocation4_spill] sm:$0xff] %v3377_v23  ;;  %v3389_v19 = vld [vmem:[#allocation2 + $0x16a] sm:$0xff] }
  0xbe   : > { %1034 = vmatprep.mubr.f32.mxu0 %v2906_v40  ;;  %1259 = vmatprep.mubr.f32.mxu1 %v3360_v20  ;;  %v762_v40 = vld [vmem:[%s3900_s1 + $0x288] sm:$0xff] }
  0xbf   : > { %1333 = vmatprep.subr.mxu0 %v3181_v2  ;;  %1554 = vmatprep.subr.mxu1 %v3181_v2 }
  0xc0   : > { %1334 = vmatpush2.msra.mxu0 %v763_v32  ;;  %1555 = vmatpush2.msra.mxu1 %v797_v22  ;;  %v3393_v32 = vld [vmem:[#allocation2 + $0x188] sm:$0xff]  ;;  %v795_v22 = vld [vmem:[%s3900_s1 + $0x390] sm:$0xff] }
  0xc1   : > { %1035 = vmatmul.mubr.f32.gmra.mxu0 %v3328_v60  ;;  %1260 = vmatmul.mubr.f32.gmra.mxu1 %v3373_v13  ;;  %3911 = vst [vmem:[#allocation5_spill] sm:$0xff] %v3393_v32 }
  0xc2   : > { %1039 = vmatprep.mubr.f32.mxu0 %v2915_v47  ;;  %1264 = vmatprep.mubr.f32.mxu1 %v3377_v23  ;;  %v3402_v47 = vld [vmem:[#allocation2 + $0x172] sm:$0xff] }
  0xc3   : > { %1335 = vmatprep.subr.mxu0 %v3181_v2  ;;  %1556 = vmatprep.subr.mxu1 %v3181_v2  ;;  %v2392_v23 = vld [vmem:[#allocation2 + $0x31] sm:$0xff] }
  0xc4   : > { %1336 = vmatpush2.msra.mxu0 %v762_v40  ;;  %1557 = vmatpush2.msra.mxu1 %v796_v4  ;;  %v761_v40 = vld [vmem:[%s3900_s1 + $0x280] sm:$0xff]  ;;  %v794_v4 = vld [vmem:[%s3900_s1 + $0x388] sm:$0xff] }
  0xc5   : > { %1040 = vmatmul.mubr.f32.gmra.mxu0 %v3344_v16  ;;  %1265 = vmatmul.mubr.f32.gmra.mxu1 %v3389_v19 }
  0xc6   : > { %1558 = vmatprep.subr.mxu1 %v3181_v2  ;;  %1044 = vmatprep.mubr.f32.mxu0 %v2921_v49  ;;  %v793_v49 = vld [vmem:[%s3900_s1 + $0x380] sm:$0xff] }
  0xc7   : > { %1269 = vmatprep.mubr.f32.mxu1 %v3393_v32  ;;  %1559 = vmatpush2.msra.mxu1 %v795_v22  ;;  %v520_v22 = vld [vmem:[#allocation2 + $0x19] sm:$0xff] }
  0xc8   : > { %1337 = vmatprep.subr.mxu0 %v3181_v2  ;;  %1560 = vmatprep.subr.mxu1 %v3181_v2  ;;  %v824_v32 = vld [vmem:[%s3900_s1 + $0x478] sm:$0xff] }
  0xc9   : > { %1045 = vmatmul.mubr.f32.gmra.mxu0 %v3360_v20  ;;  %1270 = vmatmul.mubr.f32.gmra.mxu1 %v3402_v47 }
  0xca   : > { %1338 = vmatpush2.msra.mxu0 %v761_v40  ;;  %1561 = vmatpush2.msra.mxu1 %v794_v4  ;;  %v823_v40 = vld [vmem:[%s3900_s1 + $0x470] sm:$0xff]  ;;  %v2393_v4 = vld [vmem:[#allocation2 + $0x39] sm:$0xff] }
  0xcb   : > { %1562 = vmatprep.subr.mxu1 %v3181_v2  ;;  %1339 = vmatprep.mubr.f32.mxu0 %v2940_v58  ;;  %v2394_v58 = vld [vmem:[#allocation2 + $0x21] sm:$0xff] }
  0xcc   : > { %1563 = vmatpush2.msra.mxu1 %v793_v49  ;;  %1564 = vmatprep.mubr.f32.mxu1 %v2392_v23  ;;  %v2395_v49 = vld [vmem:[#allocation2 + $0x49] sm:$0xff] }
  0xcd   : > { %1340 = vmatmul.mubr.f32.vlgmr.msra.gmra.mxu0 %v520_v22  ;;  %1565 = vmatmul.mubr.f32.vlgmr.msra.gmra.mxu1 %v2928_v52  ;;  %v822_v52 = vld [vmem:[%s3900_s1 + $0x468] sm:$0xff] }
  0xce   : > { %2270 = vmatprep.subr.mxu0 %v824_v32  ;;  %1344 = vmatprep.mubr.f32.mxu0 %v2956_v1  ;;  %v821_v1 = vld [vmem:[%s3900_s1 + $0x460] sm:$0xff] }
  0xcf   : > { %2271 = vmatpush3.msra.mxu0 %v824_v32  ;;  %1569 = vmatprep.mubr.f32.mxu1 %v2393_v4 }
  0xd0   : > { %2272 = vmatprep.subr.mxu0 %v823_v40  ;;  %2350 = vmatprep.subr.mxu1 %v824_v32 }
  0xd1   : > { %1345 = vmatmul.mubr.f32.gmra.mxu0 %v2394_v58  ;;  %1570 = vmatmul.mubr.f32.gmra.mxu1 %v2945_v62  ;;  %v2396_v62 = vld [vmem:[#allocation2 + $0x51] sm:$0xff]  ;;  %v2411_v58 = vld [vmem:[#allocation2 + $0x109] sm:$0xff] }
  0xd2   : > { %1349 = vmatprep.mubr.f32.mxu0 %v2971_v8  ;;  %1574 = vmatprep.mubr.f32.mxu1 %v2395_v49  ;;  %v820_v8 = vld [vmem:[%s3900_s1 + $0x458] sm:$0xff] }
  0xd3   : > { %2273 = vmatpush3.msra.mxu0 %v823_v40  ;;  %2366 = vmatpush3.msra.mxu1 %v824_v32  ;;  %v2410_v32 = vld [vmem:[#allocation2 + $0xf9] sm:$0xff] }
  0xd4   : > { %2274 = vmatprep.subr.mxu0 %v822_v52  ;;  %2351 = vmatprep.subr.mxu1 %v823_v40 }
  0xd5   : > { %1350 = vmatmul.mubr.f32.gmra.mxu0 %v2392_v23  ;;  %1575 = vmatmul.mubr.f32.gmra.mxu1 %v2959_v5  ;;  %v2397_v5 = vld [vmem:[#allocation2 + $0x61] sm:$0xff] }
  0xd6   : > { %1354 = vmatprep.mubr.f32.mxu0 %v2987_v12  ;;  %1579 = vmatprep.mubr.f32.mxu1 %v2396_v62  ;;  %v819_v12 = vld [vmem:[%s3900_s1 + $0x450] sm:$0xff] }
  0xd7   : > { %2275 = vmatpush3.msra.mxu0 %v822_v52  ;;  %2367 = vmatpush3.msra.mxu1 %v823_v40 }
  0xd8   : > { %2276 = vmatprep.subr.mxu0 %v821_v1  ;;  %2352 = vmatprep.subr.mxu1 %v822_v52 }
  0xd9   : > { %1355 = vmatmul.mubr.f32.gmra.mxu0 %v2393_v4  ;;  %1580 = vmatmul.mubr.f32.gmra.mxu1 %v2974_v9  ;;  %v2398_v9 = vld [vmem:[#allocation2 + $0x69] sm:$0xff] }
  0xda   : > { %1359 = vmatprep.mubr.f32.mxu0 %v3003_v17  ;;  %1584 = vmatprep.mubr.f32.mxu1 %v2397_v5  ;;  %v818_v17 = vld [vmem:[%s3900_s1 + $0x448] sm:$0xff] }
  0xdb   : > { %2277 = vmatpush3.msra.mxu0 %v821_v1  ;;  %2368 = vmatpush3.msra.mxu1 %v822_v52 }
  0xdc   : > { %2278 = vmatprep.subr.mxu0 %v820_v8  ;;  %2353 = vmatprep.subr.mxu1 %v821_v1 }
  0xdd   : > { %1360 = vmatmul.mubr.f32.gmra.mxu0 %v2395_v49  ;;  %1585 = vmatmul.mubr.f32.gmra.mxu1 %v2990_v14  ;;  %v2399_v14 = vld [vmem:[#allocation2 + $0x79] sm:$0xff] }
  0xde   : > { %1364 = vmatprep.mubr.f32.mxu0 %v3019_v21  ;;  %1589 = vmatprep.mubr.f32.mxu1 %v2398_v9  ;;  %v817_v21 = vld [vmem:[%s3900_s1 + $0x440] sm:$0xff] }
  0xdf   : > { %2279 = vmatpush3.msra.mxu0 %v820_v8  ;;  %2369 = vmatpush3.msra.mxu1 %v821_v1 }
  0xe0   : > { %2280 = vmatprep.subr.mxu0 %v819_v12  ;;  %2354 = vmatprep.subr.mxu1 %v820_v8 }
  0xe1   : > { %1365 = vmatmul.mubr.f32.gmra.mxu0 %v2396_v62  ;;  %1590 = vmatmul.mubr.f32.gmra.mxu1 %v3006_v18  ;;  %v2400_v18 = vld [vmem:[#allocation2 + $0x81] sm:$0xff]  ;;  %v2412_v62 = vld [vmem:[#allocation2 + $0x111] sm:$0xff] }
  0xe2   : > { %1369 = vmatprep.mubr.f32.mxu0 %v3035_v27  ;;  %1594 = vmatprep.mubr.f32.mxu1 %v2399_v14  ;;  %v816_v27 = vld [vmem:[%s3900_s1 + $0x438] sm:$0xff] }
  0xe3   : > { %2281 = vmatpush3.msra.mxu0 %v819_v12  ;;  %2370 = vmatpush3.msra.mxu1 %v820_v8 }
  0xe4   : > { %2282 = vmatprep.subr.mxu0 %v818_v17  ;;  %2355 = vmatprep.subr.mxu1 %v819_v12 }
  0xe5   : > { %1370 = vmatmul.mubr.f32.gmra.mxu0 %v2397_v5  ;;  %1595 = vmatmul.mubr.f32.gmra.mxu1 %v3022_v24  ;;  %v2401_v24 = vld [vmem:[#allocation2 + $0x91] sm:$0xff] }
  0xe6   : > { %1374 = vmatprep.mubr.f32.mxu0 %v3051_v37  ;;  %1599 = vmatprep.mubr.f32.mxu1 %v2400_v18  ;;  %v815_v37 = vld [vmem:[%s3900_s1 + $0x430] sm:$0xff] }
  0xe7   : > { %2283 = vmatpush3.msra.mxu0 %v818_v17  ;;  %2371 = vmatpush3.msra.mxu1 %v819_v12 }
  0xe8   : > { %2284 = vmatprep.subr.mxu0 %v817_v21  ;;  %2356 = vmatprep.subr.mxu1 %v818_v17 }
  0xe9   : > { %1375 = vmatmul.mubr.f32.gmra.mxu0 %v2398_v9  ;;  %1600 = vmatmul.mubr.f32.gmra.mxu1 %v3038_v31  ;;  %v2402_v31 = vld [vmem:[#allocation2 + $0x99] sm:$0xff]  ;;  %v2413_v9 = vld [vmem:[#allocation2 + $0x121] sm:$0xff] }
  0xea   : > { %1379 = vmatprep.mubr.f32.mxu0 %v3067_v45  ;;  %1604 = vmatprep.mubr.f32.mxu1 %v2401_v24  ;;  %v814_v45 = vld [vmem:[%s3900_s1 + $0x428] sm:$0xff] }
  0xeb   : > { %2285 = vmatpush3.msra.mxu0 %v817_v21  ;;  %2372 = vmatpush3.msra.mxu1 %v818_v17 }
  0xec   : > { %2286 = vmatprep.subr.mxu0 %v816_v27  ;;  %2357 = vmatprep.subr.mxu1 %v817_v21 }
  0xed   : > { %1380 = vmatmul.mubr.f32.gmra.mxu0 %v2399_v14  ;;  %1605 = vmatmul.mubr.f32.gmra.mxu1 %v3054_v41  ;;  %v2403_v41 = vld [vmem:[#allocation2 + $0xa9] sm:$0xff] }
  0xee   : > { %1384 = vmatprep.mubr.f32.mxu0 %v3083_v51  ;;  %1609 = vmatprep.mubr.f32.mxu1 %v2402_v31  ;;  %v813_v51 = vld [vmem:[%s3900_s1 + $0x420] sm:$0xff] }
  0xef   : > { %2287 = vmatpush3.msra.mxu0 %v816_v27  ;;  %2373 = vmatpush3.msra.mxu1 %v817_v21 }
  0xf0   : > { %2288 = vmatprep.subr.mxu0 %v815_v37  ;;  %2358 = vmatprep.subr.mxu1 %v816_v27 }
  0xf1   : > { %1385 = vmatmul.mubr.f32.gmra.mxu0 %v2400_v18  ;;  %1610 = vmatmul.mubr.f32.gmra.mxu1 %v3070_v46  ;;  %v2404_v46 = vld [vmem:[#allocation2 + $0xb1] sm:$0xff]  ;;  %v2414_v18 = vld [vmem:[#allocation2 + $0x129] sm:$0xff] }
  0xf2   : > { %1389 = vmatprep.mubr.f32.mxu0 %v3099_v57  ;;  %1614 = vmatprep.mubr.f32.mxu1 %v2403_v41  ;;  %v812_v57 = vld [vmem:[%s3900_s1 + $0x418] sm:$0xff] }
  0xf3   : > { %2289 = vmatpush3.msra.mxu0 %v815_v37  ;;  %2374 = vmatpush3.msra.mxu1 %v816_v27 }
  0xf4   : > { %2290 = vmatprep.subr.mxu0 %v814_v45  ;;  %2359 = vmatprep.subr.mxu1 %v815_v37 }
  0xf5   : > { %1390 = vmatmul.mubr.f32.gmra.mxu0 %v2401_v24  ;;  %1615 = vmatmul.mubr.f32.gmra.mxu1 %v3086_v53  ;;  %v2405_v53 = vld [vmem:[#allocation2 + $0xc1] sm:$0xff] }
  0xf6   : > { %1394 = vmatprep.mubr.f32.mxu0 %v3115_v25  ;;  %1619 = vmatprep.mubr.f32.mxu1 %v2404_v46  ;;  %v811_v25 = vld [vmem:[%s3900_s1 + $0x410] sm:$0xff] }
  0xf7   : > { %2291 = vmatpush3.msra.mxu0 %v814_v45  ;;  %2375 = vmatpush3.msra.mxu1 %v815_v37 }
  0xf8   : > { %2292 = vmatprep.subr.mxu0 %v813_v51  ;;  %2360 = vmatprep.subr.mxu1 %v814_v45 }
  0xf9   : > { %1395 = vmatmul.mubr.f32.gmra.mxu0 %v2402_v31  ;;  %1620 = vmatmul.mubr.f32.gmra.mxu1 %v3102_v61  ;;  %v2406_v61 = vld [vmem:[#allocation2 + $0xc9] sm:$0xff]  ;;  %v2415_v31 = vld [vmem:[#allocation2 + $0x139] sm:$0xff] }
  0xfa   : > { %1399 = vmatprep.mubr.f32.mxu0 %v3131_v29  ;;  %1624 = vmatprep.mubr.f32.mxu1 %v2405_v53  ;;  %v810_v29 = vld [vmem:[%s3900_s1 + $0x408] sm:$0xff] }
  0xfb   : > { %2293 = vmatpush3.msra.mxu0 %v813_v51  ;;  %2376 = vmatpush3.msra.mxu1 %v814_v45 }
  0xfc   : > { %2294 = vmatprep.subr.mxu0 %v812_v57  ;;  %2361 = vmatprep.subr.mxu1 %v813_v51 }
  0xfd   : > { %1400 = vmatmul.mubr.f32.gmra.mxu0 %v2403_v41  ;;  %1625 = vmatmul.mubr.f32.gmra.mxu1 %v3118_v6  ;;  %v2407_v6 = vld [vmem:[#allocation2 + $0xd9] sm:$0xff] }
  0xfe   : > { %1404 = vmatprep.mubr.f32.mxu0 %v3147_v15  ;;  %1629 = vmatprep.mubr.f32.mxu1 %v2406_v61  ;;  %v809_v15 = vld [vmem:[%s3900_s1 + $0x400] sm:$0xff] }
  0xff   : > { %2295 = vmatpush3.msra.mxu0 %v812_v57  ;;  %2377 = vmatpush3.msra.mxu1 %v813_v51 }
 0x100   : > { %2296 = vmatprep.subr.mxu0 %v811_v25  ;;  %2362 = vmatprep.subr.mxu1 %v812_v57 }
 0x101   : > { %1405 = vmatmul.mubr.f32.gmra.mxu0 %v2404_v46  ;;  %1630 = vmatmul.mubr.f32.gmra.mxu1 %v3134_v11  ;;  %v2408_v11 = vld [vmem:[#allocation2 + $0xe1] sm:$0xff] }
 0x102   : > { %1409 = vmatprep.mubr.f32.mxu0 %v3163_v34  ;;  %1634 = vmatprep.mubr.f32.mxu1 %v2407_v6  ;;  %v2409_v34 = vld [vmem:[#allocation2 + $0xf1] sm:$0xff]  ;;  %v2416_v46 = vld [vmem:[#allocation2 + $0x141] sm:$0xff] }
 0x103   : > { %2297 = vmatpush3.msra.mxu0 %v811_v25  ;;  %2378 = vmatpush3.msra.mxu1 %v812_v57 }
 0x104   : > { %2298 = vmatprep.subr.mxu0 %v810_v29  ;;  %2363 = vmatprep.subr.mxu1 %v811_v25 }
 0x105   : > { %1410 = vmatmul.mubr.f32.gmra.mxu0 %v2405_v53  ;;  %1635 = vmatmul.mubr.f32.gmra.mxu1 %v3150_v33 }
 0x106   : > { %1414 = vmatprep.mubr.f32.mxu0 %v3179_v36  ;;  %1639 = vmatprep.mubr.f32.mxu1 %v2408_v11 }
 0x107   : > { %2299 = vmatpush3.msra.mxu0 %v810_v29  ;;  %2379 = vmatpush3.msra.mxu1 %v811_v25 }
 0x108   : > { %2300 = vmatprep.subr.mxu0 %v809_v15  ;;  %2364 = vmatprep.subr.mxu1 %v810_v29 }
 0x109   : > { %1415 = vmatmul.mubr.f32.gmra.mxu0 %v2406_v61  ;;  %1640 = vmatmul.mubr.f32.gmra.mxu1 %v3166_v26  ;;  %v2417_v61 = vld [vmem:[#allocation2 + $0x151] sm:$0xff] }
 0x10a   : > { %1419 = vmatprep.mubr.f32.mxu0 %v3197_v39  ;;  %1644 = vmatprep.mubr.f32.mxu1 %v2409_v34 }
 0x10b   : > { %2301 = vmatpush3.msra.mxu0 %v809_v15  ;;  %2380 = vmatpush3.msra.mxu1 %v810_v29 }
 0x10c   : > { %2365 = vmatprep.subr.mxu1 %v809_v15 }
 0x10d   : > { %v891_v33 = vpop.f32.mrf.mxu0  ;;  %v1116_v23 = vpop.f32.mrf.mxu1  ;;  %1420 = vmatmul.mubr.f32.gmra.mxu0 %v2407_v6  ;;  %1645 = vmatmul.mubr.f32.gmra.mxu1 %v3184_v38 }
 0x10e   : > { %v3501_v36 = vadd.f32 %v1116_v23, %v891_v33  ;;  %1424 = vmatprep.mubr.f32.mxu0 %v3213_v54  ;;  %1649 = vmatprep.mubr.f32.mxu1 %v2410_v32 }
 0x10f   : > { %v893_v22 = vpop.f32.mrf.mxu0  ;;  %v1118_v26 = vpop.f32.mrf.mxu1  ;;  %2381 = vmatpush3.msra.mxu1 %v809_v15 }
 0x110   : > { %v2419_v22 = vld [vmem:[#allocation2 + $0x169] sm:$0xff] }
 0x111   : > { %v896_v39 = vpop.f32.mrf.mxu0  ;;  %v1121_v40 = vpop.f32.mrf.mxu1  ;;  %1425 = vmatmul.mubr.f32.gmra.mxu0 %v2408_v11  ;;  %1650 = vmatmul.mubr.f32.gmra.mxu1 %v3200_v48  ;;  %v2418_v11 = vld [vmem:[#allocation2 + $0x159] sm:$0xff] }
 0x112   : > { %v3505_v4 = vadd.f32 %v1121_v40, %v896_v39  ;;  %1429 = vmatprep.mubr.f32.mxu0 %v3229_v50  ;;  %1654 = vmatprep.mubr.f32.mxu1 %v2411_v58 }
 0x113   : > { %v898_v38 = vpop.f32.mrf.mxu0  ;;  %v1123_v52 = vpop.f32.mrf.mxu1 }
 0x115   : > { %v901_v49 = vpop.f32.mrf.mxu0  ;;  %v1126_v54 = vpop.f32.mrf.mxu1  ;;  %1430 = vmatmul.mubr.f32.gmra.mxu0 %v2409_v34  ;;  %1655 = vmatmul.mubr.f32.gmra.mxu1 %v3216_v43 }
 0x116   : > { %v3509_v1 = vadd.f32 %v1126_v54, %v901_v49  ;;  %1434 = vmatprep.mubr.f32.mxu0 %v3245_v30  ;;  %1659 = vmatprep.mubr.f32.mxu1 %v2412_v62 }
 0x117   : > { %v903_v48 = vpop.f32.mrf.mxu0  ;;  %v1128_v8 = vpop.f32.mrf.mxu1 }
 0x119   : > { %v906_v5 = vpop.f32.mrf.mxu0  ;;  %v1131_v12 = vpop.f32.mrf.mxu1  ;;  %1435 = vmatmul.mubr.f32.gmra.mxu0 %v2410_v32  ;;  %1660 = vmatmul.mubr.f32.gmra.mxu1 %v3232_v28  ;;  %v3912_v32 = vld [vmem:[#allocation3_spill] sm:$0xff] }
 0x11a   : > { %v3513_v50 = vadd.f32 %v1131_v12, %v906_v5  ;;  %1439 = vmatprep.mubr.f32.mxu0 %v3261_v59  ;;  %1664 = vmatprep.mubr.f32.mxu1 %v2413_v9 }
 0x11b   : > { %v908_v43 = vpop.f32.mrf.mxu0  ;;  %v1133_v17 = vpop.f32.mrf.mxu1 }
 0x11c   : > { %v3552_v17 = vld [vmem:[#allocation2 + $0x182] sm:$0xff] }
 0x11d   : > { %v911_v14 = vpop.f32.mrf.mxu0  ;;  %v1136_v21 = vpop.f32.mrf.mxu1  ;;  %1440 = vmatmul.mubr.f32.gmra.mxu0 %v2411_v58  ;;  %1665 = vmatmul.mubr.f32.gmra.mxu1 %v3248_v56  ;;  %v2420_v58 = vld [vmem:[#allocation2 + $0x171] sm:$0xff] }
 0x11e   : > { %v3517_v30 = vadd.f32 %v1136_v21, %v911_v14  ;;  %1444 = vmatprep.mubr.f32.mxu0 %v3277_v44  ;;  %1669 = vmatprep.mubr.f32.mxu1 %v2414_v18 }
 0x11f   : > { %v913_v28 = vpop.f32.mrf.mxu0  ;;  %v1138_v27 = vpop.f32.mrf.mxu1 }
 0x121   : > { %v916_v24 = vpop.f32.mrf.mxu0  ;;  %v1141_v37 = vpop.f32.mrf.mxu1  ;;  %1445 = vmatmul.mubr.f32.gmra.mxu0 %v2412_v62  ;;  %1670 = vmatmul.mubr.f32.gmra.mxu1 %v3264_v35  ;;  %v2421_v62 = vld [vmem:[#allocation2 + $0x181] sm:$0xff] }
 0x122   : > { %v3521_v59 = vadd.f32 %v1141_v37, %v916_v24  ;;  %1449 = vmatprep.mubr.f32.mxu0 %v3293_v3  ;;  %1674 = vmatprep.mubr.f32.mxu1 %v2415_v31  ;;  %v3558_v37 = vld [vmem:[#allocation2 + $0x18a] sm:$0xff] }
 0x123   : > { %v918_v56 = vpop.f32.mrf.mxu0  ;;  %v1143_v45 = vpop.f32.mrf.mxu1 }
 0x125   : > { %v921_v41 = vpop.f32.mrf.mxu0  ;;  %v1146_v51 = vpop.f32.mrf.mxu1  ;;  %1450 = vmatmul.mubr.f32.gmra.mxu0 %v2413_v9  ;;  %1675 = vmatmul.mubr.f32.gmra.mxu1 %v3280_v63  ;;  %v2422_v9 = vld [vmem:[#allocation2 + $0x189] sm:$0xff] }
 0x126   : > { %v3525_v44 = vadd.f32 %v1146_v51, %v921_v41  ;;  %1454 = vmatprep.mubr.f32.mxu0 %v3309_v55  ;;  %1679 = vmatprep.mubr.f32.mxu1 %v2416_v46 }
 0x127   : > { %v923_v35 = vpop.f32.mrf.mxu0  ;;  %v1148_v57 = vpop.f32.mrf.mxu1 }
 0x128   : > { %v649_v35 = vld [vmem:[#allocation2 + $0x32] sm:$0xff] }
 0x129   : > { %v926_v53 = vpop.f32.mrf.mxu0  ;;  %v1151_v25 = vpop.f32.mrf.mxu1  ;;  %1455 = vmatmul.mubr.f32.gmra.mxu0 %v2414_v18  ;;  %1680 = vmatmul.mubr.f32.gmra.mxu1 %v3296_v0  ;;  %v3914_v18 = vld [vmem:[#allocation5_spill] sm:$0xff]  ;;  %v665_v57 = vld [vmem:[#allocation2 + $0xf2] sm:$0xff] }
 0x12a   : > { %v3529_v3 = vadd.f32 %v1151_v25, %v926_v53  ;;  %1459 = vmatprep.mubr.f32.mxu0 %v3325_v10  ;;  %1684 = vmatprep.mubr.f32.mxu1 %v2417_v61 }
 0x12b   : > { %v928_v63 = vpop.f32.mrf.mxu0  ;;  %v1153_v29 = vpop.f32.mrf.mxu1 }
 0x12c   : > { %v650_v63 = vld [vmem:[#allocation2 + $0x3a] sm:$0xff] }
 0x12d   : > { %v931_v6 = vpop.f32.mrf.mxu0  ;;  %v1156_v15 = vpop.f32.mrf.mxu1  ;;  %1460 = vmatmul.mubr.f32.gmra.mxu0 %v2415_v31  ;;  %1685 = vmatmul.mubr.f32.gmra.mxu1 %v3312_v7  ;;  %v648_v31 = vld [vmem:[#allocation2 + $0x1a1] sm:$0xff] }
 0x12e   : > { %v3533_v55 = vadd.f32 %v1156_v15, %v931_v6  ;;  %1464 = vmatprep.mubr.f32.mxu0 %v3341_v42  ;;  %1689 = vmatprep.mubr.f32.mxu1 %v2418_v11  ;;  %v666_v29 = vld [vmem:[#allocation2 + $0xfa] sm:$0xff] }
 0x12f   : > { %v933_v0 = vpop.f32.mrf.mxu0  ;;  %v1158_v34 = vpop.f32.mrf.mxu1 }
 0x130   : > { %v667_v0 = vld [vmem:[#allocation2 + $0x10a] sm:$0xff] }
 0x131   : > { %v936_v33 = vpop.f32.mrf.mxu0  ;;  %v1161_v23 = vpop.f32.mrf.mxu1  ;;  %1465 = vmatmul.mubr.f32.gmra.mxu0 %v2416_v46  ;;  %1690 = vmatmul.mubr.f32.gmra.mxu1 %v3328_v60 }
 0x132   : > { %v3537_v10 = vadd.f32 %v1161_v23, %v936_v33  ;;  %1469 = vmatprep.mubr.f32.mxu0 %v3912_v32  ;;  %1694 = vmatprep.mubr.f32.mxu1 %v2419_v22  ;;  %v652_v32 = vld [vmem:[#allocation2 + $0x52] sm:$0xff] }
 0x133   : > { %v938_v7 = vpop.f32.mrf.mxu0  ;;  %v1163_v26 = vpop.f32.mrf.mxu1 }
 0x134   : > { %v653_v26 = vld [vmem:[#allocation2 + $0x62] sm:$0xff] }
 0x135   : > { %v941_v39 = vpop.f32.mrf.mxu0  ;;  %v1166_v40 = vpop.f32.mrf.mxu1  ;;  %1470 = vmatmul.mubr.f32.gmra.mxu0 %v2417_v61  ;;  %1695 = vmatmul.mubr.f32.gmra.mxu1 %v3344_v16 }
 0x136   : > { %v3541_v42 = vadd.f32 %v1166_v40, %v941_v39  ;;  %1474 = vmatprep.mubr.f32.mxu0 %v3373_v13  ;;  %1699 = vmatprep.mubr.f32.mxu1 %v2420_v58  ;;  %v3913_v13 = vld [vmem:[#allocation4_spill] sm:$0xff]  ;;  %v669_v39 = vld [vmem:[#allocation2 + $0x122] sm:$0xff] }
 0x137   : > { %v943_v60 = vpop.f32.mrf.mxu0  ;;  %v1168_v38 = vpop.f32.mrf.mxu1 }
 0x138   : > { %v654_v38 = vld [vmem:[#allocation2 + $0x6a] sm:$0xff] }
 0x139   : > { %v946_v52 = vpop.f32.mrf.mxu0  ;;  %v1171_v49 = vpop.f32.mrf.mxu1  ;;  %1475 = vmatmul.mubr.f32.gmra.mxu0 %v2418_v11  ;;  %1700 = vmatmul.mubr.f32.gmra.mxu1 %v3360_v20  ;;  %v651_v11 = vld [vmem:[#allocation2 + $0x4a] sm:$0xff] }
 0x13a   : > { %v3545_v54 = vadd.f32 %v1171_v49, %v946_v52  ;;  %1479 = vmatprep.mubr.f32.mxu0 %v3389_v19  ;;  %1704 = vmatprep.mubr.f32.mxu1 %v2421_v62  ;;  %v647_v19 = vld [vmem:[#allocation2 + $0x199] sm:$0xff]  ;;  %v670_v52 = vld [vmem:[#allocation2 + $0x12a] sm:$0xff] }
 0x13b   : > { %v948_v16 = vpop.f32.mrf.mxu0  ;;  %v1173_v48 = vpop.f32.mrf.mxu1 }
 0x13c   : > { %v655_v16 = vld [vmem:[#allocation2 + $0x7a] sm:$0xff] }
 0x13d   : > { %v951_v8 = vpop.f32.mrf.mxu0  ;;  %v1176_v5 = vpop.f32.mrf.mxu1  ;;  %1480 = vmatmul.mubr.f32.gmra.mxu0 %v2419_v22  ;;  %1705 = vmatmul.mubr.f32.gmra.mxu1 %v3913_v13  ;;  %v671_v48 = vld [vmem:[#allocation2 + $0x13a] sm:$0xff] }
 0x13e   : > { %v3549_v12 = vadd.f32 %v1176_v5, %v951_v8  ;;  %1484 = vmatprep.mubr.f32.mxu0 %v3402_v47  ;;  %1709 = vmatprep.mubr.f32.mxu1 %v2422_v9 }
 0x13f   : > { %v953_v20 = vpop.f32.mrf.mxu0  ;;  %v1178_v43 = vpop.f32.mrf.mxu1 }
 0x140   : > { %v672_v20 = vld [vmem:[#allocation2 + $0x142] sm:$0xff] }
 0x141   : > { %v956_v14 = vpop.f32.mrf.mxu0  ;;  %v1181_v21 = vpop.f32.mrf.mxu1  ;;  %1485 = vmatmul.mubr.f32.gmra.mxu0 %v2420_v58  ;;  %1710 = vmatmul.mubr.f32.gmra.mxu1 %v3914_v18 }
 0x142   : > { %v3555_v28 = vadd.f32 %v1181_v21, %v956_v14  ;;  %1489 = vmatprep.mubr.f32.mxu0 %v3552_v17  ;;  %1714 = vmatprep.mubr.f32.mxu1 %v647_v19  ;;  %v657_v14 = vld [vmem:[#allocation2 + $0x92] sm:$0xff] }
 0x143   : > { %v958_v27 = vpop.f32.mrf.mxu0  ;;  %v1183_v24 = vpop.f32.mrf.mxu1  ;;  %v673_v21 = vld [vmem:[#allocation2 + $0x152] sm:$0xff] }
 0x145   : > { %v961_v56 = vpop.f32.mrf.mxu0  ;;  %v1186_v45 = vpop.f32.mrf.mxu1  ;;  %1490 = vmatmul.mubr.f32.gmra.mxu0 %v2421_v62  ;;  %1715 = vmatmul.mubr.f32.gmra.mxu1 %v3181_v2 }
 0x146   : > { %v3561_v41 = vadd.f32 %v1186_v45, %v961_v56  ;;  %1494 = vmatprep.mubr.f32.mxu0 %v3558_v37  ;;  %1719 = vmatprep.mubr.f32.mxu1 %v648_v31  ;;  %v658_v31 = vld [vmem:[#allocation2 + $0x9a] sm:$0xff] }
 0x147   : > { %v963_v51 = vpop.f32.mrf.mxu0  ;;  %v1188_v46 = vpop.f32.mrf.mxu1  ;;  %v674_v56 = vld [vmem:[#allocation2 + $0x15a] sm:$0xff] }
 0x148   : > { %v659_v46 = vld [vmem:[#allocation2 + $0xaa] sm:$0xff] }
 0x149   : > { %v966_v53 = vpop.f32.mrf.mxu0  ;;  %v1191_v25 = vpop.f32.mrf.mxu1  ;;  %1495 = vmatmul.mubr.f32.gmra.mxu0 %v2422_v9  ;;  %1720 = vmatmul.mubr.f32.gmra.mxu1 %v3181_v2  ;;  %v668_v2 = vld [vmem:[#allocation2 + $0x112] sm:$0xff]  ;;  %v656_v9 = vld [vmem:[#allocation2 + $0x82] sm:$0xff] }
 0x14a   : > { %v3565_v61 = vadd.f32 %v1191_v25, %v966_v53  ;;  %2302 = vmatprep.mubr.f32.mxu0 %v649_v35  ;;  %2326 = vmatprep.mubr.f32.mxu1 %v665_v57  ;;  %v675_v35 = vld [vmem:[#allocation2 + $0x16a] sm:$0xff] }
 0x14b   : > { %v968_v6 = vpop.f32.mrf.mxu0  ;;  %v1193_v15 = vpop.f32.mrf.mxu1 }
 0x14c   : > { %v661_v15 = vld [vmem:[#allocation2 + $0xc2] sm:$0xff] }
 0x14d   : > { %v971_v34 = vpop.f32.mrf.mxu0  ;;  %v1196_v33 = vpop.f32.mrf.mxu1  ;;  %2303 = vmatmul.mubr.f32.vlgmr.msra.gmra.mxu0 %v650_v63  ;;  %2327 = vmatmul.mubr.f32.vlgmr.msra.gmra.mxu1 %v666_v29  ;;  %v660_v63 = vld [vmem:[#allocation2 + $0xb2] sm:$0xff] }
 0x14e   : > { %v3567_v23 = vadd.f32 %v1196_v33, %v971_v34  ;;  %2305 = vmatprep.mubr.f32.mxu0 %v651_v11  ;;  %2329 = vmatprep.mubr.f32.mxu1 %v667_v0  ;;  %v662_v33 = vld [vmem:[#allocation2 + $0xca] sm:$0xff] }
 0x14f   : > { %v973_v22 = vpop.f32.mrf.mxu0  ;;  %v1198_v7 = vpop.f32.mrf.mxu1 }
 0x150   : > { %v663_v22 = vld [vmem:[#allocation2 + $0xda] sm:$0xff] }
 0x151   : > { %v976_v40 = vpop.f32.mrf.mxu0  ;;  %v1201_v58 = vpop.f32.mrf.mxu1  ;;  %2306 = vmatmul.mubr.f32.gmra.mxu0 %v652_v32  ;;  %2330 = vmatmul.mubr.f32.gmra.mxu1 %v668_v2  ;;  %v679_v7 = vld [vmem:[#allocation2 + $0x19a] sm:$0xff] }
 0x152   : > { %v3569_v60 = vadd.f32 %v1201_v58, %v976_v40  ;;  %2308 = vmatprep.mubr.f32.mxu0 %v653_v26  ;;  %2332 = vmatprep.mubr.f32.mxu1 %v669_v39  ;;  %v680_v58 = vld [vmem:[#allocation2 + $0x1a2] sm:$0xff] }
 0x153   : > { %v978_v49 = vpop.f32.mrf.mxu0  ;;  %v1203_v62 = vpop.f32.mrf.mxu1 }
 0x155   : > { %v981_v8 = vpop.f32.mrf.mxu0  ;;  %v1206_v5 = vpop.f32.mrf.mxu1  ;;  %2309 = vmatmul.mubr.f32.gmra.mxu0 %v654_v38  ;;  %2333 = vmatmul.mubr.f32.gmra.mxu1 %v670_v52 }
 0x156   : > { %v3571_v13 = vadd.f32 %v1206_v5, %v981_v8  ;;  %2311 = vmatprep.mubr.f32.mxu0 %v655_v16  ;;  %2335 = vmatprep.mubr.f32.mxu1 %v671_v48 }
 0x157   : > { %v983_v43 = vpop.f32.mrf.mxu0  ;;  %v1208_v19 = vpop.f32.mrf.mxu1 }
 0x159   : > { %v986_v18 = vpop.f32.mrf.mxu0  ;;  %v1211_v27 = vpop.f32.mrf.mxu1  ;;  %2312 = vmatmul.mubr.f32.gmra.mxu0 %v656_v9  ;;  %2336 = vmatmul.mubr.f32.gmra.mxu1 %v672_v20 }
 0x15a   : > { %v3573_v24 = vadd.f32 %v1211_v27, %v986_v18  ;;  %2314 = vmatprep.mubr.f32.mxu0 %v657_v14  ;;  %2338 = vmatprep.mubr.f32.mxu1 %v673_v21 }
 0x15b   : > { %v988_v45 = vpop.f32.mrf.mxu0  ;;  %v1213_v51 = vpop.f32.mrf.mxu1 }
 0x15d   : > { %v991_v57 = vpop.f32.mrf.mxu0  ;;  %v1216_v53 = vpop.f32.mrf.mxu1  ;;  %2315 = vmatmul.mubr.f32.gmra.mxu0 %v658_v31  ;;  %2339 = vmatmul.mubr.f32.gmra.mxu1 %v674_v56 }
 0x15e   : > { %v3575_v25 = vadd.f32 %v1216_v53, %v991_v57  ;;  %2317 = vmatprep.mubr.f32.mxu0 %v659_v46  ;;  %2341 = vmatprep.mubr.f32.mxu1 %v675_v35 }
 0x15f   : > { %v993_v29 = vpop.f32.mrf.mxu0  ;;  %v1218_v6 = vpop.f32.mrf.mxu1 }
 0x161   : > { %v996_v11 = vpop.f32.mrf.mxu0  ;;  %v1221_v0 = vpop.f32.mrf.mxu1  ;;  %2318 = vmatmul.mubr.f32.gmra.mxu0 %v660_v63  ;;  %2342 = vmatmul.mubr.f32.gmra.mxu1 %v3402_v47  ;;  %v664_v47 = vld [vmem:[#allocation2 + $0xe2] sm:$0xff] }
 0x162   : > { %v3578_v34 = vadd.f32 %v1221_v0, %v996_v11  ;;  %2320 = vmatprep.mubr.f32.mxu0 %v661_v15  ;;  %2344 = vmatprep.mubr.f32.mxu1 %v3552_v17 }
 0x163   : > { %v998_v32 = vpop.f32.mrf.mxu0  ;;  %v1223_v2 = vpop.f32.mrf.mxu1 }
 0x165   : > { %v1001_v26 = vpop.f32.mrf.mxu0  ;;  %v1226_v39 = vpop.f32.mrf.mxu1  ;;  %2321 = vmatmul.mubr.f32.gmra.mxu0 %v662_v33  ;;  %2345 = vmatmul.mubr.f32.gmra.mxu1 %v3558_v37 }
 0x166   : > { %v3582_v40 = vadd.f32 %v1226_v39, %v1001_v26  ;;  %2323 = vmatprep.mubr.f32.mxu0 %v663_v22  ;;  %2347 = vmatprep.mubr.f32.mxu1 %v679_v7 }
 0x167   : > { %v1003_v38 = vpop.f32.mrf.mxu0  ;;  %v1228_v52 = vpop.f32.mrf.mxu1 }
 0x169   : > { %v1006_v49 = vpop.f32.mrf.mxu0  ;;  %v1231_v17 = vpop.f32.mrf.mxu1  ;;  %2324 = vmatmul.mubr.f32.gmra.mxu0 %v664_v47  ;;  %2348 = vmatmul.mubr.f32.gmra.mxu1 %v680_v58 }
 0x16a   : > { %v3584_v62 = vadd.f32 %v1231_v17, %v1006_v49 }
 0x16b   : > { %v1008_v16 = vpop.f32.mrf.mxu0  ;;  %v1233_v48 = vpop.f32.mrf.mxu1 }
 0x16d   : > { %v1011_v8 = vpop.f32.mrf.mxu0  ;;  %v1236_v5 = vpop.f32.mrf.mxu1 }
 0x16e   : > { %v3586_v9 = vadd.f32 %v1236_v5, %v1011_v8 }
 0x16f   : > { %v1013_v37 = vpop.f32.mrf.mxu0  ;;  %v1238_v20 = vpop.f32.mrf.mxu1 }
 0x171   : > { %v1016_v43 = vpop.f32.mrf.mxu0  ;;  %v1241_v19 = vpop.f32.mrf.mxu1 }
 0x172   : > { %v3588_v14 = vadd.f32 %v1241_v19, %v1016_v43 }
 0x173   : > { %v1018_v21 = vpop.f32.mrf.mxu0  ;;  %v1243_v18 = vpop.f32.mrf.mxu1 }
 0x175   : > { %v1021_v27 = vpop.f32.mrf.mxu0  ;;  %v1246_v31 = vpop.f32.mrf.mxu1 }
 0x176   : > { %v3590_v56 = vadd.f32 %v1246_v31, %v1021_v27 }
 0x177   : > { %v1023_v45 = vpop.f32.mrf.mxu0  ;;  %v1248_v51 = vpop.f32.mrf.mxu1 }
 0x179   : > { %v1026_v46 = vpop.f32.mrf.mxu0  ;;  %v1251_v35 = vpop.f32.mrf.mxu1 }
 0x17a   : > { %v3592_v57 = vadd.f32 %v1251_v35, %v1026_v46 }
 0x17b   : > { %v1028_v53 = vpop.f32.mrf.mxu0  ;;  %v1253_v63 = vpop.f32.mrf.mxu1 }
 0x17d   : > { %v1031_v29 = vpop.f32.mrf.mxu0  ;;  %v1256_v6 = vpop.f32.mrf.mxu1 }
 0x17e   : > { %v3594_v15 = vadd.f32 %v1256_v6, %v1031_v29 }
 0x17f   : > { %v1033_v11 = vpop.f32.mrf.mxu0  ;;  %v1258_v0 = vpop.f32.mrf.mxu1 }
 0x181   : > { %v1036_v33 = vpop.f32.mrf.mxu0  ;;  %v1261_v32 = vpop.f32.mrf.mxu1 }
 0x182   : > { %v3596_v2 = vadd.f32 %v1261_v32, %v1036_v33 }
 0x183   : > { %v1038_v22 = vpop.f32.mrf.mxu0  ;;  %v1263_v7 = vpop.f32.mrf.mxu1 }
 0x185   : > { %v1041_v26 = vpop.f32.mrf.mxu0  ;;  %v1266_v39 = vpop.f32.mrf.mxu1 }
 0x186   : > { %v3598_v47 = vadd.f32 %v1266_v39, %v1041_v26 }
 0x187   : > { %v1043_v58 = vpop.f32.mrf.mxu0  ;;  %v1268_v38 = vpop.f32.mrf.mxu1 }
 0x188   : > { %3915 = vst [vmem:[#allocation3_spill] sm:$0xff] %v3598_v47 }
 0x189   : > { %v1046_v52 = vpop.f32.mrf.mxu0  ;;  %v1271_v49 = vpop.f32.mrf.mxu1 }
 0x18a   : > { %v3600_v17 = vadd.f32 %v1271_v49, %v1046_v52 }
 0x18b   : > { %v1048_v16 = vpop.f32.mrf.mxu0  ;;  %v1273_v48 = vpop.f32.mrf.mxu1 }
 0x18c   : > { %3916 = vst [vmem:[#allocation4_spill] sm:$0xff] %v3600_v17 }
 0x18d   : > { %v1341_v8 = vpop.f32.mrf.mxu0  ;;  %v1566_v5 = vpop.f32.mrf.mxu1 }
 0x18e   : > { %v1342_v37 = vadd.f32 %v1341_v8, %v3501_v36 }
 0x18f   : > { %v1343_v20 = vpop.f32.mrf.mxu0  ;;  %v1568_v43 = vpop.f32.mrf.mxu1 }
 0x190   : > { %v3603_v19 = vadd.f32 %v1566_v5, %v1342_v37 }
 0x191   : > { %v1346_v21 = vpop.f32.mrf.mxu0  ;;  %v1571_v18 = vpop.f32.mrf.mxu1 }
 0x192   : > { %v1347_v27 = vadd.f32 %v1346_v21, %v3505_v4 }
 0x193   : > { %v1348_v31 = vpop.f32.mrf.mxu0  ;;  %v1573_v45 = vpop.f32.mrf.mxu1 }
 0x194   : > { %v3606_v51 = vadd.f32 %v1571_v18, %v1347_v27 }
 0x195   : > { %v1351_v46 = vpop.f32.mrf.mxu0  ;;  %v1576_v35 = vpop.f32.mrf.mxu1 }
 0x196   : > { %v1352_v53 = vadd.f32 %v1351_v46, %v3509_v1 }
 0x197   : > { %v1353_v63 = vpop.f32.mrf.mxu0  ;;  %v1578_v29 = vpop.f32.mrf.mxu1 }
 0x198   : > { %v3609_v6 = vadd.f32 %v1576_v35, %v1352_v53 }
 0x199   : > { %v1356_v36 = vpop.f32.mrf.mxu0  ;;  %v1581_v11 = vpop.f32.mrf.mxu1 }
 0x19a   : > { %v1357_v0 = vadd.f32 %v1356_v36, %v3513_v50 }
 0x19b   : > { %v1358_v33 = vpop.f32.mrf.mxu0  ;;  %v1583_v32 = vpop.f32.mrf.mxu1 }
 0x19c   : > { %v3612_v22 = vadd.f32 %v1581_v11, %v1357_v0 }
 0x19d   : > { %v1361_v4 = vpop.f32.mrf.mxu0  ;;  %v1586_v7 = vpop.f32.mrf.mxu1 }
 0x19e   : > { %v1362_v26 = vadd.f32 %v1361_v4, %v3517_v30 }
 0x19f   : > { %v1363_v39 = vpop.f32.mrf.mxu0  ;;  %v1588_v58 = vpop.f32.mrf.mxu1 }
 0x1a0   : > { %v3615_v38 = vadd.f32 %v1586_v7, %v1362_v26 }
 0x1a1   : > { %v1366_v1 = vpop.f32.mrf.mxu0  ;;  %v1591_v52 = vpop.f32.mrf.mxu1 }
 0x1a2   : > { %v1367_v49 = vadd.f32 %v1366_v1, %v3521_v59 }
 0x1a3   : > { %v1368_v16 = vpop.f32.mrf.mxu0  ;;  %v1593_v48 = vpop.f32.mrf.mxu1 }
 0x1a4   : > { %v3618_v8 = vadd.f32 %v1591_v52, %v1367_v49 }
 0x1a5   : > { %v1371_v50 = vpop.f32.mrf.mxu0  ;;  %v1596_v5 = vpop.f32.mrf.mxu1 }
 0x1a6   : > { %v1372_v37 = vadd.f32 %v1371_v50, %v3525_v44 }
 0x1a7   : > { %v1373_v20 = vpop.f32.mrf.mxu0  ;;  %v1598_v43 = vpop.f32.mrf.mxu1 }
 0x1a8   : > { %v3621_v21 = vadd.f32 %v1596_v5, %v1372_v37 }
 0x1a9   : > { %v1376_v30 = vpop.f32.mrf.mxu0  ;;  %v1601_v18 = vpop.f32.mrf.mxu1 }
 0x1aa   : > { %v1377_v27 = vadd.f32 %v1376_v30, %v3529_v3 }
 0x1ab   : > { %v1378_v31 = vpop.f32.mrf.mxu0  ;;  %v1603_v45 = vpop.f32.mrf.mxu1 }
 0x1ac   : > { %v3624_v46 = vadd.f32 %v1601_v18, %v1377_v27 }
 0x1ad   : > { %v1381_v59 = vpop.f32.mrf.mxu0  ;;  %v1606_v35 = vpop.f32.mrf.mxu1 }
 0x1ae   : > { %v1382_v53 = vadd.f32 %v1381_v59, %v3533_v55 }
 0x1af   : > { %v1383_v63 = vpop.f32.mrf.mxu0  ;;  %v1608_v29 = vpop.f32.mrf.mxu1 }
 0x1b0   : > { %v3627_v36 = vadd.f32 %v1606_v35, %v1382_v53 }
 0x1b1   : > { %v1386_v44 = vpop.f32.mrf.mxu0  ;;  %v1611_v11 = vpop.f32.mrf.mxu1 }
 0x1b2   : > { %v1387_v0 = vadd.f32 %v1386_v44, %v3537_v10 }
 0x1b3   : > { %v1388_v33 = vpop.f32.mrf.mxu0  ;;  %v1613_v32 = vpop.f32.mrf.mxu1 }
 0x1b4   : > { %v3630_v4 = vadd.f32 %v1611_v11, %v1387_v0 }
 0x1b5   : > { %v1391_v3 = vpop.f32.mrf.mxu0  ;;  %v1616_v7 = vpop.f32.mrf.mxu1 }
 0x1b6   : > { %v1392_v26 = vadd.f32 %v1391_v3, %v3541_v42 }
 0x1b7   : > { %v1393_v39 = vpop.f32.mrf.mxu0  ;;  %v1618_v58 = vpop.f32.mrf.mxu1 }
 0x1b8   : > { %v3633_v1 = vadd.f32 %v1616_v7, %v1392_v26 }
 0x1b9   : > { %v1396_v55 = vpop.f32.mrf.mxu0  ;;  %v1621_v52 = vpop.f32.mrf.mxu1 }
 0x1ba   : > { %v1397_v49 = vadd.f32 %v1396_v55, %v3545_v54 }
 0x1bb   : > { %v1398_v16 = vpop.f32.mrf.mxu0  ;;  %v1623_v48 = vpop.f32.mrf.mxu1 }
 0x1bc   : > { %v3636_v50 = vadd.f32 %v1621_v52, %v1397_v49 }
 0x1bd   : > { %v1401_v10 = vpop.f32.mrf.mxu0  ;;  %v1626_v5 = vpop.f32.mrf.mxu1 }
 0x1be   : > { %v1402_v37 = vadd.f32 %v1401_v10, %v3549_v12 }
 0x1bf   : > { %v1403_v20 = vpop.f32.mrf.mxu0  ;;  %v1628_v43 = vpop.f32.mrf.mxu1 }
 0x1c0   : > { %v3639_v30 = vadd.f32 %v1626_v5, %v1402_v37 }
 0x1c1   : > { %v1406_v42 = vpop.f32.mrf.mxu0  ;;  %v1631_v18 = vpop.f32.mrf.mxu1 }
 0x1c2   : > { %3917 = vst [vmem:[#allocation5_spill] sm:$0xff] %v3639_v30  ;;  %v1407_v27 = vadd.f32 %v1406_v42, %v3555_v28 }
 0x1c3   : > { %v1408_v31 = vpop.f32.mrf.mxu0  ;;  %v1633_v45 = vpop.f32.mrf.mxu1 }
 0x1c4   : > { %v3642_v59 = vadd.f32 %v1631_v18, %v1407_v27 }
 0x1c5   : > { %v1411_v54 = vpop.f32.mrf.mxu0  ;;  %v1636_v35 = vpop.f32.mrf.mxu1 }
 0x1c6   : > { %3918 = vst [vmem:[#allocation6_spill] sm:$0xff] %v3642_v59  ;;  %v1412_v53 = vadd.f32 %v1411_v54, %v3561_v41 }
 0x1c7   : > { %v1413_v63 = vpop.f32.mrf.mxu0  ;;  %v1638_v29 = vpop.f32.mrf.mxu1 }
 0x1c8   : > { %v3645_v44 = vadd.f32 %v1636_v35, %v1412_v53 }
 0x1c9   : > { %v1416_v12 = vpop.f32.mrf.mxu0  ;;  %v1641_v11 = vpop.f32.mrf.mxu1 }
 0x1ca   : > { %3919 = vst [vmem:[#allocation7_spill] sm:$0xff] %v3645_v44  ;;  %v1417_v0 = vadd.f32 %v1416_v12, %v3565_v61 }
 0x1cb   : > { %v1418_v33 = vpop.f32.mrf.mxu0  ;;  %v1643_v32 = vpop.f32.mrf.mxu1 }
 0x1cc   : > { %v3648_v3 = vadd.f32 %v1641_v11, %v1417_v0 }
 0x1cd   : > { %v1421_v28 = vpop.f32.mrf.mxu0  ;;  %v1646_v7 = vpop.f32.mrf.mxu1 }
 0x1ce   : > { %3920 = vst [vmem:[#allocation8_spill] sm:$0xff] %v3648_v3  ;;  %v1422_v26 = vadd.f32 %v1421_v28, %v3567_v23 }
 0x1cf   : > { %v1423_v39 = vpop.f32.mrf.mxu0  ;;  %v1648_v58 = vpop.f32.mrf.mxu1 }
 0x1d0   : > { %v3651_v55 = vadd.f32 %v1646_v7, %v1422_v26 }
 0x1d1   : > { %v1426_v41 = vpop.f32.mrf.mxu0  ;;  %v1651_v52 = vpop.f32.mrf.mxu1 }
 0x1d3   : > { %v1428_v49 = vpop.f32.mrf.mxu0  ;;  %v1653_v16 = vpop.f32.mrf.mxu1 }
 0x1d5   : > { %v1431_v48 = vpop.f32.mrf.mxu0  ;;  %v3653_v10 = vpop.f32.mrf.mxu1 }
 0x1d6   : > { %v1432_v17 = vadd.f32 %v1431_v48, %v3571_v13 }
 0x1d7   : > { %v1433_v61 = vpop.f32.mrf.mxu0  ;;  %v1658_v5 = vpop.f32.mrf.mxu1 }
 0x1d9   : > { %v1436_v37 = vpop.f32.mrf.mxu0  ;;  %v3655_v20 = vpop.f32.mrf.mxu1 }
 0x1db   : > { %v1438_v43 = vpop.f32.mrf.mxu0  ;;  %v1663_v42 = vpop.f32.mrf.mxu1 }
 0x1dd   : > { %v3657_v18 = vpop.f32.mrf.mxu0  ;;  %v3659_v23 = vpop.f32.mrf.mxu1 }
 0x1df   : > { %v1443_v27 = vpop.f32.mrf.mxu0  ;;  %v1668_v31 = vpop.f32.mrf.mxu1 }
 0x1e1   : > { %v1446_v45 = vpop.f32.mrf.mxu0  ;;  %v3661_v54 = vpop.f32.mrf.mxu1 }
 0x1e3   : > { %v1448_v35 = vpop.f32.mrf.mxu0  ;;  %v1673_v53 = vpop.f32.mrf.mxu1 }
 0x1e5   : > { %v3663_v63 = vpop.f32.mrf.mxu0  ;;  %v3665_v29 = vpop.f32.mrf.mxu1 }
 0x1e7   : > { %v1453_v12 = vpop.f32.mrf.mxu0  ;;  %v1678_v11 = vpop.f32.mrf.mxu1 }
 0x1e9   : > { %v3667_v0 = vpop.f32.mrf.mxu0  ;;  %v3669_v33 = vpop.f32.mrf.mxu1 }
 0x1eb   : > { %v1458_v32 = vpop.f32.mrf.mxu0  ;;  %v1683_v28 = vpop.f32.mrf.mxu1 }
 0x1ed   : > { %v3671_v7 = vpop.f32.mrf.mxu0  ;;  %v3673_v26 = vpop.f32.mrf.mxu1 }
 0x1ef   : > { %v1463_v39 = vpop.f32.mrf.mxu0  ;;  %v1688_v58 = vpop.f32.mrf.mxu1 }
 0x1f1   : > { %v3675_v49 = vpop.f32.mrf.mxu0  ;;  %v3677_v16 = vpop.f32.mrf.mxu1 }
 0x1f3   : > { %v1468_v61 = vpop.f32.mrf.mxu0  ;;  %v1693_v5 = vpop.f32.mrf.mxu1 }
 0x1f5   : > { %v3679_v43 = vpop.f32.mrf.mxu0  ;;  %v3681_v42 = vpop.f32.mrf.mxu1 }
 0x1f7   : > { %v1473_v27 = vpop.f32.mrf.mxu0  ;;  %v1698_v31 = vpop.f32.mrf.mxu1 }
 0x1f9   : > { %v3683_v35 = vpop.f32.mrf.mxu0  ;;  %v3685_v53 = vpop.f32.mrf.mxu1 }
 0x1fb   : > { %v1478_v12 = vpop.f32.mrf.mxu0  ;;  %v1703_v11 = vpop.f32.mrf.mxu1 }
 0x1fc   : > { %v1427_v11 = vadd.f32 %v1426_v41, %v3569_v60 }
 0x1fd   : > { %v3687_v32 = vpop.f32.mrf.mxu0  ;;  %v3689_v28 = vpop.f32.mrf.mxu1 }
 0x1fe   : > { %3921 = vst [vmem:[#allocation9_spill] sm:$0xff] %v3689_v28  ;;  %v1652_v59 = vadd.f32 %v1651_v52, %v1427_v11 }
 0x1ff   : > { %v1483_v39 = vpop.f32.mrf.mxu0  ;;  %v1708_v58 = vpop.f32.mrf.mxu1 }
 0x201   : > { %v3691_v61 = vpop.f32.mrf.mxu0  ;;  %v3693_v5 = vpop.f32.mrf.mxu1 }
 0x203   : > { %v1488_v44 = vpop.f32.mrf.mxu0  ;;  %v1713_v27 = vpop.f32.mrf.mxu1 }
 0x204   : > { %v1437_v44 = vadd.f32 %v1436_v37, %v3573_v24  ;;  %v1657_v37 = vadd.f32 %v3653_v10, %v1432_v17  ;;  %v1442_v17 = vadd.f32 %v3657_v18, %v3575_v25 }
 0x205   : > { %v3695_v31 = vpop.f32.mrf.mxu0  ;;  %v3697_v3 = vpop.f32.mrf.mxu1 }
 0x207   : > { %v1493_v30 = vpop.f32.mrf.mxu0  ;;  %v1718_v12 = vpop.f32.mrf.mxu1 }
 0x208   : > { %v1662_v12 = vadd.f32 %v3655_v20, %v1437_v44 }
 0x209   : > { %v3700_v47 = vpop.f32.mrf.mxu0  ;;  %v3702_v28 = vpop.f32.mrf.mxu1 }
 0x20b   : > { %v1498_v39 = vpop.f32.mrf.mxu0  ;;  %v1723_v58 = vpop.f32.mrf.mxu1 }
 0x20d   : > { %v2304_v60 = vpop.f32.mrf.mxu0  ;;  %v2328_v30 = vpop.f32.mrf.mxu1 }
 0x20e   : > { %v1797_v41 = vadd.f32 %v2304_v60, %v3606_v51  ;;  %v3714_v27 = vadd.f32 %v2328_v30, %v1652_v59  ;;  %v1447_v51 = vadd.f32 %v1446_v45, %v3578_v34 }
 0x20f   : > { %v1791_v52 = vpop.f32.mrf.mxu0  ;;  %v1871_v13 = vpop.f32.mrf.mxu1 }
 0x210   : > { %1951 = vst [vmem:[%s3711_s18 + $0x8] sm:$0xff] %v1797_v41  ;;  %1967 = vst [vmem:[%s3711_s18 + $0x88] sm:$0xff] %v3714_v27  ;;  %v1792_v24 = vadd.f32 %v1791_v52, %v3603_v19  ;;  %v3721_v48 = vadd.f32 %v1871_v13, %v3651_v55  ;;  %v2020_v39 = vmul.f32 %v1797_v41, %v1797_v41 }
 0x211   : > { %v2307_v59 = vpop.f32.mrf.mxu0  ;;  %v2331_v11 = vpop.f32.mrf.mxu1  ;;  %v1672_v30 = vadd.f32 %v3661_v54, %v1447_v51  ;;  %v1667_v13 = vadd.f32 %v3659_v23, %v1442_v17  ;;  %v1452_v54 = vadd.f32 %v3663_v63, %v3582_v40 }
 0x212   : > { %1950 = vst [vmem:[%s3711_s18] sm:$0xff] %v1792_v24  ;;  %v1982_v58 = vadd.f32 %v1797_v41, %v1792_v24  ;;  %v2019_v60 = vmul.f32 %v1792_v24, %v1792_v24  ;;  %1966 = vst [vmem:[%s3711_s18 + $0x80] sm:$0xff] %v3721_v48  ;;  %v1807_v19 = vadd.f32 %v2307_v59, %v3612_v22 }
 0x213   : > { %v3732_v55 = vadd.f32 %v2331_v11, %v1662_v12  ;;  %v1801_v10 = vpop.f32.mrf.mxu0  ;;  %v1881_v34 = vpop.f32.mrf.mxu1  ;;  %v1457_v41 = vadd.f32 %v3667_v0, %v3584_v62 }
 0x214   : > { %v2051_v20 = vadd.f32 %v2020_v39, %v2019_v60  ;;  %1953 = vst [vmem:[%s3711_s18 + $0x18] sm:$0xff] %v1807_v19  ;;  %v1802_v45 = vadd.f32 %v1801_v10, %v3609_v6  ;;  %v3736_v44 = vadd.f32 %v1881_v34, %v1657_v37  ;;  %v2022_v37 = vmul.f32 %v1807_v19, %v1807_v19 }
 0x215   : > { %1969 = vst [vmem:[%s3711_s18 + $0x98] sm:$0xff] %v3732_v55  ;;  %v2310_v25 = vpop.f32.mrf.mxu0  ;;  %v2334_v22 = vpop.f32.mrf.mxu1  ;;  %v1682_v11 = vadd.f32 %v3669_v33, %v1457_v41  ;;  %v1462_v33 = vadd.f32 %v3671_v7, %v3586_v9 }
 0x216   : > { %1952 = vst [vmem:[%s3711_s18 + $0x10] sm:$0xff] %v1802_v45  ;;  %v1983_v18 = vadd.f32 %v1982_v58, %v1802_v45  ;;  %v2021_v52 = vmul.f32 %v1802_v45, %v1802_v45  ;;  %1968 = vst [vmem:[%s3711_s18 + $0x90] sm:$0xff] %v3736_v44  ;;  %v1817_v6 = vadd.f32 %v2310_v25, %v3618_v8 }
 0x217   : > { %v3750_v62 = vadd.f32 %v2334_v22, %v1672_v30  ;;  %v1811_v0 = vpop.f32.mrf.mxu0  ;;  %v1891_v24 = vpop.f32.mrf.mxu1  ;;  %v1467_v8 = vadd.f32 %v3675_v49, %v3588_v14 }
 0x218   : > { %v2052_v12 = vadd.f32 %v2051_v20, %v2021_v52  ;;  %1955 = vst [vmem:[%s3711_s18 + $0x28] sm:$0xff] %v1817_v6  ;;  %v1812_v51 = vadd.f32 %v1811_v0, %v3615_v38  ;;  %v1984_v59 = vadd.f32 %v1983_v18, %v1807_v19  ;;  %v3759_v23 = vadd.f32 %v1891_v24, %v1667_v13 }
 0x219   : > { %1971 = vst [vmem:[%s3711_s18 + $0xa8] sm:$0xff] %v3750_v62  ;;  %v2313_v40 = vpop.f32.mrf.mxu0  ;;  %v2337_v63 = vpop.f32.mrf.mxu1  ;;  %v1677_v19 = vadd.f32 %v3665_v29, %v1452_v54  ;;  %v2024_v10 = vmul.f32 %v1817_v6, %v1817_v6  ;;  %v1477_v29 = vadd.f32 %v3683_v35, %v3592_v57  ;;  %v1687_v18 = vadd.f32 %v3673_v26, %v1462_v33 }
 0x21a   : > { %1954 = vst [vmem:[%s3711_s18 + $0x20] sm:$0xff] %v1812_v51  ;;  %v1985_v39 = vadd.f32 %v1984_v59, %v1812_v51  ;;  %v2023_v58 = vmul.f32 %v1812_v51, %v1812_v51  ;;  %v2053_v60 = vadd.f32 %v2052_v12, %v2022_v37  ;;  %v1827_v38 = vadd.f32 %v2313_v40, %v3624_v46 }
 0x21b   : > { %1970 = vst [vmem:[%s3711_s18 + $0xa0] sm:$0xff] %v3759_v23  ;;  %v3768_v14 = vadd.f32 %v2337_v63, %v1682_v11  ;;  %v1821_v49 = vpop.f32.mrf.mxu0  ;;  %v1901_v17 = vpop.f32.mrf.mxu1  ;;  %v1692_v46 = vadd.f32 %v3677_v16, %v1467_v8  ;;  %v1472_v16 = vadd.f32 %v3679_v43, %v3590_v56  ;;  %v1487_v26 = vadd.f32 %v3691_v61, %v3596_v2 }
 0x21c   : > { %v2054_v34 = vadd.f32 %v2053_v60, %v2023_v58  ;;  %1957 = vst [vmem:[%s3711_s18 + $0x38] sm:$0xff] %v1827_v38  ;;  %v1822_v20 = vadd.f32 %v1821_v49, %v3621_v21  ;;  %v1986_v45 = vadd.f32 %v1985_v39, %v1817_v6  ;;  %v3777_v9 = vadd.f32 %v1901_v17, %v1677_v19  ;;  %v3923_v49 = vld [vmem:[#allocation6_spill] sm:$0xff]  ;;  %v3924_v17 = vld [vmem:[#allocation9_spill] sm:$0xff] }
 0x21d   : > { %1973 = vst [vmem:[%s3711_s18 + $0xb8] sm:$0xff] %v3768_v14  ;;  %v2316_v7 = vpop.f32.mrf.mxu0  ;;  %v2340_v30 = vpop.f32.mrf.mxu1  ;;  %v2026_v6 = vmul.f32 %v1827_v38, %v1827_v38  ;;  %v1697_v59 = vadd.f32 %v3681_v42, %v1472_v16  ;;  %v3922_v42 = vld [vmem:[#allocation4_spill] sm:$0xff] }
 0x21e   : > { %1956 = vst [vmem:[%s3711_s18 + $0x30] sm:$0xff] %v1822_v20  ;;  %v1987_v41 = vadd.f32 %v1986_v45, %v1822_v20  ;;  %v2025_v25 = vmul.f32 %v1822_v20, %v1822_v20  ;;  %v2055_v22 = vadd.f32 %v2054_v34, %v2024_v10  ;;  %v1837_v21 = vadd.f32 %v2316_v7, %v3630_v4  ;;  %v3926_v7 = vld [vmem:[#allocation5_spill] sm:$0xff] }
 0x21f   : > { %1972 = vst [vmem:[%s3711_s18 + $0xb0] sm:$0xff] %v3777_v9  ;;  %v3786_v57 = vadd.f32 %v2340_v30, %v1692_v46  ;;  %v1831_v35 = vpop.f32.mrf.mxu0  ;;  %v1911_v52 = vpop.f32.mrf.mxu1  ;;  %v1702_v4 = vadd.f32 %v3685_v53, %v1477_v29  ;;  %v1482_v53 = vadd.f32 %v3687_v32, %v3594_v15  ;;  %v1497_v58 = vadd.f32 %v3700_v47, %v3922_v42 }
 0x220   : > { %v2056_v13 = vadd.f32 %v2055_v22, %v2025_v25  ;;  %1959 = vst [vmem:[%s3711_s18 + $0x48] sm:$0xff] %v1837_v21  ;;  %v1832_v54 = vadd.f32 %v1831_v35, %v3627_v36  ;;  %v1988_v0 = vadd.f32 %v1987_v41, %v1827_v38  ;;  %v3795_v56 = vadd.f32 %v1911_v52, %v1687_v18  ;;  %v3927_v52 = vld [vmem:[#allocation8_spill] sm:$0xff] }
 0x221   : > { %1975 = vst [vmem:[%s3711_s18 + $0xc8] sm:$0xff] %v3786_v57  ;;  %v2319_v43 = vpop.f32.mrf.mxu0  ;;  %v2343_v24 = vpop.f32.mrf.mxu1  ;;  %v2028_v8 = vmul.f32 %v1837_v21, %v1837_v21  ;;  %v1707_v10 = vadd.f32 %v3924_v17, %v1482_v53  ;;  %v1722_v25 = vadd.f32 %v3702_v28, %v1497_v58  ;;  %v2037_v42 = vmul.f32 %v3736_v44, %v3736_v44 }
 0x222   : > { %1958 = vst [vmem:[%s3711_s18 + $0x40] sm:$0xff] %v1832_v54  ;;  %v1989_v37 = vadd.f32 %v1988_v0, %v1832_v54  ;;  %v2027_v12 = vmul.f32 %v1832_v54, %v1832_v54  ;;  %v2057_v51 = vadd.f32 %v2056_v13, %v2026_v6  ;;  %v1847_v36 = vadd.f32 %v2319_v43, %v3636_v50  ;;  %v3928_v43 = vld [vmem:[#allocation7_spill] sm:$0xff] }
 0x223   : > { %1974 = vst [vmem:[%s3711_s18 + $0xc0] sm:$0xff] %v3795_v56  ;;  %v3804_v2 = vadd.f32 %v2343_v24, %v1702_v4  ;;  %v1841_v61 = vpop.f32.mrf.mxu0  ;;  %v1921_v11 = vpop.f32.mrf.mxu1  ;;  %v1712_v50 = vadd.f32 %v3693_v5, %v1487_v26  ;;  %v3925_v5 = vld [vmem:[#allocation3_spill] sm:$0xff] }
 0x224   : > { %v2058_v40 = vadd.f32 %v2057_v51, %v2027_v12  ;;  %1961 = vst [vmem:[%s3711_s18 + $0x58] sm:$0xff] %v1847_v36  ;;  %v1842_v63 = vadd.f32 %v1841_v61, %v3633_v1  ;;  %v1990_v39 = vadd.f32 %v1989_v37, %v1837_v21  ;;  %v3813_v15 = vadd.f32 %v1921_v11, %v1697_v59 }
 0x225   : > { %1977 = vst [vmem:[%s3711_s18 + $0xd8] sm:$0xff] %v3804_v2  ;;  %v2322_v32 = vpop.f32.mrf.mxu0  ;;  %v2346_v60 = vpop.f32.mrf.mxu1  ;;  %v1492_v47 = vadd.f32 %v3695_v31, %v3925_v5  ;;  %v2030_v46 = vmul.f32 %v1847_v36, %v1847_v36  ;;  %v2035_v11 = vmul.f32 %v3721_v48, %v3721_v48 }
 0x226   : > { %1960 = vst [vmem:[%s3711_s18 + $0x50] sm:$0xff] %v1842_v63  ;;  %v1991_v38 = vadd.f32 %v1990_v39, %v1842_v63  ;;  %v2029_v19 = vmul.f32 %v1842_v63, %v1842_v63  ;;  %v2059_v33 = vadd.f32 %v2058_v40, %v2028_v8  ;;  %v1857_v1 = vadd.f32 %v2322_v32, %v3923_v49 }
 0x227   : > { %1976 = vst [vmem:[%s3711_s18 + $0xd0] sm:$0xff] %v3813_v15  ;;  %v3822_v34 = vadd.f32 %v2346_v60, %v1712_v50  ;;  %v1851_v20 = vpop.f32.mrf.mxu0  ;;  %v1931_v45 = vpop.f32.mrf.mxu1  ;;  %v1717_v13 = vadd.f32 %v3697_v3, %v1492_v47  ;;  %v2036_v63 = vmul.f32 %v3714_v27, %v3714_v27  ;;  %v2038_v60 = vmul.f32 %v3732_v55, %v3732_v55 }
 0x228   : > { %v2060_v29 = vadd.f32 %v2059_v33, %v2029_v19  ;;  %1963 = vst [vmem:[%s3711_s18 + $0x68] sm:$0xff] %v1857_v1  ;;  %v1852_v30 = vadd.f32 %v1851_v20, %v3926_v7  ;;  %v1992_v41 = vadd.f32 %v1991_v38, %v1847_v36  ;;  %v3829_v22 = vadd.f32 %v1931_v45, %v1707_v10 }
 0x229   : > { %1979 = vst [vmem:[%s3711_s18 + $0xe8] sm:$0xff] %v3822_v34  ;;  %v2325_v31 = vpop.f32.mrf.mxu0  ;;  %v2349_v21 = vpop.f32.mrf.mxu1  ;;  %v2032_v4 = vmul.f32 %v1857_v1, %v1857_v1 }
 0x22a   : > { %1962 = vst [vmem:[%s3711_s18 + $0x60] sm:$0xff] %v1852_v30  ;;  %v1993_v18 = vadd.f32 %v1992_v41, %v1852_v30  ;;  %v2031_v16 = vmul.f32 %v1852_v30, %v1852_v30  ;;  %v2061_v35 = vadd.f32 %v2060_v29, %v2030_v46  ;;  %v1867_v6 = vadd.f32 %v2325_v31, %v3927_v52 }
 0x22b   : > { %1978 = vst [vmem:[%s3711_s18 + $0xe0] sm:$0xff] %v3829_v22  ;;  %v3836_v28 = vadd.f32 %v2349_v21, %v1722_v25  ;;  %v1861_v54 = vpop.f32.mrf.mxu0  ;;  %v1941_v0 = vpop.f32.mrf.mxu1 }
 0x22c   : > { %v2062_v26 = vadd.f32 %v2061_v35, %v2031_v16  ;;  %1965 = vst [vmem:[%s3711_s18 + $0x78] sm:$0xff] %v1867_v6  ;;  %v1862_v24 = vadd.f32 %v1861_v54, %v3928_v43  ;;  %v1994_v37 = vadd.f32 %v1993_v18, %v1857_v1  ;;  %v1942_v12 = vadd.f32 %v1941_v0, %v1717_v13 }
 0x22d   : > { %1981 = vst [vmem:[%s3711_s18 + $0xf8] sm:$0xff] %v3836_v28  ;;  %v2034_v59 = vmul.f32 %v1867_v6, %v1867_v6 }
 0x22e   : > { %1964 = vst [vmem:[%s3711_s18 + $0x70] sm:$0xff] %v1862_v24  ;;  %v1995_v51 = vadd.f32 %v1994_v37, %v1862_v24  ;;  %v2033_v36 = vmul.f32 %v1862_v24, %v1862_v24  ;;  %v2063_v3 = vadd.f32 %v2062_v26, %v2032_v4  ;;  %1980 = vst [vmem:[%s3711_s18 + $0xf0] sm:$0xff] %v1942_v12 }
 0x22f   : > { %v2049_v52 = vmul.f32 %v1942_v12, %v1942_v12 }
 0x230   : > { %v1996_v53 = vadd.f32 %v1995_v51, %v1867_v6  ;;  %v2064_v61 = vadd.f32 %v2063_v3, %v2033_v36 }
 0x232   : > { %v1997_v8 = vadd.f32 %v1996_v53, %v3721_v48  ;;  %v2065_v40 = vadd.f32 %v2064_v61, %v2034_v59  ;;  %v2039_v48 = vmul.f32 %v3759_v23, %v3759_v23 }
 0x234   : > { %v1998_v39 = vadd.f32 %v1997_v8, %v3714_v27  ;;  %v2066_v50 = vadd.f32 %v2065_v40, %v2035_v11  ;;  %v2040_v27 = vmul.f32 %v3750_v62, %v3750_v62 }
 0x236   : > { %v1999_v58 = vadd.f32 %v1998_v39, %v3736_v44  ;;  %v2067_v32 = vadd.f32 %v2066_v50, %v2036_v63  ;;  %v2041_v44 = vmul.f32 %v3777_v9, %v3777_v9 }
 0x238   : > { %v2000_v38 = vadd.f32 %v1999_v58, %v3732_v55  ;;  %v2068_v19 = vadd.f32 %v2067_v32, %v2037_v42  ;;  %v2042_v55 = vmul.f32 %v3768_v14, %v3768_v14 }
 0x23a   : > { %v2001_v33 = vadd.f32 %v2000_v38, %v3759_v23  ;;  %v2069_v49 = vadd.f32 %v2068_v19, %v2038_v60  ;;  %v2043_v23 = vmul.f32 %v3795_v56, %v3795_v56 }
 0x23c   : > { %v2002_v1 = vadd.f32 %v2001_v33, %v3750_v62  ;;  %v2070_v17 = vadd.f32 %v2069_v49, %v2039_v48  ;;  %v2044_v62 = vmul.f32 %v3786_v57, %v3786_v57 }
 0x23e   : > { %v2071_v10 = vadd.f32 %v2070_v17, %v2040_v27  ;;  %v2003_v5 = vadd.f32 %v2002_v1, %v3777_v9  ;;  %v2045_v9 = vmul.f32 %v3813_v15, %v3813_v15 }
 0x240   : > { %v2004_v47 = vadd.f32 %v2003_v5, %v3768_v14  ;;  %v2072_v20 = vadd.f32 %v2071_v10, %v2041_v44  ;;  %v2046_v14 = vmul.f32 %v3804_v2, %v3804_v2 }
 0x242   : > { %v2005_v45 = vadd.f32 %v2004_v47, %v3795_v56  ;;  %v2073_v46 = vadd.f32 %v2072_v20, %v2042_v55  ;;  %v2047_v56 = vmul.f32 %v3829_v22, %v3829_v22 }
 0x244   : > { %v2006_v29 = vadd.f32 %v2005_v45, %v3786_v57  ;;  %v2074_v7 = vadd.f32 %v2073_v46, %v2043_v23  ;;  %v2048_v57 = vmul.f32 %v3822_v34, %v3822_v34 }
 0x246   : > { %v2007_v30 = vadd.f32 %v2006_v29, %v3813_v15  ;;  %v2075_v41 = vadd.f32 %v2074_v7, %v2044_v62 }
 0x248   : > { %v2008_v25 = vadd.f32 %v2007_v30, %v3804_v2  ;;  %v2076_v31 = vadd.f32 %v2075_v41, %v2045_v9  ;;  %v2050_v2 = vmul.f32 %v3836_v28, %v3836_v28 }
 0x24a   : > { %v2009_v21 = vadd.f32 %v2008_v25, %v3829_v22  ;;  %v2077_v18 = vadd.f32 %v2076_v31, %v2046_v14 }
 0x24c   : > { %v2010_v16 = vadd.f32 %v2009_v21, %v3822_v34  ;;  %v2078_v15 = vadd.f32 %v2077_v18, %v2047_v56 }
 0x24e   : > { %v2011_v35 = vadd.f32 %v2010_v16, %v1942_v12  ;;  %v2079_v6 = vadd.f32 %v2078_v15, %v2048_v57 }
 0x250   : > { %v2012_v13 = vadd.f32 %v2011_v35, %v3836_v28  ;;  %v2080_v54 = vadd.f32 %v2079_v6, %v2049_v52 }
 0x252   : > { %v2013_v0 = vrot.slane %v2012_v13, 4  ;;  %v2081_v4 = vadd.f32 %v2080_v54, %v2050_v2 }
 0x254   : > { %v2014_v22 = vadd.f32 %v2013_v0, %v2012_v13  ;;  %v2082_v26 = vrot.slane %v2081_v4, 4 }
 0x256   : > { %v2015_v43 = vrot.slane %v2014_v22, 2  ;;  %v2083_v24 = vadd.f32 %v2082_v26, %v2081_v4 }
 0x258   : > { %v2016_v37 = vadd.f32 %v2015_v43, %v2014_v22  ;;  %v2084_v51 = vrot.slane %v2083_v24, 2 }
 0x25a   : > { %v2017_v34 = vrot.slane %v2016_v37, 1  ;;  %v2085_v36 = vadd.f32 %v2084_v51, %v2083_v24 }
 0x25c   : > { %v2018_v12 = vadd.f32 %v2017_v34, %v2016_v37  ;;  %v2086_v3 = vrot.slane %v2085_v36, 1 }
 0x25e   : > { %v2087_v28 = vadd.f32 %v2086_v3, %v2085_v36  ;;  %2088 = vst [vmem:[%s268_s3] sm:$0xff] %v2018_v12 }
 0x260   : > { %2089 = vst [vmem:[%s272_s24] sm:$0xff] %v2087_v28 }
 0x261 PF: > { %s17_s21 = sadd.s32 1, %s2429_s21  }
 0x262   : > { %p14_p4 = scmp.ge.s32.totalorder %s17_s21, 4  }
 0x264   :  { %16 = sbr.rel (!%p14_p4) target bundleno = 1 (0x1), region = 92 }

// kernel: conv_block_forward.4
= control target key start
LH: loop header
LB: loop body
LE: loop exit
PB: predicated region body
PF: predicated region fallthrough
CT: control target
= control target key end

     0   :  { %s2570_s21 = smov 0   ;;  %s4111_s0 = inlined_call_operand.vmem [shape: f32[2,16,16,128], index: 0, kind: input, shape index: {}]   ;;  %s4112_s1 = inlined_call_operand.vmem [shape: f32[1152,128], index: 1, kind: input, shape index: {}]   ;;  %s4113_s2 = inlined_call_operand.vmem [shape: f32[1,128], index: 2, kind: input, shape index: {}]   ;;  %s4114_s3 = inlined_call_operand.vmem [shape: f32[1,128], index: 3, kind: input, shape index: {}]   ;;  %s4115_s4 = inlined_call_operand.vmem [shape: f32[2,16,16,128], index: 4, kind: output, shape index: {0}]   ;;  %s4116_s5 = inlined_call_operand.vmem [shape: f32[2,8,128], index: 5, kind: output, shape index: {1}]   ;;  %s4117_s6 = inlined_call_operand.vmem [shape: f32[2,8,128], index: 6, kind: output, shape index: {2}]  }
   0x1 LB: > { %s2317_s22 = sadd.s32 4294967295, %s2532_s21   ;;  %p2321_p0 = scmp.ge.s32.totalorder %s2532_s21, 1  ;;  %s2532_s21 = sphi %s2570_s21, %s17_s21  }
   0x2   : > { %p217_p1 = scmp.lt.s32.totalorder %s2532_s21, 3 }
   0x4   : > { %p218_p2 = pnand %p2321_p0, %p217_p1 }
   0x6   : > { %221 = sbr.rel (%p218_p2) target bundleno = 609 (0x261), region = 36 }
   0xb   : > { %v806_v0 = vld [vmem:[%s4112_s1 + $0x78] sm:$0xff]  ;;  %v2534_v2 = vmov 0.0   ;;  %v805_v3 = vld [vmem:[%s4112_s1 + $0x70] sm:$0xff]  ;;  %v804_v5 = vld [vmem:[%s4112_s1 + $0x68] sm:$0xff]  ;;  %p255_p3 = scmp.lt.s32.totalorder %s2317_s22, 1 }
   0xc   : > { %v838_v1 = vld [vmem:[%s4112_s1 + $0x178] sm:$0xff]  ;;  %935 = vmatprep.subr.mxu0 %v2534_v2  ;;  %415 = vst [vmem:[#allocation2] sm:$0xff] %v2534_v2  ;;  %416 = vst [vmem:[#allocation2 + $0x8] sm:$0xff] %v2534_v2  ;;  %1160 = vmatprep.subr.mxu1 %v2534_v2  ;;  %v837_v4 = vld [vmem:[%s4112_s1 + $0x170] sm:$0xff] }
   0xd   : > { %417 = vst [vmem:[#allocation2 + $0x10] sm:$0x3] %v2534_v2  ;;  %418 = vst [vmem:[#allocation2 + $0x18] sm:$0xff] %v2534_v2  ;;  %936 = vmatpush1.msra.mxu0 %v806_v0  ;;  %1161 = vmatpush1.msra.mxu1 %v838_v1  ;;  %v836_v6 = vld [vmem:[%s4112_s1 + $0x168] sm:$0xff]  ;;  %v803_v7 = vld [vmem:[%s4112_s1 + $0x60] sm:$0xff]  ;;  %s4157_s22 = smov (!%p255_p3, %s2317_s22), 1 }
   0xe   : > { %419 = vst [vmem:[#allocation2 + $0x20] sm:$0xff] %v2534_v2  ;;  %420 = vst [vmem:[#allocation2 + $0x28] sm:$0x3] %v2534_v2  ;;  %937 = vmatprep.subr.mxu0 %v2534_v2  ;;  %1162 = vmatprep.subr.mxu1 %v2534_v2  ;;  %v835_v8 = vld [vmem:[%s4112_s1 + $0x160] sm:$0xff]  ;;  %v802_v9 = vld [vmem:[%s4112_s1 + $0x58] sm:$0xff]  ;;  %s2332_s13 = sshll.u32 %s4157_s22, 8 }
   0xf   : > { %421 = vst [vmem:[#allocation2 + $0x30] sm:$0xff] %v2534_v2  ;;  %422 = vst [vmem:[#allocation2 + $0x38] sm:$0xff] %v2534_v2  ;;  %938 = vmatpush1.msra.mxu0 %v805_v3  ;;  %1163 = vmatpush1.msra.mxu1 %v837_v4  ;;  %v834_v10 = vld [vmem:[%s4112_s1 + $0x158] sm:$0xff]  ;;  %v801_v11 = vld [vmem:[%s4112_s1 + $0x50] sm:$0xff]  ;;  %s2722_s20 = scalar_lea.vmem %s4111_s0, %s2332_s13  ;;  %s3923_s29 = scalar_lea.vmem %s4115_s4, %s2332_s13 }
  0x10   : > { %423 = vst [vmem:[#allocation2 + $0x40] sm:$0x3] %v2534_v2  ;;  %424 = vst [vmem:[#allocation2 + $0x48] sm:$0xff] %v2534_v2  ;;  %939 = vmatprep.subr.mxu0 %v2534_v2  ;;  %1164 = vmatprep.subr.mxu1 %v2534_v2  ;;  %v833_v12 = vld [vmem:[%s4112_s1 + $0x150] sm:$0xff]  ;;  %v800_v13 = vld [vmem:[%s4112_s1 + $0x48] sm:$0xff]  ;;  %s2326_s13 = sshll.u32 %s4157_s22, 3 }
  0x11   : > { %425 = vst [vmem:[#allocation2 + $0x50] sm:$0xff] %v2534_v2  ;;  %426 = vst [vmem:[#allocation2 + $0x58] sm:$0x3] %v2534_v2  ;;  %940 = vmatpush1.msra.mxu0 %v804_v5  ;;  %1165 = vmatpush1.msra.mxu1 %v836_v6  ;;  %v832_v14 = vld [vmem:[%s4112_s1 + $0x148] sm:$0xff]  ;;  %v799_v15 = vld [vmem:[%s4112_s1 + $0x40] sm:$0xff]  ;;  %s268_s8 = scalar_lea.vmem %s4116_s5, %s2326_s13  ;;  %s272_s11 = scalar_lea.vmem %s4117_s6, %s2326_s13 }
  0x12   : > { %427 = vst [vmem:[#allocation2 + $0x60] sm:$0xff] %v2534_v2  ;;  %428 = vst [vmem:[#allocation2 + $0x68] sm:$0xff] %v2534_v2  ;;  %941 = vmatprep.subr.mxu0 %v2534_v2  ;;  %1166 = vmatprep.subr.mxu1 %v2534_v2  ;;  %v831_v16 = vld [vmem:[%s4112_s1 + $0x140] sm:$0xff]  ;;  %v798_v17 = vld [vmem:[%s4112_s1 + $0x38] sm:$0xff] }
  0x13   : > { %429 = vst [vmem:[#allocation2 + $0x70] sm:$0x3] %v2534_v2  ;;  %430 = vst [vmem:[#allocation2 + $0x78] sm:$0xff] %v2534_v2  ;;  %942 = vmatpush1.msra.mxu0 %v803_v7  ;;  %1167 = vmatpush1.msra.mxu1 %v835_v8  ;;  %v830_v18 = vld [vmem:[%s4112_s1 + $0x138] sm:$0xff]  ;;  %v797_v19 = vld [vmem:[%s4112_s1 + $0x30] sm:$0xff] }
  0x14   : > { %431 = vst [vmem:[#allocation2 + $0x80] sm:$0xff] %v2534_v2  ;;  %432 = vst [vmem:[#allocation2 + $0x88] sm:$0x3] %v2534_v2  ;;  %943 = vmatprep.subr.mxu0 %v2534_v2  ;;  %1168 = vmatprep.subr.mxu1 %v2534_v2  ;;  %v829_v20 = vld [vmem:[%s4112_s1 + $0x130] sm:$0xff]  ;;  %v796_v21 = vld [vmem:[%s4112_s1 + $0x28] sm:$0xff] }
  0x15   : > { %433 = vst [vmem:[#allocation2 + $0x90] sm:$0xff] %v2534_v2  ;;  %434 = vst [vmem:[#allocation2 + $0x98] sm:$0xff] %v2534_v2  ;;  %944 = vmatpush1.msra.mxu0 %v802_v9  ;;  %1169 = vmatpush1.msra.mxu1 %v834_v10  ;;  %v828_v22 = vld [vmem:[%s4112_s1 + $0x128] sm:$0xff]  ;;  %v795_v23 = vld [vmem:[%s4112_s1 + $0x20] sm:$0xff] }
  0x16   : > { %435 = vst [vmem:[#allocation2 + $0xa0] sm:$0x3] %v2534_v2  ;;  %436 = vst [vmem:[#allocation2 + $0xa8] sm:$0xff] %v2534_v2  ;;  %945 = vmatprep.subr.mxu0 %v2534_v2  ;;  %1170 = vmatprep.subr.mxu1 %v2534_v2  ;;  %v827_v24 = vld [vmem:[%s4112_s1 + $0x120] sm:$0xff]  ;;  %v794_v28 = vld [vmem:[%s4112_s1 + $0x18] sm:$0xff] }
  0x17   : > { %437 = vst [vmem:[#allocation2 + $0xb0] sm:$0xff] %v2534_v2  ;;  %438 = vst [vmem:[#allocation2 + $0xb8] sm:$0x3] %v2534_v2  ;;  %946 = vmatpush1.msra.mxu0 %v801_v11  ;;  %1171 = vmatpush1.msra.mxu1 %v833_v12  ;;  %v273_v25 = vld [vmem:[%s2722_s20] sm:$0xff]  ;;  %v826_v29 = vld [vmem:[%s4112_s1 + $0x118] sm:$0xff] }
  0x18   : > { %439 = vst [vmem:[#allocation2 + $0xc0] sm:$0xff] %v2534_v2  ;;  %440 = vst [vmem:[#allocation2 + $0xc8] sm:$0xff] %v2534_v2  ;;  %947 = vmatprep.subr.mxu0 %v2534_v2  ;;  %1172 = vmatprep.subr.mxu1 %v2534_v2  ;;  %v2744_v26 = vld [vmem:[%s4113_s2] ss:$0 sm:$0xff]  ;;  %v274_v31 = vld [vmem:[%s2722_s20 + $0x8] sm:$0xff] }
  0x19   : > { %441 = vst [vmem:[#allocation2 + $0xd0] sm:$0x3] %v2534_v2  ;;  %442 = vst [vmem:[#allocation2 + $0xd8] sm:$0xff] %v2534_v2  ;;  %948 = vmatpush1.msra.mxu0 %v800_v13  ;;  %1173 = vmatpush1.msra.mxu1 %v832_v14  ;;  %v2749_v27 = vld [vmem:[%s4114_s3] ss:$0 sm:$0xff]  ;;  %v312_v30 = vmul.f32 %v2744_v26, %v273_v25  ;;  %v313_v32 = vmul.f32 %v2744_v26, %v274_v31  ;;  %v275_v33 = vld [vmem:[%s2722_s20 + $0x10] sm:$0xff] }
  0x1a   : > { %443 = vst [vmem:[#allocation2 + $0xe0] sm:$0xff] %v2534_v2  ;;  %444 = vst [vmem:[#allocation2 + $0xe8] sm:$0x3] %v2534_v2  ;;  %949 = vmatprep.subr.mxu0 %v2534_v2  ;;  %1174 = vmatprep.subr.mxu1 %v2534_v2  ;;  %v793_v34 = vld [vmem:[%s4112_s1 + $0x10] sm:$0xff]  ;;  %v314_v37 = vmul.f32 %v2744_v26, %v275_v33  ;;  %v276_v38 = vld [vmem:[%s2722_s20 + $0x18] sm:$0xff] }
  0x1b   : > { %445 = vst [vmem:[#allocation2 + $0xf0] sm:$0xff] %v2534_v2  ;;  %446 = vst [vmem:[#allocation2 + $0xf8] sm:$0xff] %v2534_v2  ;;  %950 = vmatpush1.msra.mxu0 %v799_v15  ;;  %1175 = vmatpush1.msra.mxu1 %v831_v16  ;;  %v825_v35 = vld [vmem:[%s4112_s1 + $0x110] sm:$0xff]  ;;  %v2772_v36 = vadd.f32 %v2749_v27, %v312_v30  ;;  %v2777_v39 = vadd.f32 %v2749_v27, %v313_v32  ;;  %v277_v41 = vld [vmem:[%s2722_s20 + $0x20] sm:$0xff] }
  0x1c   : > { %447 = vst [vmem:[#allocation2 + $0x100] sm:$0x3] %v2534_v2  ;;  %448 = vst [vmem:[#allocation2 + $0x108] sm:$0xff] %v2534_v2  ;;  %951 = vmatprep.subr.mxu0 %v2534_v2  ;;  %1176 = vmatprep.subr.mxu1 %v2534_v2  ;;  %v315_v40 = vmul.f32 %v2744_v26, %v276_v38  ;;  %v278_v42 = vld [vmem:[%s2722_s20 + $0x28] sm:$0xff]  ;;  %v2792_v46 = vadd.f32 %v2749_v27, %v314_v37  ;;  %v279_v49 = vld [vmem:[%s2722_s20 + $0x30] sm:$0xff] }
  0x1d   : > { %449 = vst [vmem:[#allocation2 + $0x110] sm:$0xff] %v2534_v2  ;;  %450 = vst [vmem:[#allocation2 + $0x118] sm:$0x3] %v2534_v2  ;;  %952 = vmatpush1.msra.mxu0 %v798_v17  ;;  %1177 = vmatpush1.msra.mxu1 %v830_v18  ;;  %v792_v43 = vld [vmem:[%s4112_s1 + $0x8] sm:$0xff]  ;;  %v383_v45 = vmax.f32 %v2772_v36, 0.0  ;;  %v316_v47 = vmul.f32 %v2744_v26, %v277_v41  ;;  %v317_v48 = vmul.f32 %v2744_v26, %v278_v42  ;;  %v280_v53 = vld [vmem:[%s2722_s20 + $0x38] sm:$0xff] }
  0x1e   : > { %451 = vst [vmem:[#allocation2 + $0x120] sm:$0xff] %v2534_v2  ;;  %452 = vst [vmem:[#allocation2 + $0x128] sm:$0xff] %v2534_v2  ;;  %953 = vmatprep.subr.mxu0 %v2534_v2  ;;  %1178 = vmatprep.subr.mxu1 %v2534_v2  ;;  %v824_v44 = vld [vmem:[%s4112_s1 + $0x108] sm:$0xff]  ;;  %v384_v50 = vmax.f32 %v2777_v39, 0.0  ;;  %v2799_v51 = vadd.f32 %v2749_v27, %v315_v40  ;;  %v318_v52 = vmul.f32 %v2744_v26, %v279_v49  ;;  %v281_v54 = vld [vmem:[%s2722_s20 + $0x40] sm:$0xff] }
  0x1f   : > { %453 = vst [vmem:[#allocation2 + $0x130] sm:$0x3] %v2534_v2  ;;  %454 = vst [vmem:[#allocation2 + $0x138] sm:$0xff] %v2534_v2  ;;  %954 = vmatpush1.msra.mxu0 %v797_v19  ;;  %1179 = vmatpush1.msra.mxu1 %v829_v20  ;;  %v791_v55 = vld [vmem:[%s4112_s1] sm:$0xff]  ;;  %v385_v57 = vmax.f32 %v2792_v46, 0.0  ;;  %v2816_v58 = vadd.f32 %v2749_v27, %v316_v47  ;;  %v2819_v59 = vadd.f32 %v2749_v27, %v317_v48  ;;  %v282_v61 = vld [vmem:[%s2722_s20 + $0x48] sm:$0xff] }
  0x20   : > { %455 = vst [vmem:[#allocation2 + $0x140] sm:$0xff] %v2534_v2  ;;  %456 = vst [vmem:[#allocation2 + $0x148] sm:$0x3] %v2534_v2  ;;  %955 = vmatprep.subr.mxu0 %v2534_v2  ;;  %1180 = vmatprep.subr.mxu1 %v2534_v2  ;;  %v823_v56 = vld [vmem:[%s4112_s1 + $0x100] sm:$0xff]  ;;  %v319_v60 = vmul.f32 %v2744_v26, %v280_v53  ;;  %v386_v62 = vmax.f32 %v2799_v51, 0.0  ;;  %v2827_v63 = vadd.f32 %v2749_v27, %v318_v52  ;;  %v283_v3 = vld [vmem:[%s2722_s20 + $0x50] sm:$0xff] }
  0x21   : > { %457 = vst [vmem:[#allocation2 + $0x150] sm:$0xff] %v2534_v2  ;;  %458 = vst [vmem:[#allocation2 + $0x158] sm:$0xff] %v2534_v2  ;;  %956 = vmatpush1.msra.mxu0 %v796_v21  ;;  %1181 = vmatpush1.msra.mxu1 %v828_v22  ;;  %v320_v0 = vmul.f32 %v2744_v26, %v281_v54  ;;  %v321_v1 = vmul.f32 %v2744_v26, %v282_v61  ;;  %v822_v4 = vld [vmem:[%s4112_s1 + $0xf8] sm:$0xff]  ;;  %v387_v6 = vmax.f32 %v2816_v58, 0.0  ;;  %v285_v15 = vld [vmem:[%s2722_s20 + $0x60] sm:$0xff] }
  0x22   : > { %459 = vst [vmem:[#allocation2 + $0x160] sm:$0x3] %v2534_v2  ;;  %460 = vst [vmem:[#allocation2 + $0x168] sm:$0xff] %v2534_v2  ;;  %957 = vmatprep.subr.mxu0 %v2534_v2  ;;  %1182 = vmatprep.subr.mxu1 %v2534_v2  ;;  %v854_v5 = vld [vmem:[%s4112_s1 + $0x1f8] sm:$0xff]  ;;  %v388_v7 = vmax.f32 %v2819_v59, 0.0  ;;  %v2845_v8 = vadd.f32 %v2749_v27, %v319_v60  ;;  %v322_v9 = vmul.f32 %v2744_v26, %v283_v3  ;;  %v821_v16 = vld [vmem:[%s4112_s1 + $0xf0] sm:$0xff] }
  0x23   : > { %461 = vst [vmem:[#allocation2 + $0x170] sm:$0xff] %v2534_v2  ;;  %462 = vst [vmem:[#allocation2 + $0x178] sm:$0x3] %v2534_v2  ;;  %958 = vmatpush1.msra.mxu0 %v795_v23  ;;  %1183 = vmatpush1.msra.mxu1 %v827_v24  ;;  %v284_v10 = vld [vmem:[%s2722_s20 + $0x58] sm:$0xff]  ;;  %v389_v11 = vmax.f32 %v2827_v63, 0.0  ;;  %v2853_v12 = vadd.f32 %v2749_v27, %v320_v0  ;;  %v2856_v13 = vadd.f32 %v2749_v27, %v321_v1  ;;  %v853_v17 = vld [vmem:[%s4112_s1 + $0x1f0] sm:$0xff] }
  0x24   : > { %463 = vst [vmem:[#allocation2 + $0x180] sm:$0xff] %v2534_v2  ;;  %464 = vst [vmem:[#allocation2 + $0x188] sm:$0xff] %v2534_v2  ;;  %959 = vmatprep.subr.mxu0 %v2534_v2  ;;  %1184 = vmatprep.subr.mxu1 %v2534_v2  ;;  %v323_v14 = vmul.f32 %v2744_v26, %v284_v10  ;;  %v390_v18 = vmax.f32 %v2845_v8, 0.0  ;;  %v2874_v19 = vadd.f32 %v2749_v27, %v322_v9  ;;  %v286_v21 = vld [vmem:[%s2722_s20 + $0x68] sm:$0xff]  ;;  %v819_v40 = vld [vmem:[%s4112_s1 + $0xe0] sm:$0xff] }
  0x25   : > { %465 = vst [vmem:[#allocation2 + $0x190] sm:$0x3] %v2534_v2  ;;  %466 = vst [vmem:[#allocation2 + $0x198] sm:$0xff] %v2534_v2  ;;  %960 = vmatpush1.msra.mxu0 %v794_v28  ;;  %1185 = vmatpush1.msra.mxu1 %v826_v29  ;;  %v324_v20 = vmul.f32 %v2744_v26, %v285_v15  ;;  %v391_v22 = vmax.f32 %v2853_v12, 0.0  ;;  %v392_v23 = vmax.f32 %v2856_v13, 0.0  ;;  %v287_v28 = vld [vmem:[%s2722_s20 + $0x70] sm:$0xff] }
  0x26   : > { %467 = vst [vmem:[#allocation2 + $0x1a0] sm:$0xff] %v2534_v2  ;;  %468 = vst [vmem:[#allocation2 + $0x1a8] sm:$0x3] %v2534_v2  ;;  %961 = vmatprep.subr.mxu0 %v2534_v2  ;;  %1186 = vmatprep.subr.mxu1 %v2534_v2  ;;  %v2883_v24 = vadd.f32 %v2749_v27, %v323_v14  ;;  %v325_v25 = vmul.f32 %v2744_v26, %v286_v21  ;;  %v820_v29 = vld [vmem:[%s4112_s1 + $0xe8] sm:$0xff]  ;;  %v393_v31 = vmax.f32 %v2874_v19, 0.0  ;;  %v851_v41 = vld [vmem:[%s4112_s1 + $0x1e0] sm:$0xff] }
  0x27   : > { %962 = vmatpush1.msra.mxu0 %v793_v34  ;;  %1187 = vmatpush1.msra.mxu1 %v825_v35  ;;  %470 = vst [vmem:[#allocation2 + $0x19] sm:$0xff] %v383_v45  ;;  %471 = vst [vmem:[#allocation2 + $0x21] sm:$0xff] %v384_v50  ;;  %v852_v30 = vld [vmem:[%s4112_s1 + $0x1e8] sm:$0xff]  ;;  %v2899_v32 = vadd.f32 %v2749_v27, %v324_v20  ;;  %v326_v33 = vmul.f32 %v2744_v26, %v287_v28  ;;  %v288_v34 = vld [vmem:[%s2722_s20 + $0x78] sm:$0xff] }
  0x28   : > { %963 = vmatprep.subr.mxu0 %v2534_v2  ;;  %1188 = vmatprep.subr.mxu1 %v2534_v2  ;;  %472 = vst [vmem:[#allocation2 + $0x31] sm:$0xff] %v385_v57  ;;  %473 = vst [vmem:[#allocation2 + $0x39] sm:$0xff] %v386_v62  ;;  %v394_v35 = vmax.f32 %v2883_v24, 0.0  ;;  %v2909_v37 = vadd.f32 %v2749_v27, %v325_v25  ;;  %v327_v38 = vmul.f32 %v2744_v26, %v288_v34  ;;  %v289_v48 = vld [vmem:[%s2722_s20 + $0x80] sm:$0xff]  ;;  %v818_v49 = vld [vmem:[%s4112_s1 + $0xd8] sm:$0xff] }
  0x29   : > { %964 = vmatpush1.msra.mxu0 %v792_v43  ;;  %1189 = vmatpush1.msra.mxu1 %v824_v44  ;;  %474 = vst [vmem:[#allocation2 + $0x49] sm:$0xff] %v387_v6  ;;  %475 = vst [vmem:[#allocation2 + $0x51] sm:$0xff] %v388_v7  ;;  %v395_v42 = vmax.f32 %v2899_v32, 0.0  ;;  %v2924_v43 = vadd.f32 %v2749_v27, %v326_v33  ;;  %v850_v52 = vld [vmem:[%s4112_s1 + $0x1d8] sm:$0xff]  ;;  %v328_v54 = vmul.f32 %v2744_v26, %v289_v48  ;;  %v849_v60 = vld [vmem:[%s4112_s1 + $0x1d0] sm:$0xff] }
  0x2a   : > { %965 = vmatprep.subr.mxu0 %v2534_v2  ;;  %1190 = vmatprep.subr.mxu1 %v2534_v2  ;;  %476 = vst [vmem:[#allocation2 + $0x61] sm:$0xff] %v389_v11  ;;  %477 = vst [vmem:[#allocation2 + $0x69] sm:$0xff] %v390_v18  ;;  %v396_v44 = vmax.f32 %v2909_v37, 0.0  ;;  %v2930_v47 = vadd.f32 %v2749_v27, %v327_v38  ;;  %v816_v0 = vld [vmem:[%s4112_s1 + $0xc8] sm:$0xff]  ;;  %v847_v9 = vld [vmem:[%s4112_s1 + $0x1c0] sm:$0xff] }
  0x2b   : > { %966 = vmatpush1.msra.mxu0 %v791_v55  ;;  %1191 = vmatpush1.msra.mxu1 %v823_v56  ;;  %478 = vst [vmem:[#allocation2 + $0x79] sm:$0xff] %v391_v22  ;;  %479 = vst [vmem:[#allocation2 + $0x81] sm:$0xff] %v392_v23  ;;  %v397_v53 = vmax.f32 %v2924_v43, 0.0  ;;  %v817_v56 = vld [vmem:[%s4112_s1 + $0xd0] sm:$0xff]  ;;  %v2959_v61 = vadd.f32 %v2749_v27, %v328_v54  ;;  %v848_v1 = vld [vmem:[%s4112_s1 + $0x1c8] sm:$0xff] }
  0x2c   : > { %967 = vmatprep.subr.mxu0 %v2534_v2  ;;  %1192 = vmatprep.subr.mxu1 %v2534_v2  ;;  %480 = vst [vmem:[#allocation2 + $0x91] sm:$0xff] %v393_v31  ;;  %481 = vst [vmem:[#allocation2 + $0x99] sm:$0xff] %v394_v35  ;;  %v398_v55 = vmax.f32 %v2930_v47, 0.0  ;;  %v814_v14 = vld [vmem:[%s4112_s1 + $0xb8] sm:$0xff]  ;;  %v813_v20 = vld [vmem:[%s4112_s1 + $0xb0] sm:$0xff] }
  0x2d   : > { %968 = vmatpush2.msra.mxu0 %v822_v4  ;;  %1193 = vmatpush2.msra.mxu1 %v854_v5  ;;  %482 = vst [vmem:[#allocation2 + $0xa9] sm:$0xff] %v395_v42  ;;  %483 = vst [vmem:[#allocation2 + $0xb1] sm:$0xff] %v396_v44  ;;  %v399_v3 = vmax.f32 %v2959_v61, 0.0  ;;  %v290_v4 = vld [vmem:[%s2722_s20 + $0x88] sm:$0xff]  ;;  %v815_v5 = vld [vmem:[%s4112_s1 + $0xc0] sm:$0xff] }
  0x2e   : > { %969 = vmatprep.subr.mxu0 %v2534_v2  ;;  %1194 = vmatprep.subr.mxu1 %v2534_v2  ;;  %484 = vst [vmem:[#allocation2 + $0xc1] sm:$0xff] %v397_v53  ;;  %485 = vst [vmem:[#allocation2 + $0xc9] sm:$0xff] %v398_v55  ;;  %v329_v10 = vmul.f32 %v2744_v26, %v290_v4  ;;  %v846_v15 = vld [vmem:[%s4112_s1 + $0x1b8] sm:$0xff]  ;;  %v845_v21 = vld [vmem:[%s4112_s1 + $0x1b0] sm:$0xff] }
  0x2f   : > { %970 = vmatpush2.msra.mxu0 %v821_v16  ;;  %1195 = vmatpush2.msra.mxu1 %v853_v17  ;;  %486 = vst [vmem:[#allocation2 + $0xd9] sm:$0xff] %v399_v3  ;;  %v291_v17 = vld [vmem:[%s2722_s20 + $0x90] sm:$0xff]  ;;  %v844_v33 = vld [vmem:[%s4112_s1 + $0x1a8] sm:$0xff]  ;;  %v899_v46 = vld [vmem:[%s4112_s1 + $0x360] sm:$0xff] }
  0x30   : > { %971 = vmatprep.subr.mxu0 %v2534_v2  ;;  %1196 = vmatprep.subr.mxu1 %v2534_v2  ;;  %v2993_v16 = vadd.f32 %v2749_v27, %v329_v10  ;;  %v330_v28 = vmul.f32 %v2744_v26, %v291_v17  ;;  %v294_v48 = vld [vmem:[%s2722_s20 + $0xa8] sm:$0xff]  ;;  %v842_v10 = vld [vmem:[%s4112_s1 + $0x198] sm:$0xff]  ;;  %v901_v36 = vld [vmem:[%s4112_s1 + $0x370] sm:$0xff] }
  0x31   : > { %972 = vmatpush2.msra.mxu0 %v820_v29  ;;  %1197 = vmatpush2.msra.mxu1 %v852_v30  ;;  %v292_v29 = vld [vmem:[%s2722_s20 + $0x98] sm:$0xff]  ;;  %v812_v30 = vld [vmem:[%s4112_s1 + $0xa8] sm:$0xff]  ;;  %v897_v58 = vld [vmem:[%s4112_s1 + $0x350] sm:$0xff] }
  0x32   : > { %973 = vmatprep.subr.mxu0 %v2534_v2  ;;  %1198 = vmatprep.subr.mxu1 %v2534_v2  ;;  %v4129_v25 = vmax.f32 %v2993_v16, 0.0  ;;  %v3018_v34 = vadd.f32 %v2749_v27, %v330_v28  ;;  %v331_v38 = vmul.f32 %v2744_v26, %v292_v29  ;;  %v570_v39 = vld [vmem:[#allocation2 + $0x32] sm:$0xff]  ;;  %v896_v59 = vld [vmem:[%s4112_s1 + $0x348] sm:$0xff]  ;;  %v895_v63 = vld [vmem:[%s4112_s1 + $0x340] sm:$0xff] }
  0x33   : > { %974 = vmatpush2.msra.mxu0 %v819_v40  ;;  %1199 = vmatpush2.msra.mxu1 %v851_v41  ;;  %v293_v40 = vld [vmem:[%s2722_s20 + $0xa0] sm:$0xff]  ;;  %v898_v51 = vld [vmem:[%s4112_s1 + $0x358] sm:$0xff]  ;;  %v893_v12 = vld [vmem:[%s4112_s1 + $0x330] sm:$0xff] }
  0x34   : > { %975 = vmatprep.subr.mxu0 %v2534_v2  ;;  %1200 = vmatprep.subr.mxu1 %v2534_v2  ;;  %487 = vst [vmem:[#allocation2 + $0xe1] sm:$0xff] %v4129_v25  ;;  %v332_v41 = vmul.f32 %v2744_v26, %v293_v40  ;;  %v4128_v54 = vmax.f32 %v3018_v34, 0.0  ;;  %v894_v8 = vld [vmem:[%s4112_s1 + $0x338] sm:$0xff]  ;;  %v857_v19 = vld [vmem:[%s4112_s1 + $0x210] sm:$0xff]  ;;  %v856_v24 = vld [vmem:[%s4112_s1 + $0x208] sm:$0xff] }
  0x35   : > { %976 = vmatpush2.msra.mxu0 %v818_v49  ;;  %1201 = vmatpush2.msra.mxu1 %v850_v52  ;;  %v811_v49 = vld [vmem:[%s4112_s1 + $0xa0] sm:$0xff]  ;;  %v858_v13 = vld [vmem:[%s4112_s1 + $0x218] sm:$0xff]  ;;  %v885_v43 = vld [vmem:[%s4112_s1 + $0x2f0] sm:$0xff] }
  0x36   : > { %977 = vmatprep.subr.mxu0 %v2534_v2  ;;  %1202 = vmatprep.subr.mxu1 %v2534_v2  ;;  %v843_v52 = vld [vmem:[%s4112_s1 + $0x1a0] sm:$0xff]  ;;  %488 = vst [vmem:[#allocation2 + $0xf1] sm:$0xff] %v4128_v54  ;;  %v886_v37 = vld [vmem:[%s4112_s1 + $0x2f8] sm:$0xff]  ;;  %v884_v47 = vld [vmem:[%s4112_s1 + $0x2e8] sm:$0xff] }
  0x37   : > { %978 = vmatpush2.msra.mxu0 %v817_v56  ;;  %1203 = vmatpush2.msra.mxu1 %v849_v60  ;;  %v3034_v56 = vadd.f32 %v2749_v27, %v331_v38  ;;  %v333_v60 = vmul.f32 %v2744_v26, %v294_v48  ;;  %v841_v38 = vld [vmem:[%s4112_s1 + $0x190] sm:$0xff]  ;;  %v855_v32 = vld [vmem:[%s4112_s1 + $0x200] sm:$0xff] }
  0x38   : > { %979 = vmatprep.subr.mxu0 %v2534_v2  ;;  %1204 = vmatprep.subr.mxu1 %v2534_v2  ;;  %v883_v61 = vld [vmem:[%s4112_s1 + $0x2e0] sm:$0xff] }
  0x39   : > { %980 = vmatpush2.msra.mxu0 %v816_v0  ;;  %1205 = vmatpush2.msra.mxu1 %v848_v1  ;;  %v295_v0 = vld [vmem:[%s2722_s20 + $0xb0] sm:$0xff]  ;;  %v3039_v1 = vadd.f32 %v2749_v27, %v332_v41 }
  0x3a   : > { %981 = vmatprep.subr.mxu0 %v2534_v2  ;;  %1206 = vmatprep.subr.mxu1 %v2534_v2  ;;  %v334_v4 = vmul.f32 %v2744_v26, %v295_v0  ;;  %v840_v0 = vld [vmem:[%s4112_s1 + $0x188] sm:$0xff] }
  0x3b   : > { %982 = vmatpush2.msra.mxu0 %v815_v5  ;;  %1207 = vmatpush2.msra.mxu1 %v847_v9  ;;  %v296_v5 = vld [vmem:[%s2722_s20 + $0xb8] sm:$0xff] }
  0x3c   : > { %983 = vmatprep.subr.mxu0 %v2534_v2  ;;  %1208 = vmatprep.subr.mxu1 %v2534_v2  ;;  %v810_v9 = vld [vmem:[%s4112_s1 + $0x98] sm:$0xff]  ;;  %v335_v17 = vmul.f32 %v2744_v26, %v296_v5  ;;  %v3061_v28 = vadd.f32 %v2749_v27, %v334_v4 }
  0x3d   : > { %984 = vmatpush2.msra.mxu0 %v814_v14  ;;  %1209 = vmatpush2.msra.mxu1 %v846_v15  ;;  %v4124_v14 = vmax.f32 %v3034_v56, 0.0  ;;  %v3055_v15 = vadd.f32 %v2749_v27, %v333_v60  ;;  %v808_v60 = vld [vmem:[%s4112_s1 + $0x88] sm:$0xff] }
  0x3e   : > { %985 = vmatprep.subr.mxu0 %v2534_v2  ;;  %1210 = vmatprep.subr.mxu1 %v2534_v2  ;;  %v3077_v41 = vadd.f32 %v2749_v27, %v335_v17 }
  0x3f   : > { %986 = vmatpush2.msra.mxu0 %v813_v20  ;;  %1211 = vmatpush2.msra.mxu1 %v845_v21  ;;  %v297_v20 = vld [vmem:[%s2722_s20 + $0xc0] sm:$0xff]  ;;  %v4122_v21 = vmax.f32 %v3039_v1, 0.0  ;;  %489 = vst [vmem:[#allocation2 + $0xf9] sm:$0xff] %v4124_v14  ;;  %v4119_v40 = vmax.f32 %v3055_v15, 0.0 }
  0x40   : > { %987 = vmatprep.subr.mxu0 %v2534_v2  ;;  %1212 = vmatprep.subr.mxu1 %v2534_v2  ;;  %v336_v29 = vmul.f32 %v2744_v26, %v297_v20  ;;  %v4120_v4 = vmax.f32 %v3077_v41, 0.0  ;;  %v300_v20 = vld [vmem:[%s2722_s20 + $0xd8] sm:$0xff] }
  0x41   : > { %988 = vmatpush2.msra.mxu0 %v812_v30  ;;  %1213 = vmatpush2.msra.mxu1 %v844_v33  ;;  %v298_v30 = vld [vmem:[%s2722_s20 + $0xc8] sm:$0xff]  ;;  %v809_v33 = vld [vmem:[%s4112_s1 + $0x90] sm:$0xff]  ;;  %490 = vst [vmem:[#allocation2 + $0x109] sm:$0xff] %v4122_v21  ;;  %491 = vst [vmem:[#allocation2 + $0x111] sm:$0xff] %v4119_v40 }
  0x42   : > { %989 = vmatprep.subr.mxu0 %v2534_v2  ;;  %1214 = vmatprep.subr.mxu1 %v2534_v2  ;;  %v337_v48 = vmul.f32 %v2744_v26, %v298_v30  ;;  %v534_v30 = vld [vmem:[#allocation2 + $0x1] sm:$0xff]  ;;  %493 = vst [vmem:[#allocation2 + $0x129] sm:$0xff] %v4120_v4 }
  0x43   : > { %990 = vmatpush2.msra.mxu0 %v811_v49  ;;  %1215 = vmatpush2.msra.mxu1 %v843_v52  ;;  %v4118_v49 = vmax.f32 %v3061_v28, 0.0  ;;  %v3084_v52 = vadd.f32 %v2749_v27, %v336_v29  ;;  %v807_v29 = vld [vmem:[%s4112_s1 + $0x80] sm:$0xff] }
  0x44   : > { %991 = vmatprep.subr.mxu0 %v2534_v2  ;;  %1216 = vmatprep.subr.mxu1 %v2534_v2  ;;  %v3098_v5 = vadd.f32 %v2749_v27, %v337_v48  ;;  %v301_v48 = vld [vmem:[%s2722_s20 + $0xe0] sm:$0xff] }
  0x45   : > { %992 = vmatpush2.msra.mxu0 %v810_v9  ;;  %1217 = vmatpush2.msra.mxu1 %v842_v10  ;;  %v299_v9 = vld [vmem:[%s2722_s20 + $0xd0] sm:$0xff]  ;;  %492 = vst [vmem:[#allocation2 + $0x121] sm:$0xff] %v4118_v49  ;;  %v4121_v10 = vmax.f32 %v3084_v52, 0.0  ;;  %v598_v49 = vld [vmem:[#allocation2 + $0x18] sm:$0xff]  ;;  %v340_v4 = vmul.f32 %v2744_v26, %v301_v48 }
  0x46   : > { %993 = vmatprep.subr.mxu0 %v2534_v2  ;;  %1218 = vmatprep.subr.mxu1 %v2534_v2  ;;  %v338_v17 = vmul.f32 %v2744_v26, %v299_v9  ;;  %v839_v9 = vld [vmem:[%s4112_s1 + $0x180] sm:$0xff] }
  0x47   : > { %994 = vmatpush2.msra.mxu0 %v809_v33  ;;  %1219 = vmatpush2.msra.mxu1 %v841_v38  ;;  %v4123_v33 = vmax.f32 %v3098_v5, 0.0  ;;  %v339_v38 = vmul.f32 %v2744_v26, %v300_v20  ;;  %494 = vst [vmem:[#allocation2 + $0x139] sm:$0xff] %v4121_v10  ;;  %v566_v20 = vld [vmem:[#allocation2 + $0x2] sm:$0xff]  ;;  %v3135_v21 = vadd.f32 %v2749_v27, %v340_v4 }
  0x48   : > { %995 = vmatprep.subr.mxu0 %v2534_v2  ;;  %1220 = vmatprep.subr.mxu1 %v2534_v2  ;;  %v3122_v40 = vadd.f32 %v2749_v27, %v338_v17  ;;  %v535_v10 = vld [vmem:[#allocation2 + $0x9] sm:$0xff] }
  0x49   : > { %996 = vmatpush2.msra.mxu0 %v808_v60  ;;  %1221 = vmatpush2.msra.mxu1 %v840_v0  ;;  %495 = vst [vmem:[#allocation2 + $0x141] sm:$0xff] %v4123_v33  ;;  %v3130_v60 = vadd.f32 %v2749_v27, %v339_v38  ;;  %v302_v0 = vld [vmem:[%s2722_s20 + $0xe8] sm:$0xff]  ;;  %v870_v33 = vld [vmem:[%s4112_s1 + $0x278] sm:$0xff]  ;;  %v599_v38 = vld [vmem:[#allocation2 + $0x20] sm:$0xff]  ;;  %v4125_v4 = vmax.f32 %v3135_v21, 0.0 }
  0x4a   : > { %997 = vmatprep.subr.mxu0 %v2534_v2  ;;  %1222 = vmatprep.subr.mxu1 %v2534_v2  ;;  %v4127_v17 = vmax.f32 %v3122_v40, 0.0  ;;  %v341_v48 = vmul.f32 %v2744_v26, %v302_v0 }
  0x4b   : > { %998 = vmatpush2.msra.mxu0 %v807_v29  ;;  %999 = vmatprep.mubr.f32.mxu0 %v534_v30  ;;  %v4126_v14 = vmax.f32 %v3130_v60, 0.0  ;;  %v567_v30 = vld [vmem:[#allocation2 + $0xa] sm:$0xff]  ;;  %498 = vst [vmem:[#allocation2 + $0x169] sm:$0xff] %v4125_v4  ;;  %v902_v4 = vld [vmem:[%s4112_s1 + $0x378] sm:$0xff] }
  0x4c   : > { %1223 = vmatpush2.msra.mxu1 %v839_v9  ;;  %1224 = vmatprep.mubr.f32.mxu1 %v598_v49  ;;  %496 = vst [vmem:[#allocation2 + $0x151] sm:$0xff] %v4127_v17  ;;  %v3147_v29 = vadd.f32 %v2749_v27, %v341_v48  ;;  %v303_v9 = vld [vmem:[%s2722_s20 + $0xf0] sm:$0xff]  ;;  %v304_v17 = vld [vmem:[%s2722_s20 + $0xf8] sm:$0xff] }
  0x4d   : > { %1000 = vmatmul.mubr.f32.vlgmr.msra.gmra.mxu0 %v2534_v2  ;;  %1225 = vmatmul.mubr.f32.vlgmr.msra.gmra.mxu1 %v566_v20  ;;  %497 = vst [vmem:[#allocation2 + $0x159] sm:$0xff] %v4126_v14  ;;  %v869_v20 = vld [vmem:[%s4112_s1 + $0x270] sm:$0xff]  ;;  %v342_v48 = vmul.f32 %v2744_v26, %v303_v9  ;;  %v568_v14 = vld [vmem:[#allocation2 + $0x1a] sm:$0xff]  ;;  %v343_v25 = vmul.f32 %v2744_v26, %v304_v17  ;;  %v569_v26 = vld [vmem:[#allocation2 + $0x22] sm:$0xff] }
  0x4e   : > { %1385 = vmatprep.subr.mxu0 %v2534_v2  ;;  %1004 = vmatprep.mubr.f32.mxu0 %v535_v10  ;;  %v412_v0 = vmax.f32 %v3147_v29, 0.0  ;;  %v600_v10 = vld [vmem:[#allocation2 + $0x30] sm:$0xff]  ;;  %v604_v17 = vld [vmem:[#allocation2 + $0x60] sm:$0xff] }
  0x4f   : > { %1386 = vmatpush1.msra.mxu0 %v870_v33  ;;  %1229 = vmatprep.mubr.f32.mxu1 %v599_v38  ;;  %v868_v33 = vld [vmem:[%s4112_s1 + $0x268] sm:$0xff]  ;;  %v381_v9 = vadd.f32 %v2749_v27, %v342_v48  ;;  %v863_v48 = vld [vmem:[%s4112_s1 + $0x240] sm:$0xff] }
  0x50   : > { %1387 = vmatprep.subr.mxu0 %v2534_v2  ;;  %1610 = vmatprep.subr.mxu1 %v2534_v2  ;;  %499 = vst [vmem:[#allocation2 + $0x171] sm:$0xff] %v412_v0  ;;  %v903_v29 = vld [vmem:[%s4112_s1 + $0x380] sm:$0xff] }
  0x51   : > { %1005 = vmatmul.mubr.f32.gmra.mxu0 %v2534_v2  ;;  %1230 = vmatmul.mubr.f32.gmra.mxu1 %v567_v30  ;;  %v601_v30 = vld [vmem:[#allocation2 + $0x38] sm:$0xff]  ;;  %v413_v54 = vmax.f32 %v381_v9, 0.0  ;;  %v607_v9 = vld [vmem:[#allocation2 + $0x80] sm:$0xff] }
  0x52   : > { %1388 = vmatpush1.msra.mxu0 %v869_v20  ;;  %1009 = vmatprep.mubr.f32.mxu0 %v383_v45  ;;  %v867_v20 = vld [vmem:[%s4112_s1 + $0x260] sm:$0xff]  ;;  %v382_v45 = vadd.f32 %v2749_v27, %v343_v25  ;;  %v900_v27 = vld [vmem:[%s4112_s1 + $0x368] sm:$0xff]  ;;  %v865_v25 = vld [vmem:[%s4112_s1 + $0x250] sm:$0xff] }
  0x53   : > { %1234 = vmatprep.mubr.f32.mxu1 %v600_v10  ;;  %1389 = vmatprep.subr.mxu0 %v2534_v2  ;;  %500 = vst [vmem:[#allocation2 + $0x181] sm:$0xff] %v413_v54  ;;  %v866_v54 = vld [vmem:[%s4112_s1 + $0x258] sm:$0xff] }
  0x54   : > { %1390 = vmatpush1.msra.mxu0 %v868_v33  ;;  %1611 = vmatpush1.msra.mxu1 %v902_v4  ;;  %v605_v4 = vld [vmem:[#allocation2 + $0x68] sm:$0xff]  ;;  %v862_v33 = vld [vmem:[%s4112_s1 + $0x238] sm:$0xff] }
  0x55   : > { %1010 = vmatmul.mubr.f32.gmra.mxu0 %v598_v49  ;;  %1235 = vmatmul.mubr.f32.gmra.mxu1 %v568_v14  ;;  %v602_v49 = vld [vmem:[#allocation2 + $0x48] sm:$0xff]  ;;  %v414_v14 = vmax.f32 %v382_v45, 0.0  ;;  %v3261_v45 = vld [vmem:[#allocation2 + $0x98] sm:$0xff] }
  0x56   : > { %1014 = vmatprep.mubr.f32.mxu0 %v384_v50  ;;  %1239 = vmatprep.mubr.f32.mxu1 %v601_v30  ;;  %v603_v50 = vld [vmem:[#allocation2 + $0x50] sm:$0xff] }
  0x57   : > { %1391 = vmatprep.subr.mxu0 %v2534_v2  ;;  %1612 = vmatprep.subr.mxu1 %v2534_v2  ;;  %501 = vst [vmem:[#allocation2 + $0x189] sm:$0xff] %v414_v14  ;;  %v3290_v14 = vld [vmem:[#allocation2 + $0x92] sm:$0xff] }
  0x58   : > { %1392 = vmatpush1.msra.mxu0 %v867_v20  ;;  %1613 = vmatpush1.msra.mxu1 %v901_v36  ;;  %v3246_v20 = vld [vmem:[#allocation2] sm:$0xff]  ;;  %v860_v36 = vld [vmem:[%s4112_s1 + $0x228] sm:$0xff] }
  0x59   : > { %1015 = vmatmul.mubr.f32.gmra.mxu0 %v599_v38  ;;  %1240 = vmatmul.mubr.f32.gmra.mxu1 %v569_v26  ;;  %v864_v38 = vld [vmem:[%s4112_s1 + $0x248] sm:$0xff]  ;;  %v859_v26 = vld [vmem:[%s4112_s1 + $0x220] sm:$0xff] }
  0x5a   : > { %1019 = vmatprep.mubr.f32.mxu0 %v385_v57  ;;  %1244 = vmatprep.mubr.f32.mxu1 %v602_v49  ;;  %v571_v57 = vld [vmem:[#allocation2 + $0x3a] sm:$0xff] }
  0x5b   : > { %1393 = vmatprep.subr.mxu0 %v2534_v2  ;;  %1614 = vmatprep.subr.mxu1 %v2534_v2 }
  0x5c   : > { %1394 = vmatpush1.msra.mxu0 %v866_v54  ;;  %1615 = vmatpush1.msra.mxu1 %v900_v27  ;;  %v3293_v54 = vld [vmem:[#allocation2 + $0xb0] sm:$0xff]  ;;  %v3306_v27 = vld [vmem:[#allocation2 + $0x9a] sm:$0xff] }
  0x5d   : > { %1020 = vmatmul.mubr.f32.gmra.mxu0 %v600_v10  ;;  %1245 = vmatmul.mubr.f32.gmra.mxu1 %v570_v39  ;;  %v606_v10 = vld [vmem:[#allocation2 + $0x78] sm:$0xff]  ;;  %v3309_v39 = vld [vmem:[#allocation2 + $0xc0] sm:$0xff] }
  0x5e   : > { %1024 = vmatprep.mubr.f32.mxu0 %v386_v62  ;;  %1249 = vmatprep.mubr.f32.mxu1 %v603_v50  ;;  %v572_v62 = vld [vmem:[#allocation2 + $0x4a] sm:$0xff] }
  0x5f   : > { %1395 = vmatprep.subr.mxu0 %v2534_v2  ;;  %1616 = vmatprep.subr.mxu1 %v2534_v2 }
  0x60   : > { %1396 = vmatpush1.msra.mxu0 %v865_v25  ;;  %1617 = vmatpush1.msra.mxu1 %v899_v46  ;;  %v3326_v25 = vld [vmem:[#allocation2 + $0xc8] sm:$0xff]  ;;  %v3340_v46 = vld [vmem:[#allocation2 + $0xb2] sm:$0xff] }
  0x61   : > { %1025 = vmatmul.mubr.f32.gmra.mxu0 %v601_v30  ;;  %1250 = vmatmul.mubr.f32.gmra.mxu1 %v571_v57  ;;  %v861_v30 = vld [vmem:[%s4112_s1 + $0x230] sm:$0xff]  ;;  %v3343_v57 = vld [vmem:[#allocation2 + $0xd8] sm:$0xff] }
  0x62   : > { %1029 = vmatprep.mubr.f32.mxu0 %v387_v6  ;;  %1254 = vmatprep.mubr.f32.mxu1 %v604_v17  ;;  %v573_v6 = vld [vmem:[#allocation2 + $0x52] sm:$0xff] }
  0x63   : > { %1397 = vmatprep.subr.mxu0 %v2534_v2  ;;  %1618 = vmatprep.subr.mxu1 %v2534_v2 }
  0x64   : > { %1398 = vmatpush1.msra.mxu0 %v864_v38  ;;  %1619 = vmatpush1.msra.mxu1 %v898_v51  ;;  %v3360_v38 = vld [vmem:[#allocation2 + $0xe0] sm:$0xff]  ;;  %v3374_v51 = vld [vmem:[#allocation2 + $0xca] sm:$0xff] }
  0x65   : > { %1030 = vmatmul.mubr.f32.gmra.mxu0 %v602_v49  ;;  %1255 = vmatmul.mubr.f32.gmra.mxu1 %v572_v62  ;;  %v3277_v49 = vld [vmem:[#allocation2 + $0xa8] sm:$0xff]  ;;  %v3377_v62 = vld [vmem:[#allocation2 + $0xf0] sm:$0xff] }
  0x66   : > { %1034 = vmatprep.mubr.f32.mxu0 %v388_v7  ;;  %1259 = vmatprep.mubr.f32.mxu1 %v605_v4  ;;  %v574_v7 = vld [vmem:[#allocation2 + $0x62] sm:$0xff] }
  0x67   : > { %1399 = vmatprep.subr.mxu0 %v2534_v2  ;;  %1620 = vmatprep.subr.mxu1 %v2534_v2 }
  0x68   : > { %1400 = vmatpush1.msra.mxu0 %v863_v48  ;;  %1621 = vmatpush1.msra.mxu1 %v897_v58  ;;  %v3394_v48 = vld [vmem:[#allocation2 + $0xf8] sm:$0xff]  ;;  %v4130_v58 = vmax.f32 %v2993_v16, 0.0 }
  0x69   : > { %1035 = vmatmul.mubr.f32.gmra.mxu0 %v603_v50  ;;  %1260 = vmatmul.mubr.f32.gmra.mxu1 %v573_v6  ;;  %v3323_v50 = vld [vmem:[#allocation2 + $0xaa] sm:$0xff]  ;;  %v3408_v6 = vld [vmem:[#allocation2 + $0xe2] sm:$0xff]  ;;  %v882_v16 = vld [vmem:[%s4112_s1 + $0x2d8] sm:$0xff] }
  0x6a   : > { %1039 = vmatprep.mubr.f32.mxu0 %v389_v11  ;;  %1264 = vmatprep.mubr.f32.mxu1 %v606_v10  ;;  %v575_v11 = vld [vmem:[#allocation2 + $0x6a] sm:$0xff] }
  0x6b   : > { %1401 = vmatprep.subr.mxu0 %v2534_v2  ;;  %1622 = vmatprep.subr.mxu1 %v2534_v2  ;;  %v608_v2 = vld [vmem:[#allocation2 + $0x90] sm:$0xff] }
  0x6c   : > { %1402 = vmatpush1.msra.mxu0 %v862_v33  ;;  %1623 = vmatpush1.msra.mxu1 %v896_v59  ;;  %v916_v33 = vld [vmem:[%s4112_s1 + $0x3e8] sm:$0xff]  ;;  %v4131_v59 = vmax.f32 %v3018_v34, 0.0  ;;  %v881_v34 = vld [vmem:[%s4112_s1 + $0x2d0] sm:$0xff] }
  0x6d   : > { %1040 = vmatmul.mubr.f32.gmra.mxu0 %v604_v17  ;;  %1265 = vmatmul.mubr.f32.gmra.mxu1 %v574_v7  ;;  %v3357_v17 = vld [vmem:[#allocation2 + $0xc2] sm:$0xff]  ;;  %v3425_v7 = vld [vmem:[#allocation2 + $0xf2] sm:$0xff] }
  0x6e   : > { %1044 = vmatprep.mubr.f32.mxu0 %v390_v18  ;;  %1269 = vmatprep.mubr.f32.mxu1 %v607_v9  ;;  %v3258_v18 = vld [vmem:[#allocation2 + $0x7a] sm:$0xff] }
  0x6f   : > { %1403 = vmatprep.subr.mxu0 %v3246_v20  ;;  %1624 = vmatprep.subr.mxu1 %v3246_v20 }
  0x70   : > { %1404 = vmatpush1.msra.mxu0 %v861_v30  ;;  %1625 = vmatpush1.msra.mxu1 %v895_v63  ;;  %v915_v30 = vld [vmem:[%s4112_s1 + $0x3e0] sm:$0xff]  ;;  %v4132_v63 = vmax.f32 %v3034_v56, 0.0  ;;  %v880_v56 = vld [vmem:[%s4112_s1 + $0x2c8] sm:$0xff] }
  0x71   : > { %1045 = vmatmul.mubr.f32.gmra.mxu0 %v605_v4  ;;  %1270 = vmatmul.mubr.f32.gmra.mxu1 %v575_v11  ;;  %v3391_v4 = vld [vmem:[#allocation2 + $0xda] sm:$0xff] }
  0x72   : > { %1049 = vmatprep.mubr.f32.mxu0 %v391_v22  ;;  %1274 = vmatprep.mubr.f32.mxu1 %v608_v2  ;;  %v3274_v22 = vld [vmem:[#allocation2 + $0x82] sm:$0xff]  ;;  %v3442_v11 = vld [vmem:[#allocation2 + $0xfa] sm:$0xff] }
  0x73   : > { %1405 = vmatprep.subr.mxu0 %v3246_v20  ;;  %1626 = vmatprep.subr.mxu1 %v3246_v20 }
  0x74   : > { %1406 = vmatpush1.msra.mxu0 %v860_v36  ;;  %1627 = vmatpush1.msra.mxu1 %v894_v8  ;;  %v914_v36 = vld [vmem:[%s4112_s1 + $0x3d8] sm:$0xff]  ;;  %v4133_v8 = vmax.f32 %v3039_v1, 0.0  ;;  %v879_v1 = vld [vmem:[%s4112_s1 + $0x2c0] sm:$0xff] }
  0x75   : > { %1050 = vmatmul.mubr.f32.gmra.mxu0 %v606_v10  ;;  %1275 = vmatmul.mubr.f32.gmra.mxu1 %v3258_v18  ;;  %v3411_v10 = vld [vmem:[#allocation2 + $0x108] sm:$0xff] }
  0x76   : > { %1054 = vmatprep.mubr.f32.mxu0 %v392_v23  ;;  %1279 = vmatprep.mubr.f32.mxu1 %v3261_v45  ;;  %v892_v23 = vld [vmem:[%s4112_s1 + $0x328] sm:$0xff] }
  0x77   : > { %1407 = vmatprep.subr.mxu0 %v3246_v20  ;;  %1628 = vmatprep.subr.mxu1 %v3246_v20 }
  0x78   : > { %1408 = vmatpush1.msra.mxu0 %v859_v26  ;;  %1629 = vmatpush1.msra.mxu1 %v893_v12  ;;  %v3459_v26 = vld [vmem:[#allocation2 + $0x10a] sm:$0xff] }
  0x79   : > { %1055 = vmatmul.mubr.f32.gmra.mxu0 %v607_v9  ;;  %1280 = vmatmul.mubr.f32.gmra.mxu1 %v3274_v22  ;;  %v3428_v9 = vld [vmem:[#allocation2 + $0x110] sm:$0xff]  ;;  %v3462_v12 = vld [vmem:[#allocation2 + $0x128] sm:$0xff] }
  0x7a   : > { %1059 = vmatprep.mubr.f32.mxu0 %v393_v31  ;;  %1284 = vmatprep.mubr.f32.mxu1 %v3277_v49  ;;  %v891_v31 = vld [vmem:[%s4112_s1 + $0x320] sm:$0xff] }
  0x7b   : > { %1409 = vmatprep.subr.mxu0 %v3246_v20  ;;  %1630 = vmatprep.subr.mxu1 %v3246_v20 }
  0x7c   : > { %1410 = vmatpush1.msra.mxu0 %v858_v13  ;;  %1631 = vmatpush1.msra.mxu1 %v892_v23  ;;  %v913_v13 = vld [vmem:[%s4112_s1 + $0x3d0] sm:$0xff]  ;;  %v4134_v23 = vmax.f32 %v3055_v15, 0.0  ;;  %v878_v15 = vld [vmem:[%s4112_s1 + $0x2b8] sm:$0xff] }
  0x7d   : > { %1060 = vmatmul.mubr.f32.gmra.mxu0 %v608_v2  ;;  %1285 = vmatmul.mubr.f32.gmra.mxu1 %v3290_v14  ;;  %v3445_v2 = vld [vmem:[#allocation2 + $0x120] sm:$0xff] }
  0x7e   : > { %1064 = vmatprep.mubr.f32.mxu0 %v394_v35  ;;  %1289 = vmatprep.mubr.f32.mxu1 %v3293_v54  ;;  %v890_v35 = vld [vmem:[%s4112_s1 + $0x318] sm:$0xff] }
  0x7f   : > { %1411 = vmatprep.subr.mxu0 %v3246_v20  ;;  %1632 = vmatprep.subr.mxu1 %v3246_v20 }
  0x80   : > { %1412 = vmatpush1.msra.mxu0 %v857_v19  ;;  %1633 = vmatpush1.msra.mxu1 %v891_v31  ;;  %v3476_v19 = vld [vmem:[#allocation2 + $0x112] sm:$0xff] }
  0x81   : > { %1065 = vmatmul.mubr.f32.gmra.mxu0 %v3261_v45  ;;  %1290 = vmatmul.mubr.f32.gmra.mxu1 %v3306_v27  ;;  %v3479_v31 = vld [vmem:[#allocation2 + $0x138] sm:$0xff] }
  0x82   : > { %1069 = vmatprep.mubr.f32.mxu0 %v395_v42  ;;  %1294 = vmatprep.mubr.f32.mxu1 %v3309_v39  ;;  %v889_v42 = vld [vmem:[%s4112_s1 + $0x310] sm:$0xff] }
  0x83   : > { %1413 = vmatprep.subr.mxu0 %v3246_v20  ;;  %1634 = vmatprep.subr.mxu1 %v3246_v20 }
  0x84   : > { %1414 = vmatpush1.msra.mxu0 %v856_v24  ;;  %1635 = vmatpush1.msra.mxu1 %v890_v35  ;;  %v912_v24 = vld [vmem:[%s4112_s1 + $0x3c8] sm:$0xff]  ;;  %v4135_v35 = vmax.f32 %v3061_v28, 0.0  ;;  %v877_v28 = vld [vmem:[%s4112_s1 + $0x2b0] sm:$0xff] }
  0x85   : > { %1070 = vmatmul.mubr.f32.gmra.mxu0 %v3277_v49  ;;  %1295 = vmatmul.mubr.f32.gmra.mxu1 %v3323_v50 }
  0x86   : > { %1074 = vmatprep.mubr.f32.mxu0 %v396_v44  ;;  %1299 = vmatprep.mubr.f32.mxu1 %v3326_v25  ;;  %v888_v44 = vld [vmem:[%s4112_s1 + $0x308] sm:$0xff] }
  0x87   : > { %1415 = vmatprep.subr.mxu0 %v3246_v20  ;;  %1636 = vmatprep.subr.mxu1 %v3246_v20 }
  0x88   : > { %1416 = vmatpush1.msra.mxu0 %v855_v32  ;;  %1637 = vmatpush1.msra.mxu1 %v889_v42  ;;  %v3493_v32 = vld [vmem:[#allocation2 + $0x122] sm:$0xff] }
  0x89   : > { %1075 = vmatmul.mubr.f32.gmra.mxu0 %v3293_v54  ;;  %1300 = vmatmul.mubr.f32.gmra.mxu1 %v3340_v46  ;;  %v3496_v42 = vld [vmem:[#allocation2 + $0x140] sm:$0xff] }
  0x8a   : > { %1079 = vmatprep.mubr.f32.mxu0 %v397_v53  ;;  %1304 = vmatprep.mubr.f32.mxu1 %v3343_v57  ;;  %v887_v53 = vld [vmem:[%s4112_s1 + $0x300] sm:$0xff] }
  0x8b   : > { %1417 = vmatprep.subr.mxu0 %v3246_v20  ;;  %1638 = vmatprep.subr.mxu1 %v3246_v20 }
  0x8c   : > { %1418 = vmatpush2.msra.mxu0 %v886_v37  ;;  %1639 = vmatpush1.msra.mxu1 %v888_v44  ;;  %v911_v37 = vld [vmem:[%s4112_s1 + $0x3c0] sm:$0xff]  ;;  %v4136_v44 = vmax.f32 %v3077_v41, 0.0  ;;  %v876_v41 = vld [vmem:[%s4112_s1 + $0x2a8] sm:$0xff] }
  0x8d   : > { %1080 = vmatmul.mubr.f32.gmra.mxu0 %v3309_v39  ;;  %1305 = vmatmul.mubr.f32.gmra.mxu1 %v3357_v17 }
  0x8e   : > { %1084 = vmatprep.mubr.f32.mxu0 %v398_v55  ;;  %1309 = vmatprep.mubr.f32.mxu1 %v3360_v38  ;;  %v918_v55 = vld [vmem:[%s4112_s1 + $0x3f8] sm:$0xff] }
  0x8f   : > { %1419 = vmatprep.subr.mxu0 %v3246_v20  ;;  %1640 = vmatprep.subr.mxu1 %v3246_v20 }
  0x90   : > { %1420 = vmatpush2.msra.mxu0 %v885_v43  ;;  %1641 = vmatpush1.msra.mxu1 %v887_v53  ;;  %v3510_v43 = vld [vmem:[#allocation2 + $0x12a] sm:$0xff] }
  0x91   : > { %1085 = vmatmul.mubr.f32.gmra.mxu0 %v3326_v25  ;;  %1310 = vmatmul.mubr.f32.gmra.mxu1 %v3374_v51  ;;  %v3513_v53 = vld [vmem:[#allocation2 + $0x150] sm:$0xff] }
  0x92   : > { %1089 = vmatprep.mubr.f32.mxu0 %v399_v3  ;;  %1314 = vmatprep.mubr.f32.mxu1 %v3377_v62  ;;  %v917_v3 = vld [vmem:[%s4112_s1 + $0x3f0] sm:$0xff] }
  0x93   : > { %1421 = vmatprep.subr.mxu0 %v3246_v20  ;;  %1642 = vmatprep.subr.mxu1 %v3246_v20 }
  0x94   : > { %1422 = vmatpush2.msra.mxu0 %v884_v47  ;;  %1643 = vmatpush2.msra.mxu1 %v918_v55  ;;  %v910_v47 = vld [vmem:[%s4112_s1 + $0x3b8] sm:$0xff]  ;;  %v4137_v55 = vmax.f32 %v3084_v52, 0.0  ;;  %v875_v52 = vld [vmem:[%s4112_s1 + $0x2a0] sm:$0xff] }
  0x95   : > { %1090 = vmatmul.mubr.f32.gmra.mxu0 %v3343_v57  ;;  %1315 = vmatmul.mubr.f32.gmra.mxu1 %v3391_v4 }
  0x96   : > { %1094 = vmatprep.mubr.f32.mxu0 %v4130_v58  ;;  %1319 = vmatprep.mubr.f32.mxu1 %v3394_v48  ;;  %v909_v58 = vld [vmem:[%s4112_s1 + $0x3b0] sm:$0xff] }
  0x97   : > { %1423 = vmatprep.subr.mxu0 %v3246_v20  ;;  %1644 = vmatprep.subr.mxu1 %v3246_v20 }
  0x98   : > { %1424 = vmatpush2.msra.mxu0 %v883_v61  ;;  %1645 = vmatpush2.msra.mxu1 %v917_v3  ;;  %v3527_v61 = vld [vmem:[#allocation2 + $0x13a] sm:$0xff] }
  0x99   : > { %1095 = vmatmul.mubr.f32.gmra.mxu0 %v3360_v38  ;;  %1320 = vmatmul.mubr.f32.gmra.mxu1 %v3408_v6  ;;  %v3530_v3 = vld [vmem:[#allocation2 + $0x158] sm:$0xff] }
  0x9a   : > { %1099 = vmatprep.mubr.f32.mxu0 %v4131_v59  ;;  %1324 = vmatprep.mubr.f32.mxu1 %v3411_v10  ;;  %v3547_v59 = vld [vmem:[#allocation2 + $0x168] sm:$0xff] }
  0x9b   : > { %1425 = vmatprep.subr.mxu0 %v3246_v20  ;;  %1646 = vmatprep.subr.mxu1 %v3246_v20 }
  0x9c   : > { %1426 = vmatpush2.msra.mxu0 %v882_v16  ;;  %1647 = vmatpush2.msra.mxu1 %v916_v33  ;;  %v4138_v16 = vmax.f32 %v3098_v5, 0.0  ;;  %v3544_v33 = vld [vmem:[#allocation2 + $0x142] sm:$0xff]  ;;  %v874_v5 = vld [vmem:[%s4112_s1 + $0x298] sm:$0xff] }
  0x9d   : > { %1100 = vmatmul.mubr.f32.gmra.mxu0 %v3377_v62  ;;  %1325 = vmatmul.mubr.f32.gmra.mxu1 %v3425_v7 }
  0x9e   : > { %1104 = vmatprep.mubr.f32.mxu0 %v4132_v63  ;;  %1329 = vmatprep.mubr.f32.mxu1 %v3428_v9  ;;  %v3561_v63 = vld [vmem:[#allocation2 + $0x152] sm:$0xff] }
  0x9f   : > { %1427 = vmatprep.subr.mxu0 %v3246_v20  ;;  %1648 = vmatprep.subr.mxu1 %v3246_v20 }
  0xa0   : > { %1428 = vmatpush2.msra.mxu0 %v881_v34  ;;  %1649 = vmatpush2.msra.mxu1 %v915_v30  ;;  %v908_v34 = vld [vmem:[%s4112_s1 + $0x3a8] sm:$0xff]  ;;  %v4139_v30 = vmax.f32 %v3122_v40, 0.0  ;;  %v873_v40 = vld [vmem:[%s4112_s1 + $0x290] sm:$0xff] }
  0xa1   : > { %1105 = vmatmul.mubr.f32.gmra.mxu0 %v3394_v48  ;;  %1330 = vmatmul.mubr.f32.gmra.mxu1 %v3442_v11 }
  0xa2   : > { %1109 = vmatprep.mubr.f32.mxu0 %v4133_v8  ;;  %1334 = vmatprep.mubr.f32.mxu1 %v3445_v2  ;;  %v4140_v8 = vmax.f32 %v3130_v60, 0.0  ;;  %v872_v60 = vld [vmem:[%s4112_s1 + $0x288] sm:$0xff] }
  0xa3   : > { %1429 = vmatprep.subr.mxu0 %v3246_v20  ;;  %1650 = vmatprep.subr.mxu1 %v3246_v20 }
  0xa4   : > { %1430 = vmatpush2.msra.mxu0 %v880_v56  ;;  %1651 = vmatpush2.msra.mxu1 %v914_v36  ;;  %v3564_v56 = vld [vmem:[#allocation2 + $0x170] sm:$0xff]  ;;  %v907_v36 = vld [vmem:[%s4112_s1 + $0x3a0] sm:$0xff] }
  0xa5   : > { %1110 = vmatmul.mubr.f32.gmra.mxu0 %v3411_v10  ;;  %1335 = vmatmul.mubr.f32.gmra.mxu1 %v3459_v26 }
  0xa6   : > { %1114 = vmatprep.mubr.f32.mxu0 %v4134_v23  ;;  %1339 = vmatprep.mubr.f32.mxu1 %v3462_v12  ;;  %v906_v23 = vld [vmem:[%s4112_s1 + $0x398] sm:$0xff] }
  0xa7   : > { %1431 = vmatprep.subr.mxu0 %v3246_v20  ;;  %1652 = vmatprep.subr.mxu1 %v3246_v20 }
  0xa8   : > { %1432 = vmatpush2.msra.mxu0 %v879_v1  ;;  %1653 = vmatpush2.msra.mxu1 %v913_v13  ;;  %v3578_v1 = vld [vmem:[#allocation2 + $0x15a] sm:$0xff] }
  0xa9   : > { %1115 = vmatmul.mubr.f32.gmra.mxu0 %v3428_v9  ;;  %1340 = vmatmul.mubr.f32.gmra.mxu1 %v3476_v19  ;;  %v3582_v13 = vld [vmem:[#allocation2 + $0x180] sm:$0xff] }
  0xaa   : > { %1119 = vmatprep.mubr.f32.mxu0 %v4135_v35  ;;  %1344 = vmatprep.mubr.f32.mxu1 %v3479_v31  ;;  %v3599_v35 = vld [vmem:[#allocation2 + $0x188] sm:$0xff] }
  0xab   : > { %1433 = vmatprep.subr.mxu0 %v3246_v20  ;;  %1654 = vmatprep.subr.mxu1 %v3246_v20 }
  0xac   : > { %1434 = vmatpush2.msra.mxu0 %v878_v15  ;;  %1655 = vmatpush2.msra.mxu1 %v912_v24  ;;  %v4141_v15 = vmax.f32 %v3135_v21, 0.0  ;;  %v3595_v24 = vld [vmem:[#allocation2 + $0x16a] sm:$0xff]  ;;  %v3609_v21 = vld [vmem:[#allocation2 + $0x172] sm:$0xff] }
  0xad   : > { %1120 = vmatmul.mubr.f32.gmra.mxu0 %v3445_v2  ;;  %1345 = vmatmul.mubr.f32.gmra.mxu1 %v3493_v32 }
  0xae   : > { %1124 = vmatprep.mubr.f32.mxu0 %v4136_v44  ;;  %1349 = vmatprep.mubr.f32.mxu1 %v3496_v42  ;;  %v904_v44 = vld [vmem:[%s4112_s1 + $0x388] sm:$0xff] }
  0xaf   : > { %1435 = vmatprep.subr.mxu0 %v3246_v20  ;;  %1656 = vmatprep.subr.mxu1 %v3246_v20 }
  0xb0   : > { %1436 = vmatpush2.msra.mxu0 %v877_v28  ;;  %1657 = vmatpush2.msra.mxu1 %v911_v37  ;;  %v905_v28 = vld [vmem:[%s4112_s1 + $0x390] sm:$0xff]  ;;  %v871_v37 = vld [vmem:[%s4112_s1 + $0x280] sm:$0xff] }
  0xb1   : > { %1125 = vmatmul.mubr.f32.gmra.mxu0 %v3462_v12  ;;  %1350 = vmatmul.mubr.f32.gmra.mxu1 %v3510_v43 }
  0xb2   : > { %1129 = vmatprep.mubr.f32.mxu0 %v4137_v55  ;;  %1354 = vmatprep.mubr.f32.mxu1 %v3513_v53  ;;  %v695_v55 = vld [vmem:[#allocation2 + $0x30] sm:$0xff] }
  0xb3   : > { %1437 = vmatprep.subr.mxu0 %v3246_v20  ;;  %1658 = vmatprep.subr.mxu1 %v3246_v20 }
  0xb4   : > { %1438 = vmatpush2.msra.mxu0 %v876_v41  ;;  %1659 = vmatpush2.msra.mxu1 %v910_v47  ;;  %v662_v41 = vld [vmem:[#allocation2 + $0x1a] sm:$0xff] }
  0xb5   : > { %1130 = vmatmul.mubr.f32.gmra.mxu0 %v3479_v31  ;;  %1355 = vmatmul.mubr.f32.gmra.mxu1 %v3527_v61  ;;  %v630_v47 = vld [vmem:[#allocation2 + $0x19] sm:$0xff] }
  0xb6   : > { %1134 = vmatprep.mubr.f32.mxu0 %v4138_v16  ;;  %1359 = vmatprep.mubr.f32.mxu1 %v3530_v3  ;;  %v728_v16 = vld [vmem:[#allocation2 + $0x39] sm:$0xff] }
  0xb7   : > { %1439 = vmatprep.subr.mxu0 %v3246_v20  ;;  %1660 = vmatprep.subr.mxu1 %v3246_v20 }
  0xb8   : > { %1440 = vmatpush2.msra.mxu0 %v875_v52  ;;  %1661 = vmatpush2.msra.mxu1 %v909_v58  ;;  %v934_v52 = vld [vmem:[%s4112_s1 + $0x478] sm:$0xff]  ;;  %v663_v58 = vld [vmem:[#allocation2 + $0x22] sm:$0xff] }
  0xb9   : > { %1135 = vmatmul.mubr.f32.gmra.mxu0 %v3496_v42  ;;  %1360 = vmatmul.mubr.f32.gmra.mxu1 %v3544_v33 }
  0xba   : > { %1139 = vmatprep.mubr.f32.mxu0 %v4139_v30  ;;  %1364 = vmatprep.mubr.f32.mxu1 %v3547_v59  ;;  %v696_v30 = vld [vmem:[#allocation2 + $0x38] sm:$0xff] }
  0xbb   : > { %1441 = vmatprep.subr.mxu0 %v3246_v20  ;;  %1662 = vmatprep.subr.mxu1 %v3246_v20 }
  0xbc   : > { %1442 = vmatpush2.msra.mxu0 %v874_v5  ;;  %1663 = vmatpush2.msra.mxu1 %v908_v34  ;;  %v933_v5 = vld [vmem:[%s4112_s1 + $0x470] sm:$0xff]  ;;  %v631_v34 = vld [vmem:[#allocation2 + $0x21] sm:$0xff] }
  0xbd   : > { %1140 = vmatmul.mubr.f32.gmra.mxu0 %v3513_v53  ;;  %1365 = vmatmul.mubr.f32.gmra.mxu1 %v3561_v63 }
  0xbe   : > { %1144 = vmatprep.mubr.f32.mxu0 %v4140_v8  ;;  %1369 = vmatprep.mubr.f32.mxu1 %v3564_v56  ;;  %v697_v8 = vld [vmem:[#allocation2 + $0x48] sm:$0xff] }
  0xbf   : > { %1443 = vmatprep.subr.mxu0 %v3246_v20  ;;  %1664 = vmatprep.subr.mxu1 %v3246_v20 }
  0xc0   : > { %1444 = vmatpush2.msra.mxu0 %v873_v40  ;;  %1665 = vmatpush2.msra.mxu1 %v907_v36  ;;  %v729_v40 = vld [vmem:[#allocation2 + $0x49] sm:$0xff] }
  0xc1   : > { %1145 = vmatmul.mubr.f32.gmra.mxu0 %v3530_v3  ;;  %1370 = vmatmul.mubr.f32.gmra.mxu1 %v3578_v1  ;;  %v932_v36 = vld [vmem:[%s4112_s1 + $0x468] sm:$0xff] }
  0xc2   : > { %1149 = vmatprep.mubr.f32.mxu0 %v4141_v15  ;;  %1374 = vmatprep.mubr.f32.mxu1 %v3582_v13  ;;  %v931_v15 = vld [vmem:[%s4112_s1 + $0x460] sm:$0xff] }
  0xc3   : > { %1445 = vmatprep.subr.mxu0 %v3246_v20  ;;  %1666 = vmatprep.subr.mxu1 %v3246_v20 }
  0xc4   : > { %1446 = vmatpush2.msra.mxu0 %v872_v60  ;;  %1667 = vmatpush2.msra.mxu1 %v906_v23  ;;  %v3638_v60 = vld [vmem:[#allocation2 + $0x3a] sm:$0xff]  ;;  %v730_v23 = vld [vmem:[#allocation2 + $0x51] sm:$0xff] }
  0xc5   : > { %1150 = vmatmul.mubr.f32.gmra.mxu0 %v3547_v59  ;;  %1375 = vmatmul.mubr.f32.gmra.mxu1 %v3595_v24 }
  0xc6   : > { %1668 = vmatprep.subr.mxu1 %v3246_v20  ;;  %1154 = vmatprep.mubr.f32.mxu0 %v412_v0  ;;  %v727_v0 = vld [vmem:[#allocation2 + $0x31] sm:$0xff] }
  0xc7   : > { %1379 = vmatprep.mubr.f32.mxu1 %v3599_v35  ;;  %1669 = vmatpush2.msra.mxu1 %v905_v28  ;;  %v698_v28 = vld [vmem:[#allocation2 + $0x50] sm:$0xff] }
  0xc8   : > { %1447 = vmatprep.subr.mxu0 %v3246_v20  ;;  %1670 = vmatprep.subr.mxu1 %v3246_v20 }
  0xc9   : > { %1155 = vmatmul.mubr.f32.gmra.mxu0 %v3564_v56  ;;  %1380 = vmatmul.mubr.f32.gmra.mxu1 %v3609_v21 }
  0xca   : > { %1448 = vmatpush2.msra.mxu0 %v871_v37  ;;  %1671 = vmatpush2.msra.mxu1 %v904_v44  ;;  %v3644_v37 = vld [vmem:[#allocation2 + $0x4a] sm:$0xff]  ;;  %v731_v44 = vld [vmem:[#allocation2 + $0x61] sm:$0xff] }
  0xcb   : > { %1672 = vmatprep.subr.mxu1 %v3246_v20  ;;  %1449 = vmatprep.mubr.f32.mxu0 %v662_v41  ;;  %v3632_v20 = vld [vmem:[#allocation2 + $0x32] sm:$0xff] }
  0xcc   : > { %1673 = vmatpush2.msra.mxu1 %v903_v29  ;;  %1674 = vmatprep.mubr.f32.mxu1 %v727_v0  ;;  %v930_v41 = vld [vmem:[%s4112_s1 + $0x458] sm:$0xff]  ;;  %v699_v29 = vld [vmem:[#allocation2 + $0x60] sm:$0xff] }
  0xcd   : > { %1450 = vmatmul.mubr.f32.vlgmr.msra.gmra.mxu0 %v630_v47  ;;  %1675 = vmatmul.mubr.f32.vlgmr.msra.gmra.mxu1 %v695_v55  ;;  %v732_v47 = vld [vmem:[#allocation2 + $0x69] sm:$0xff] }
  0xce   : > { %2382 = vmatprep.subr.mxu0 %v934_v52  ;;  %1454 = vmatprep.mubr.f32.mxu0 %v663_v58  ;;  %v929_v55 = vld [vmem:[%s4112_s1 + $0x450] sm:$0xff]  ;;  %v3656_v58 = vld [vmem:[#allocation2 + $0x62] sm:$0xff] }
  0xcf   : > { %2383 = vmatpush3.msra.mxu0 %v934_v52  ;;  %1679 = vmatprep.mubr.f32.mxu1 %v728_v16 }
  0xd0   : > { %2384 = vmatprep.subr.mxu0 %v933_v5  ;;  %2462 = vmatprep.subr.mxu1 %v934_v52 }
  0xd1   : > { %1455 = vmatmul.mubr.f32.gmra.mxu0 %v631_v34  ;;  %1680 = vmatmul.mubr.f32.gmra.mxu1 %v696_v30  ;;  %v701_v34 = vld [vmem:[#allocation2 + $0x78] sm:$0xff]  ;;  %v3662_v30 = vld [vmem:[#allocation2 + $0x6a] sm:$0xff] }
  0xd2   : > { %1459 = vmatprep.mubr.f32.mxu0 %v3632_v20  ;;  %1684 = vmatprep.mubr.f32.mxu1 %v729_v40 }
  0xd3   : > { %2385 = vmatpush3.msra.mxu0 %v933_v5  ;;  %2478 = vmatpush3.msra.mxu1 %v934_v52  ;;  %v700_v52 = vld [vmem:[#allocation2 + $0x68] sm:$0xff] }
  0xd4   : > { %2386 = vmatprep.subr.mxu0 %v932_v36  ;;  %2463 = vmatprep.subr.mxu1 %v933_v5 }
  0xd5   : > { %1460 = vmatmul.mubr.f32.gmra.mxu0 %v727_v0  ;;  %1685 = vmatmul.mubr.f32.gmra.mxu1 %v697_v8  ;;  %v3650_v0 = vld [vmem:[#allocation2 + $0x52] sm:$0xff]  ;;  %v702_v8 = vld [vmem:[#allocation2 + $0x80] sm:$0xff] }
  0xd6   : > { %1464 = vmatprep.mubr.f32.mxu0 %v3638_v60  ;;  %1689 = vmatprep.mubr.f32.mxu1 %v730_v23 }
  0xd7   : > { %2387 = vmatpush3.msra.mxu0 %v932_v36  ;;  %2479 = vmatpush3.msra.mxu1 %v933_v5  ;;  %v928_v5 = vld [vmem:[%s4112_s1 + $0x448] sm:$0xff] }
  0xd8   : > { %2388 = vmatprep.subr.mxu0 %v931_v15  ;;  %2464 = vmatprep.subr.mxu1 %v932_v36 }
  0xd9   : > { %1465 = vmatmul.mubr.f32.gmra.mxu0 %v728_v16  ;;  %1690 = vmatmul.mubr.f32.gmra.mxu1 %v698_v28  ;;  %v733_v16 = vld [vmem:[#allocation2 + $0x79] sm:$0xff]  ;;  %v703_v28 = vld [vmem:[#allocation2 + $0x90] sm:$0xff] }
  0xda   : > { %1469 = vmatprep.mubr.f32.mxu0 %v3644_v37  ;;  %1694 = vmatprep.mubr.f32.mxu1 %v731_v44 }
  0xdb   : > { %2389 = vmatpush3.msra.mxu0 %v931_v15  ;;  %2480 = vmatpush3.msra.mxu1 %v932_v36  ;;  %v927_v36 = vld [vmem:[%s4112_s1 + $0x440] sm:$0xff] }
  0xdc   : > { %2390 = vmatprep.subr.mxu0 %v930_v41  ;;  %2465 = vmatprep.subr.mxu1 %v931_v15 }
  0xdd   : > { %1470 = vmatmul.mubr.f32.gmra.mxu0 %v729_v40  ;;  %1695 = vmatmul.mubr.f32.gmra.mxu1 %v699_v29  ;;  %v734_v40 = vld [vmem:[#allocation2 + $0x81] sm:$0xff]  ;;  %v2505_v29 = vld [vmem:[#allocation2 + $0xa9] sm:$0xff] }
  0xde   : > { %1474 = vmatprep.mubr.f32.mxu0 %v3650_v0  ;;  %1699 = vmatprep.mubr.f32.mxu1 %v732_v47 }
  0xdf   : > { %2391 = vmatpush3.msra.mxu0 %v930_v41  ;;  %2481 = vmatpush3.msra.mxu1 %v931_v15  ;;  %v926_v15 = vld [vmem:[%s4112_s1 + $0x438] sm:$0xff] }
  0xe0   : > { %2392 = vmatprep.subr.mxu0 %v929_v55  ;;  %2466 = vmatprep.subr.mxu1 %v930_v41 }
  0xe1   : > { %1475 = vmatmul.mubr.f32.gmra.mxu0 %v730_v23  ;;  %1700 = vmatmul.mubr.f32.gmra.mxu1 %v700_v52  ;;  %v735_v23 = vld [vmem:[#allocation2 + $0x91] sm:$0xff] }
  0xe2   : > { %1479 = vmatprep.mubr.f32.mxu0 %v3656_v58  ;;  %1704 = vmatprep.mubr.f32.mxu1 %v733_v16  ;;  %v643_v52 = vld [vmem:[#allocation2 + $0xb1] sm:$0xff] }
  0xe3   : > { %2393 = vmatpush3.msra.mxu0 %v929_v55  ;;  %2482 = vmatpush3.msra.mxu1 %v930_v41  ;;  %v2504_v41 = vld [vmem:[#allocation2 + $0x99] sm:$0xff] }
  0xe4   : > { %2394 = vmatprep.subr.mxu0 %v928_v5  ;;  %2467 = vmatprep.subr.mxu1 %v929_v55 }
  0xe5   : > { %1480 = vmatmul.mubr.f32.gmra.mxu0 %v731_v44  ;;  %1705 = vmatmul.mubr.f32.gmra.mxu1 %v701_v34  ;;  %v925_v44 = vld [vmem:[%s4112_s1 + $0x430] sm:$0xff] }
  0xe6   : > { %1484 = vmatprep.mubr.f32.mxu0 %v3662_v30  ;;  %1709 = vmatprep.mubr.f32.mxu1 %v734_v40 }
  0xe7   : > { %2395 = vmatpush3.msra.mxu0 %v928_v5  ;;  %2483 = vmatpush3.msra.mxu1 %v929_v55  ;;  %v642_v55 = vld [vmem:[#allocation2 + $0xa9] sm:$0xff] }
  0xe8   : > { %2396 = vmatprep.subr.mxu0 %v927_v36  ;;  %2468 = vmatprep.subr.mxu1 %v928_v5 }
  0xe9   : > { %1485 = vmatmul.mubr.f32.gmra.mxu0 %v732_v47  ;;  %1710 = vmatmul.mubr.f32.gmra.mxu1 %v702_v8  ;;  %v641_v47 = vld [vmem:[#allocation2 + $0x99] sm:$0xff]  ;;  %v2513_v8 = vld [vmem:[#allocation2 + $0x109] sm:$0xff] }
  0xea   : > { %1489 = vmatprep.mubr.f32.mxu0 %v3258_v18  ;;  %1714 = vmatprep.mubr.f32.mxu1 %v735_v23  ;;  %v924_v18 = vld [vmem:[%s4112_s1 + $0x428] sm:$0xff] }
  0xeb   : > { %2397 = vmatpush3.msra.mxu0 %v927_v36  ;;  %2484 = vmatpush3.msra.mxu1 %v928_v5  ;;  %v2512_v5 = vld [vmem:[#allocation2 + $0xf9] sm:$0xff] }
  0xec   : > { %2398 = vmatprep.subr.mxu0 %v926_v15  ;;  %2469 = vmatprep.subr.mxu1 %v927_v36 }
  0xed   : > { %1490 = vmatmul.mubr.f32.gmra.mxu0 %v733_v16  ;;  %1715 = vmatmul.mubr.f32.gmra.mxu1 %v703_v28 }
  0xee   : > { %1494 = vmatprep.mubr.f32.mxu0 %v3274_v22  ;;  %1719 = vmatprep.mubr.f32.mxu1 %v2504_v41  ;;  %v923_v22 = vld [vmem:[%s4112_s1 + $0x420] sm:$0xff] }
  0xef   : > { %2399 = vmatpush3.msra.mxu0 %v926_v15  ;;  %2485 = vmatpush3.msra.mxu1 %v927_v36 }
  0xf0   : > { %2400 = vmatprep.subr.mxu0 %v925_v44  ;;  %2470 = vmatprep.subr.mxu1 %v926_v15 }
  0xf1   : > { %1495 = vmatmul.mubr.f32.gmra.mxu0 %v734_v40  ;;  %1720 = vmatmul.mubr.f32.gmra.mxu1 %v3261_v45  ;;  %v2506_v45 = vld [vmem:[#allocation2 + $0xb1] sm:$0xff] }
  0xf2   : > { %1499 = vmatprep.mubr.f32.mxu0 %v3290_v14  ;;  %1724 = vmatprep.mubr.f32.mxu1 %v2505_v29  ;;  %v2507_v14 = vld [vmem:[#allocation2 + $0xc1] sm:$0xff] }
  0xf3   : > { %2401 = vmatpush3.msra.mxu0 %v925_v44  ;;  %2486 = vmatpush3.msra.mxu1 %v926_v15 }
  0xf4   : > { %2402 = vmatprep.subr.mxu0 %v924_v18  ;;  %2471 = vmatprep.subr.mxu1 %v925_v44 }
  0xf5   : > { %1500 = vmatmul.mubr.f32.gmra.mxu0 %v735_v23  ;;  %1725 = vmatmul.mubr.f32.gmra.mxu1 %v3277_v49  ;;  %v922_v49 = vld [vmem:[%s4112_s1 + $0x418] sm:$0xff] }
  0xf6   : > { %1504 = vmatprep.mubr.f32.mxu0 %v3306_v27  ;;  %1729 = vmatprep.mubr.f32.mxu1 %v2506_v45  ;;  %v2508_v27 = vld [vmem:[#allocation2 + $0xc9] sm:$0xff] }
  0xf7   : > { %2403 = vmatpush3.msra.mxu0 %v924_v18  ;;  %2487 = vmatpush3.msra.mxu1 %v925_v44  ;;  %v2514_v44 = vld [vmem:[#allocation2 + $0x111] sm:$0xff] }
  0xf8   : > { %2404 = vmatprep.subr.mxu0 %v923_v22  ;;  %2472 = vmatprep.subr.mxu1 %v924_v18 }
  0xf9   : > { %1505 = vmatmul.mubr.f32.gmra.mxu0 %v641_v47  ;;  %1730 = vmatmul.mubr.f32.gmra.mxu1 %v3293_v54  ;;  %v921_v54 = vld [vmem:[%s4112_s1 + $0x410] sm:$0xff] }
  0xfa   : > { %1509 = vmatprep.mubr.f32.mxu0 %v3323_v50  ;;  %1734 = vmatprep.mubr.f32.mxu1 %v2507_v14  ;;  %v2509_v50 = vld [vmem:[#allocation2 + $0xd9] sm:$0xff] }
  0xfb   : > { %2405 = vmatpush3.msra.mxu0 %v923_v22  ;;  %2488 = vmatpush3.msra.mxu1 %v924_v18 }
  0xfc   : > { %2406 = vmatprep.subr.mxu0 %v922_v49  ;;  %2473 = vmatprep.subr.mxu1 %v923_v22 }
  0xfd   : > { %1510 = vmatmul.mubr.f32.gmra.mxu0 %v642_v55  ;;  %1735 = vmatmul.mubr.f32.gmra.mxu1 %v3309_v39  ;;  %v920_v39 = vld [vmem:[%s4112_s1 + $0x408] sm:$0xff] }
  0xfe   : > { %1514 = vmatprep.mubr.f32.mxu0 %v3340_v46  ;;  %1739 = vmatprep.mubr.f32.mxu1 %v2508_v27  ;;  %v919_v46 = vld [vmem:[%s4112_s1 + $0x400] sm:$0xff] }
  0xff   : > { %2407 = vmatpush3.msra.mxu0 %v922_v49  ;;  %2489 = vmatpush3.msra.mxu1 %v923_v22  ;;  %v2515_v22 = vld [vmem:[#allocation2 + $0x121] sm:$0xff] }
 0x100   : > { %2408 = vmatprep.subr.mxu0 %v921_v54  ;;  %2474 = vmatprep.subr.mxu1 %v922_v49 }
 0x101   : > { %1515 = vmatmul.mubr.f32.gmra.mxu0 %v643_v52  ;;  %1740 = vmatmul.mubr.f32.gmra.mxu1 %v3326_v25  ;;  %v2510_v25 = vld [vmem:[#allocation2 + $0xe1] sm:$0xff]  ;;  %v2517_v52 = vld [vmem:[#allocation2 + $0x139] sm:$0xff] }
 0x102   : > { %1519 = vmatprep.mubr.f32.mxu0 %v3357_v17  ;;  %1744 = vmatprep.mubr.f32.mxu1 %v2509_v50  ;;  %v2511_v17 = vld [vmem:[#allocation2 + $0xf1] sm:$0xff] }
 0x103   : > { %2409 = vmatpush3.msra.mxu0 %v921_v54  ;;  %2490 = vmatpush3.msra.mxu1 %v922_v49 }
 0x104   : > { %2410 = vmatprep.subr.mxu0 %v920_v39  ;;  %2475 = vmatprep.subr.mxu1 %v921_v54 }
 0x105   : > { %1520 = vmatmul.mubr.f32.gmra.mxu0 %v2507_v14  ;;  %1745 = vmatmul.mubr.f32.gmra.mxu1 %v3343_v57  ;;  %v2516_v14 = vld [vmem:[#allocation2 + $0x129] sm:$0xff] }
 0x106   : > { %1524 = vmatprep.mubr.f32.mxu0 %v3374_v51  ;;  %1749 = vmatprep.mubr.f32.mxu1 %v2510_v25 }
 0x107   : > { %2411 = vmatpush3.msra.mxu0 %v920_v39  ;;  %2491 = vmatpush3.msra.mxu1 %v921_v54 }
 0x108   : > { %2412 = vmatprep.subr.mxu0 %v919_v46  ;;  %2476 = vmatprep.subr.mxu1 %v920_v39 }
 0x109   : > { %1525 = vmatmul.mubr.f32.gmra.mxu0 %v2508_v27  ;;  %1750 = vmatmul.mubr.f32.gmra.mxu1 %v3360_v38 }
 0x10a   : > { %1529 = vmatprep.mubr.f32.mxu0 %v3391_v4  ;;  %1754 = vmatprep.mubr.f32.mxu1 %v2511_v17 }
 0x10b   : > { %2413 = vmatpush3.msra.mxu0 %v919_v46  ;;  %2492 = vmatpush3.msra.mxu1 %v920_v39 }
 0x10c   : > { %2477 = vmatprep.subr.mxu1 %v919_v46 }
 0x10d   : > { %v1001_v57 = vpop.f32.mrf.mxu0  ;;  %v1226_v16 = vpop.f32.mrf.mxu1  ;;  %1530 = vmatmul.mubr.f32.gmra.mxu0 %v2509_v50  ;;  %1755 = vmatmul.mubr.f32.gmra.mxu1 %v3377_v62 }
 0x10e   : > { %v3709_v51 = vadd.f32 %v1226_v16, %v1001_v57  ;;  %1534 = vmatprep.mubr.f32.mxu0 %v3408_v6  ;;  %1759 = vmatprep.mubr.f32.mxu1 %v2512_v5 }
 0x10f   : > { %v1003_v34 = vpop.f32.mrf.mxu0  ;;  %v1228_v38 = vpop.f32.mrf.mxu1  ;;  %2493 = vmatpush3.msra.mxu1 %v919_v46 }
 0x111   : > { %v1006_v4 = vpop.f32.mrf.mxu0  ;;  %v1231_v40 = vpop.f32.mrf.mxu1  ;;  %1535 = vmatmul.mubr.f32.gmra.mxu0 %v2510_v25  ;;  %1760 = vmatmul.mubr.f32.gmra.mxu1 %v3394_v48  ;;  %v2518_v25 = vld [vmem:[#allocation2 + $0x141] sm:$0xff] }
 0x112   : > { %v3713_v36 = vadd.f32 %v1231_v40, %v1006_v4  ;;  %1539 = vmatprep.mubr.f32.mxu0 %v3425_v7  ;;  %1764 = vmatprep.mubr.f32.mxu1 %v2513_v8  ;;  %v2520_v40 = vld [vmem:[#allocation2 + $0x159] sm:$0xff] }
 0x113   : > { %v1008_v62 = vpop.f32.mrf.mxu0  ;;  %v1233_v23 = vpop.f32.mrf.mxu1 }
 0x115   : > { %v1011_v15 = vpop.f32.mrf.mxu0  ;;  %v1236_v6 = vpop.f32.mrf.mxu1  ;;  %1540 = vmatmul.mubr.f32.gmra.mxu0 %v2511_v17  ;;  %1765 = vmatmul.mubr.f32.gmra.mxu1 %v3411_v10 }
 0x116   : > { %v3717_v28 = vadd.f32 %v1236_v6, %v1011_v15  ;;  %1544 = vmatprep.mubr.f32.mxu0 %v3442_v11  ;;  %1769 = vmatprep.mubr.f32.mxu1 %v2514_v44  ;;  %v2521_v15 = vld [vmem:[#allocation2 + $0x169] sm:$0xff] }
 0x117   : > { %v1013_v48 = vpop.f32.mrf.mxu0  ;;  %v1238_v41 = vpop.f32.mrf.mxu1 }
 0x118   : > { %v2522_v41 = vld [vmem:[#allocation2 + $0x171] sm:$0xff] }
 0x119   : > { %v1016_v18 = vpop.f32.mrf.mxu0  ;;  %v1241_v29 = vpop.f32.mrf.mxu1  ;;  %1545 = vmatmul.mubr.f32.gmra.mxu0 %v2512_v5  ;;  %1770 = vmatmul.mubr.f32.gmra.mxu1 %v3428_v9  ;;  %v2519_v5 = vld [vmem:[#allocation2 + $0x151] sm:$0xff] }
 0x11a   : > { %v3721_v7 = vadd.f32 %v1241_v29, %v1016_v18  ;;  %1549 = vmatprep.mubr.f32.mxu0 %v3459_v26  ;;  %1774 = vmatprep.mubr.f32.mxu1 %v2515_v22 }
 0x11b   : > { %v1018_v10 = vpop.f32.mrf.mxu0  ;;  %v1243_v45 = vpop.f32.mrf.mxu1 }
 0x11c   : > { %v2523_v10 = vld [vmem:[#allocation2 + $0x181] sm:$0xff] }
 0x11d   : > { %v1021_v47 = vpop.f32.mrf.mxu0  ;;  %v1246_v49 = vpop.f32.mrf.mxu1  ;;  %1550 = vmatmul.mubr.f32.gmra.mxu0 %v2513_v8  ;;  %1775 = vmatmul.mubr.f32.gmra.mxu1 %v3445_v2 }
 0x11e   : > { %v3725_v11 = vadd.f32 %v1246_v49, %v1021_v47  ;;  %1554 = vmatprep.mubr.f32.mxu0 %v3476_v19  ;;  %1779 = vmatprep.mubr.f32.mxu1 %v2516_v14 }
 0x11f   : > { %v1023_v9 = vpop.f32.mrf.mxu0  ;;  %v1248_v55 = vpop.f32.mrf.mxu1 }
 0x120   : > { %v3760_v55 = vld [vmem:[#allocation2 + $0x182] sm:$0xff] }
 0x121   : > { %v1026_v54 = vpop.f32.mrf.mxu0  ;;  %v1251_v27 = vpop.f32.mrf.mxu1  ;;  %1555 = vmatmul.mubr.f32.gmra.mxu0 %v2514_v44  ;;  %1780 = vmatmul.mubr.f32.gmra.mxu1 %v3462_v12 }
 0x122   : > { %v3729_v26 = vadd.f32 %v1251_v27, %v1026_v54  ;;  %1559 = vmatprep.mubr.f32.mxu0 %v3493_v32  ;;  %1784 = vmatprep.mubr.f32.mxu1 %v2517_v52 }
 0x123   : > { %v1028_v2 = vpop.f32.mrf.mxu0  ;;  %v1253_v39 = vpop.f32.mrf.mxu1 }
 0x124   : > { %v3766_v39 = vld [vmem:[#allocation2 + $0x18a] sm:$0xff] }
 0x125   : > { %v1031_v50 = vpop.f32.mrf.mxu0  ;;  %v1256_v46 = vpop.f32.mrf.mxu1  ;;  %1560 = vmatmul.mubr.f32.gmra.mxu0 %v2515_v22  ;;  %1785 = vmatmul.mubr.f32.gmra.mxu1 %v3479_v31 }
 0x126   : > { %v3733_v19 = vadd.f32 %v1256_v46, %v1031_v50  ;;  %1564 = vmatprep.mubr.f32.mxu0 %v3510_v43  ;;  %1789 = vmatprep.mubr.f32.mxu1 %v2518_v25  ;;  %v758_v50 = vld [vmem:[#allocation2 + $0x1a1] sm:$0xff] }
 0x127   : > { %v1033_v12 = vpop.f32.mrf.mxu0  ;;  %v1258_v17 = vpop.f32.mrf.mxu1 }
 0x128   : > { %v2525_v12 = vld [vmem:[#allocation2] sm:$0xff] }
 0x129   : > { %v1036_v57 = vpop.f32.mrf.mxu0  ;;  %v1261_v16 = vpop.f32.mrf.mxu1  ;;  %1565 = vmatmul.mubr.f32.gmra.mxu0 %v2516_v14  ;;  %1790 = vmatmul.mubr.f32.gmra.mxu1 %v3496_v42  ;;  %v2524_v14 = vld [vmem:[#allocation2 + $0x189] sm:$0xff] }
 0x12a   : > { %v3737_v32 = vadd.f32 %v1261_v16, %v1036_v57  ;;  %1569 = vmatprep.mubr.f32.mxu0 %v3527_v61  ;;  %1794 = vmatprep.mubr.f32.mxu1 %v2519_v5  ;;  %v775_v16 = vld [vmem:[#allocation2 + $0xf2] sm:$0xff] }
 0x12b   : > { %v1038_v31 = vpop.f32.mrf.mxu0  ;;  %v1263_v34 = vpop.f32.mrf.mxu1 }
 0x12d   : > { %v1041_v38 = vpop.f32.mrf.mxu0  ;;  %v1266_v4 = vpop.f32.mrf.mxu1  ;;  %1570 = vmatmul.mubr.f32.gmra.mxu0 %v2517_v52  ;;  %1795 = vmatmul.mubr.f32.gmra.mxu1 %v3513_v53 }
 0x12e   : > { %v3741_v43 = vadd.f32 %v1266_v4, %v1041_v38  ;;  %1574 = vmatprep.mubr.f32.mxu0 %v3544_v33  ;;  %1799 = vmatprep.mubr.f32.mxu1 %v2520_v40  ;;  %v776_v38 = vld [vmem:[#allocation2 + $0xfa] sm:$0xff] }
 0x12f   : > { %v1043_v42 = vpop.f32.mrf.mxu0  ;;  %v1268_v8 = vpop.f32.mrf.mxu1 }
 0x130   : > { %v777_v42 = vld [vmem:[#allocation2 + $0x10a] sm:$0xff] }
 0x131   : > { %v1046_v62 = vpop.f32.mrf.mxu0  ;;  %v1271_v23 = vpop.f32.mrf.mxu1  ;;  %1575 = vmatmul.mubr.f32.gmra.mxu0 %v2518_v25  ;;  %1800 = vmatmul.mubr.f32.gmra.mxu1 %v3530_v3 }
 0x132   : > { %v3745_v61 = vadd.f32 %v1271_v23, %v1046_v62  ;;  %1579 = vmatprep.mubr.f32.mxu0 %v3561_v63  ;;  %1804 = vmatprep.mubr.f32.mxu1 %v2521_v15 }
 0x133   : > { %v1048_v53 = vpop.f32.mrf.mxu0  ;;  %v1273_v6 = vpop.f32.mrf.mxu1 }
 0x135   : > { %v1051_v44 = vpop.f32.mrf.mxu0  ;;  %v1276_v48 = vpop.f32.mrf.mxu1  ;;  %1580 = vmatmul.mubr.f32.gmra.mxu0 %v2519_v5  ;;  %1805 = vmatmul.mubr.f32.gmra.mxu1 %v3547_v59 }
 0x136   : > { %v3749_v33 = vadd.f32 %v1276_v48, %v1051_v44  ;;  %1584 = vmatprep.mubr.f32.mxu0 %v3578_v1  ;;  %1809 = vmatprep.mubr.f32.mxu1 %v2522_v41  ;;  %v779_v44 = vld [vmem:[#allocation2 + $0x122] sm:$0xff] }
 0x137   : > { %v1053_v3 = vpop.f32.mrf.mxu0  ;;  %v1278_v18 = vpop.f32.mrf.mxu1 }
 0x139   : > { %v1056_v29 = vpop.f32.mrf.mxu0  ;;  %v1281_v22 = vpop.f32.mrf.mxu1  ;;  %1585 = vmatmul.mubr.f32.gmra.mxu0 %v2520_v40  ;;  %1810 = vmatmul.mubr.f32.gmra.mxu1 %v3564_v56 }
 0x13a   : > { %v3753_v63 = vadd.f32 %v1281_v22, %v1056_v29  ;;  %1589 = vmatprep.mubr.f32.mxu0 %v3595_v24  ;;  %1814 = vmatprep.mubr.f32.mxu1 %v2523_v10  ;;  %v757_v24 = vld [vmem:[#allocation2 + $0x199] sm:$0xff] }
 0x13b   : > { %v1058_v59 = vpop.f32.mrf.mxu0  ;;  %v1283_v45 = vpop.f32.mrf.mxu1  ;;  %v765_v29 = vld [vmem:[#allocation2 + $0x7a] sm:$0xff] }
 0x13c   : > { %v782_v45 = vld [vmem:[#allocation2 + $0x142] sm:$0xff] }
 0x13d   : > { %v1061_v47 = vpop.f32.mrf.mxu0  ;;  %v1286_v49 = vpop.f32.mrf.mxu1  ;;  %1590 = vmatmul.mubr.f32.gmra.mxu0 %v2521_v15  ;;  %1815 = vmatmul.mubr.f32.gmra.mxu1 %v3582_v13  ;;  %v778_v15 = vld [vmem:[#allocation2 + $0x112] sm:$0xff] }
 0x13e   : > { %v3757_v1 = vadd.f32 %v1286_v49, %v1061_v47  ;;  %1594 = vmatprep.mubr.f32.mxu0 %v3609_v21  ;;  %1819 = vmatprep.mubr.f32.mxu1 %v2524_v14 }
 0x13f   : > { %v1063_v56 = vpop.f32.mrf.mxu0  ;;  %v1288_v9 = vpop.f32.mrf.mxu1 }
 0x141   : > { %v1066_v54 = vpop.f32.mrf.mxu0  ;;  %v1291_v27 = vpop.f32.mrf.mxu1  ;;  %1595 = vmatmul.mubr.f32.gmra.mxu0 %v2522_v41  ;;  %1820 = vmatmul.mubr.f32.gmra.mxu1 %v3599_v35 }
 0x142   : > { %v3763_v52 = vadd.f32 %v1291_v27, %v1066_v54  ;;  %1599 = vmatprep.mubr.f32.mxu0 %v3760_v55  ;;  %1824 = vmatprep.mubr.f32.mxu1 %v757_v24  ;;  %v784_v54 = vld [vmem:[#allocation2 + $0x15a] sm:$0xff] }
 0x143   : > { %v1068_v13 = vpop.f32.mrf.mxu0  ;;  %v1293_v2 = vpop.f32.mrf.mxu1 }
 0x144   : > { %v769_v2 = vld [vmem:[#allocation2 + $0xaa] sm:$0xff] }
 0x145   : > { %v1071_v46 = vpop.f32.mrf.mxu0  ;;  %v1296_v25 = vpop.f32.mrf.mxu1  ;;  %1600 = vmatmul.mubr.f32.gmra.mxu0 %v2523_v10  ;;  %1825 = vmatmul.mubr.f32.gmra.mxu1 %v2525_v12 }
 0x146   : > { %v3768_v17 = vadd.f32 %v1296_v25, %v1071_v46  ;;  %1604 = vmatprep.mubr.f32.mxu0 %v3766_v39  ;;  %1829 = vmatprep.mubr.f32.mxu1 %v758_v50  ;;  %v785_v50 = vld [vmem:[#allocation2 + $0x16a] sm:$0xff] }
 0x147   : > { %v1073_v35 = vpop.f32.mrf.mxu0  ;;  %v1298_v57 = vpop.f32.mrf.mxu1 }
 0x148   : > { %v770_v35 = vld [vmem:[#allocation2 + $0xb2] sm:$0xff] }
 0x149   : > { %v1076_v5 = vpop.f32.mrf.mxu0  ;;  %v1301_v31 = vpop.f32.mrf.mxu1  ;;  %1605 = vmatmul.mubr.f32.gmra.mxu0 %v2524_v14  ;;  %1830 = vmatmul.mubr.f32.gmra.mxu1 %v2525_v12  ;;  %v783_v14 = vld [vmem:[#allocation2 + $0x152] sm:$0xff] }
 0x14a   : > { %v3771_v34 = vadd.f32 %v1301_v31, %v1076_v5  ;;  %2414 = vmatprep.mubr.f32.mxu0 %v3632_v20  ;;  %2438 = vmatprep.mubr.f32.mxu1 %v775_v16  ;;  %v771_v5 = vld [vmem:[#allocation2 + $0xc2] sm:$0xff] }
 0x14b   : > { %v1078_v4 = vpop.f32.mrf.mxu0  ;;  %v1303_v40 = vpop.f32.mrf.mxu1 }
 0x14c   : > { %v772_v40 = vld [vmem:[#allocation2 + $0xca] sm:$0xff] }
 0x14d   : > { %v1081_v8 = vpop.f32.mrf.mxu0  ;;  %v1306_v62 = vpop.f32.mrf.mxu1  ;;  %2415 = vmatmul.mubr.f32.vlgmr.msra.gmra.mxu0 %v3638_v60  ;;  %2439 = vmatmul.mubr.f32.vlgmr.msra.gmra.mxu1 %v776_v38  ;;  %v780_v60 = vld [vmem:[#allocation2 + $0x12a] sm:$0xff] }
 0x14e   : > { %v3775_v23 = vadd.f32 %v1306_v62, %v1081_v8  ;;  %2417 = vmatprep.mubr.f32.mxu0 %v3644_v37  ;;  %2441 = vmatprep.mubr.f32.mxu1 %v777_v42  ;;  %v781_v37 = vld [vmem:[#allocation2 + $0x13a] sm:$0xff] }
 0x14f   : > { %v1083_v53 = vpop.f32.mrf.mxu0  ;;  %v1308_v6 = vpop.f32.mrf.mxu1  ;;  %v773_v62 = vld [vmem:[#allocation2 + $0xda] sm:$0xff] }
 0x151   : > { %v1086_v20 = vpop.f32.mrf.mxu0  ;;  %v1311_v48 = vpop.f32.mrf.mxu1  ;;  %2418 = vmatmul.mubr.f32.gmra.mxu0 %v3650_v0  ;;  %2442 = vmatmul.mubr.f32.gmra.mxu1 %v778_v15  ;;  %v766_v0 = vld [vmem:[#allocation2 + $0x82] sm:$0xff]  ;;  %v789_v15 = vld [vmem:[#allocation2 + $0x19a] sm:$0xff] }
 0x152   : > { %v3779_v41 = vadd.f32 %v1311_v48, %v1086_v20  ;;  %2420 = vmatprep.mubr.f32.mxu0 %v3656_v58  ;;  %2444 = vmatprep.mubr.f32.mxu1 %v779_v44  ;;  %v767_v58 = vld [vmem:[#allocation2 + $0x92] sm:$0xff]  ;;  %v790_v20 = vld [vmem:[#allocation2 + $0x1a2] sm:$0xff] }
 0x153   : > { %v1088_v3 = vpop.f32.mrf.mxu0  ;;  %v1313_v18 = vpop.f32.mrf.mxu1 }
 0x155   : > { %v1091_v22 = vpop.f32.mrf.mxu0  ;;  %v1316_v10 = vpop.f32.mrf.mxu1  ;;  %2421 = vmatmul.mubr.f32.gmra.mxu0 %v3662_v30  ;;  %2445 = vmatmul.mubr.f32.gmra.mxu1 %v780_v60  ;;  %v768_v30 = vld [vmem:[#allocation2 + $0x9a] sm:$0xff] }
 0x156   : > { %v3783_v59 = vadd.f32 %v1316_v10, %v1091_v22  ;;  %2423 = vmatprep.mubr.f32.mxu0 %v765_v29  ;;  %2447 = vmatprep.mubr.f32.mxu1 %v781_v37 }
 0x157   : > { %v1093_v47 = vpop.f32.mrf.mxu0  ;;  %v1318_v49 = vpop.f32.mrf.mxu1 }
 0x159   : > { %v1096_v56 = vpop.f32.mrf.mxu0  ;;  %v1321_v9 = vpop.f32.mrf.mxu1  ;;  %2424 = vmatmul.mubr.f32.gmra.mxu0 %v766_v0  ;;  %2448 = vmatmul.mubr.f32.gmra.mxu1 %v782_v45 }
 0x15a   : > { %v3785_v24 = vadd.f32 %v1321_v9, %v1096_v56  ;;  %2426 = vmatprep.mubr.f32.mxu0 %v767_v58  ;;  %2450 = vmatprep.mubr.f32.mxu1 %v783_v14 }
 0x15b   : > { %v1098_v27 = vpop.f32.mrf.mxu0  ;;  %v1323_v13 = vpop.f32.mrf.mxu1 }
 0x15d   : > { %v1101_v46 = vpop.f32.mrf.mxu0  ;;  %v1326_v25 = vpop.f32.mrf.mxu1  ;;  %2427 = vmatmul.mubr.f32.gmra.mxu0 %v768_v30  ;;  %2451 = vmatmul.mubr.f32.gmra.mxu1 %v784_v54 }
 0x15e   : > { %v3787_v12 = vadd.f32 %v1326_v25, %v1101_v46  ;;  %2429 = vmatprep.mubr.f32.mxu0 %v769_v2  ;;  %2453 = vmatprep.mubr.f32.mxu1 %v785_v50 }
 0x15f   : > { %v1103_v57 = vpop.f32.mrf.mxu0  ;;  %v1328_v16 = vpop.f32.mrf.mxu1 }
 0x161   : > { %v1106_v31 = vpop.f32.mrf.mxu0  ;;  %v1331_v38 = vpop.f32.mrf.mxu1  ;;  %2430 = vmatmul.mubr.f32.gmra.mxu0 %v770_v35  ;;  %2454 = vmatmul.mubr.f32.gmra.mxu1 %v3609_v21  ;;  %v774_v21 = vld [vmem:[#allocation2 + $0xe2] sm:$0xff] }
 0x162   : > { %v3790_v4 = vadd.f32 %v1331_v38, %v1106_v31  ;;  %2432 = vmatprep.mubr.f32.mxu0 %v771_v5  ;;  %2456 = vmatprep.mubr.f32.mxu1 %v3760_v55 }
 0x163   : > { %v1108_v42 = vpop.f32.mrf.mxu0  ;;  %v1333_v8 = vpop.f32.mrf.mxu1 }
 0x165   : > { %v1111_v53 = vpop.f32.mrf.mxu0  ;;  %v1336_v6 = vpop.f32.mrf.mxu1  ;;  %2433 = vmatmul.mubr.f32.gmra.mxu0 %v772_v40  ;;  %2457 = vmatmul.mubr.f32.gmra.mxu1 %v3766_v39 }
 0x166   : > { %v3794_v44 = vadd.f32 %v1336_v6, %v1111_v53  ;;  %2435 = vmatprep.mubr.f32.mxu0 %v773_v62  ;;  %2459 = vmatprep.mubr.f32.mxu1 %v789_v15 }
 0x167   : > { %v1113_v48 = vpop.f32.mrf.mxu0  ;;  %v1338_v60 = vpop.f32.mrf.mxu1 }
 0x169   : > { %v1116_v3 = vpop.f32.mrf.mxu0  ;;  %v1341_v55 = vpop.f32.mrf.mxu1  ;;  %2436 = vmatmul.mubr.f32.gmra.mxu0 %v774_v21  ;;  %2460 = vmatmul.mubr.f32.gmra.mxu1 %v790_v20 }
 0x16a   : > { %v3796_v18 = vadd.f32 %v1341_v55, %v1116_v3 }
 0x16b   : > { %v1118_v29 = vpop.f32.mrf.mxu0  ;;  %v1343_v37 = vpop.f32.mrf.mxu1 }
 0x16d   : > { %v1121_v22 = vpop.f32.mrf.mxu0  ;;  %v1346_v10 = vpop.f32.mrf.mxu1 }
 0x16e   : > { %v3798_v0 = vadd.f32 %v1346_v10, %v1121_v22 }
 0x16f   : > { %v1123_v39 = vpop.f32.mrf.mxu0  ;;  %v1348_v45 = vpop.f32.mrf.mxu1 }
 0x171   : > { %v1126_v47 = vpop.f32.mrf.mxu0  ;;  %v1351_v49 = vpop.f32.mrf.mxu1 }
 0x172   : > { %v3800_v58 = vadd.f32 %v1351_v49, %v1126_v47 }
 0x173   : > { %v1128_v14 = vpop.f32.mrf.mxu0  ;;  %v1353_v56 = vpop.f32.mrf.mxu1 }
 0x175   : > { %v1131_v9 = vpop.f32.mrf.mxu0  ;;  %v1356_v30 = vpop.f32.mrf.mxu1 }
 0x176   : > { %v3802_v54 = vadd.f32 %v1356_v30, %v1131_v9 }
 0x177   : > { %v1133_v27 = vpop.f32.mrf.mxu0  ;;  %v1358_v13 = vpop.f32.mrf.mxu1 }
 0x179   : > { %v1136_v2 = vpop.f32.mrf.mxu0  ;;  %v1361_v50 = vpop.f32.mrf.mxu1 }
 0x17a   : > { %v3804_v46 = vadd.f32 %v1361_v50, %v1136_v2 }
 0x17b   : > { %v1138_v25 = vpop.f32.mrf.mxu0  ;;  %v1363_v35 = vpop.f32.mrf.mxu1 }
 0x17d   : > { %v1141_v57 = vpop.f32.mrf.mxu0  ;;  %v1366_v16 = vpop.f32.mrf.mxu1 }
 0x17e   : > { %v3806_v5 = vadd.f32 %v1366_v16, %v1141_v57 }
 0x17f   : > { %v1143_v31 = vpop.f32.mrf.mxu0  ;;  %v1368_v38 = vpop.f32.mrf.mxu1 }
 0x181   : > { %v1146_v40 = vpop.f32.mrf.mxu0  ;;  %v1371_v42 = vpop.f32.mrf.mxu1 }
 0x182   : > { %v3808_v8 = vadd.f32 %v1371_v42, %v1146_v40 }
 0x183   : > { %v1148_v62 = vpop.f32.mrf.mxu0  ;;  %v1373_v15 = vpop.f32.mrf.mxu1 }
 0x185   : > { %v1151_v53 = vpop.f32.mrf.mxu0  ;;  %v1376_v6 = vpop.f32.mrf.mxu1 }
 0x186   : > { %v3810_v21 = vadd.f32 %v1376_v6, %v1151_v53 }
 0x187   : > { %v1153_v20 = vpop.f32.mrf.mxu0  ;;  %v1378_v48 = vpop.f32.mrf.mxu1 }
 0x188   : > { %4142 = vst [vmem:[#allocation3_spill] sm:$0xff] %v3810_v21 }
 0x189   : > { %v1156_v60 = vpop.f32.mrf.mxu0  ;;  %v1381_v3 = vpop.f32.mrf.mxu1 }
 0x18a   : > { %v3812_v55 = vadd.f32 %v1381_v3, %v1156_v60 }
 0x18b   : > { %v1158_v29 = vpop.f32.mrf.mxu0  ;;  %v1383_v37 = vpop.f32.mrf.mxu1 }
 0x18c   : > { %4143 = vst [vmem:[#allocation4_spill] sm:$0xff] %v3812_v55 }
 0x18d   : > { %v1451_v22 = vpop.f32.mrf.mxu0  ;;  %v1676_v10 = vpop.f32.mrf.mxu1 }
 0x18e   : > { %v1452_v39 = vadd.f32 %v1451_v22, %v3709_v51 }
 0x18f   : > { %v1453_v45 = vpop.f32.mrf.mxu0  ;;  %v1678_v47 = vpop.f32.mrf.mxu1 }
 0x190   : > { %v3815_v49 = vadd.f32 %v1676_v10, %v1452_v39 }
 0x191   : > { %v1456_v14 = vpop.f32.mrf.mxu0  ;;  %v1681_v56 = vpop.f32.mrf.mxu1 }
 0x192   : > { %v1457_v9 = vadd.f32 %v1456_v14, %v3713_v36 }
 0x193   : > { %v1458_v30 = vpop.f32.mrf.mxu0  ;;  %v1683_v27 = vpop.f32.mrf.mxu1 }
 0x194   : > { %v3818_v13 = vadd.f32 %v1681_v56, %v1457_v9 }
 0x195   : > { %v1461_v2 = vpop.f32.mrf.mxu0  ;;  %v1686_v50 = vpop.f32.mrf.mxu1 }
 0x196   : > { %v1462_v25 = vadd.f32 %v1461_v2, %v3717_v28 }
 0x197   : > { %v1463_v35 = vpop.f32.mrf.mxu0  ;;  %v1688_v57 = vpop.f32.mrf.mxu1 }
 0x198   : > { %v3821_v16 = vadd.f32 %v1686_v50, %v1462_v25 }
 0x199   : > { %v1466_v51 = vpop.f32.mrf.mxu0  ;;  %v1691_v31 = vpop.f32.mrf.mxu1 }
 0x19a   : > { %v1467_v38 = vadd.f32 %v1466_v51, %v3721_v7 }
 0x19b   : > { %v1468_v40 = vpop.f32.mrf.mxu0  ;;  %v1693_v42 = vpop.f32.mrf.mxu1 }
 0x19c   : > { %v3824_v62 = vadd.f32 %v1691_v31, %v1467_v38 }
 0x19d   : > { %v1471_v36 = vpop.f32.mrf.mxu0  ;;  %v1696_v15 = vpop.f32.mrf.mxu1 }
 0x19e   : > { %v1472_v53 = vadd.f32 %v1471_v36, %v3725_v11 }
 0x19f   : > { %v1473_v6 = vpop.f32.mrf.mxu0  ;;  %v1698_v20 = vpop.f32.mrf.mxu1 }
 0x1a0   : > { %v3827_v48 = vadd.f32 %v1696_v15, %v1472_v53 }
 0x1a1   : > { %v1476_v28 = vpop.f32.mrf.mxu0  ;;  %v1701_v60 = vpop.f32.mrf.mxu1 }
 0x1a2   : > { %v1477_v3 = vadd.f32 %v1476_v28, %v3729_v26 }
 0x1a3   : > { %v1478_v29 = vpop.f32.mrf.mxu0  ;;  %v1703_v37 = vpop.f32.mrf.mxu1 }
 0x1a4   : > { %v3830_v22 = vadd.f32 %v1701_v60, %v1477_v3 }
 0x1a5   : > { %v1481_v7 = vpop.f32.mrf.mxu0  ;;  %v1706_v10 = vpop.f32.mrf.mxu1 }
 0x1a6   : > { %v1482_v39 = vadd.f32 %v1481_v7, %v3733_v19 }
 0x1a7   : > { %v1483_v45 = vpop.f32.mrf.mxu0  ;;  %v1708_v47 = vpop.f32.mrf.mxu1 }
 0x1a8   : > { %v3833_v14 = vadd.f32 %v1706_v10, %v1482_v39 }
 0x1a9   : > { %v1486_v11 = vpop.f32.mrf.mxu0  ;;  %v1711_v56 = vpop.f32.mrf.mxu1 }
 0x1aa   : > { %v1487_v9 = vadd.f32 %v1486_v11, %v3737_v32 }
 0x1ab   : > { %v1488_v30 = vpop.f32.mrf.mxu0  ;;  %v1713_v27 = vpop.f32.mrf.mxu1 }
 0x1ac   : > { %v3836_v2 = vadd.f32 %v1711_v56, %v1487_v9 }
 0x1ad   : > { %v1491_v26 = vpop.f32.mrf.mxu0  ;;  %v1716_v50 = vpop.f32.mrf.mxu1 }
 0x1ae   : > { %v1492_v25 = vadd.f32 %v1491_v26, %v3741_v43 }
 0x1af   : > { %v1493_v35 = vpop.f32.mrf.mxu0  ;;  %v1718_v57 = vpop.f32.mrf.mxu1 }
 0x1b0   : > { %v3839_v51 = vadd.f32 %v1716_v50, %v1492_v25 }
 0x1b1   : > { %v1496_v19 = vpop.f32.mrf.mxu0  ;;  %v1721_v31 = vpop.f32.mrf.mxu1 }
 0x1b2   : > { %v1497_v38 = vadd.f32 %v1496_v19, %v3745_v61 }
 0x1b3   : > { %v1498_v40 = vpop.f32.mrf.mxu0  ;;  %v1723_v42 = vpop.f32.mrf.mxu1 }
 0x1b4   : > { %v3842_v36 = vadd.f32 %v1721_v31, %v1497_v38 }
 0x1b5   : > { %v1501_v32 = vpop.f32.mrf.mxu0  ;;  %v1726_v15 = vpop.f32.mrf.mxu1 }
 0x1b6   : > { %v1502_v53 = vadd.f32 %v1501_v32, %v3749_v33 }
 0x1b7   : > { %v1503_v6 = vpop.f32.mrf.mxu0  ;;  %v1728_v20 = vpop.f32.mrf.mxu1 }
 0x1b8   : > { %v3845_v28 = vadd.f32 %v1726_v15, %v1502_v53 }
 0x1b9   : > { %v1506_v43 = vpop.f32.mrf.mxu0  ;;  %v1731_v60 = vpop.f32.mrf.mxu1 }
 0x1ba   : > { %v1507_v3 = vadd.f32 %v1506_v43, %v3753_v63 }
 0x1bb   : > { %v1508_v29 = vpop.f32.mrf.mxu0  ;;  %v1733_v37 = vpop.f32.mrf.mxu1 }
 0x1bc   : > { %v3848_v7 = vadd.f32 %v1731_v60, %v1507_v3 }
 0x1bd   : > { %v1511_v61 = vpop.f32.mrf.mxu0  ;;  %v1736_v10 = vpop.f32.mrf.mxu1 }
 0x1be   : > { %v1512_v39 = vadd.f32 %v1511_v61, %v3757_v1 }
 0x1bf   : > { %v1513_v45 = vpop.f32.mrf.mxu0  ;;  %v1738_v47 = vpop.f32.mrf.mxu1 }
 0x1c0   : > { %v3851_v11 = vadd.f32 %v1736_v10, %v1512_v39 }
 0x1c1   : > { %v1516_v33 = vpop.f32.mrf.mxu0  ;;  %v1741_v56 = vpop.f32.mrf.mxu1 }
 0x1c2   : > { %4144 = vst [vmem:[#allocation5_spill] sm:$0xff] %v3851_v11  ;;  %v1517_v9 = vadd.f32 %v1516_v33, %v3763_v52 }
 0x1c3   : > { %v1518_v30 = vpop.f32.mrf.mxu0  ;;  %v1743_v27 = vpop.f32.mrf.mxu1 }
 0x1c4   : > { %v3854_v26 = vadd.f32 %v1741_v56, %v1517_v9 }
 0x1c5   : > { %v1521_v63 = vpop.f32.mrf.mxu0  ;;  %v1746_v50 = vpop.f32.mrf.mxu1 }
 0x1c6   : > { %4145 = vst [vmem:[#allocation6_spill] sm:$0xff] %v3854_v26  ;;  %v1522_v25 = vadd.f32 %v1521_v63, %v3768_v17 }
 0x1c7   : > { %v1523_v35 = vpop.f32.mrf.mxu0  ;;  %v1748_v57 = vpop.f32.mrf.mxu1 }
 0x1c8   : > { %v3857_v19 = vadd.f32 %v1746_v50, %v1522_v25 }
 0x1c9   : > { %v1526_v1 = vpop.f32.mrf.mxu0  ;;  %v1751_v31 = vpop.f32.mrf.mxu1 }
 0x1ca   : > { %4146 = vst [vmem:[#allocation7_spill] sm:$0xff] %v3857_v19  ;;  %v1527_v38 = vadd.f32 %v1526_v1, %v3771_v34 }
 0x1cb   : > { %v1528_v40 = vpop.f32.mrf.mxu0  ;;  %v1753_v42 = vpop.f32.mrf.mxu1 }
 0x1cc   : > { %v3860_v32 = vadd.f32 %v1751_v31, %v1527_v38 }
 0x1cd   : > { %v1531_v52 = vpop.f32.mrf.mxu0  ;;  %v1756_v15 = vpop.f32.mrf.mxu1 }
 0x1ce   : > { %4147 = vst [vmem:[#allocation8_spill] sm:$0xff] %v3860_v32  ;;  %v1532_v53 = vadd.f32 %v1531_v52, %v3775_v23 }
 0x1cf   : > { %v1533_v6 = vpop.f32.mrf.mxu0  ;;  %v1758_v20 = vpop.f32.mrf.mxu1 }
 0x1d0   : > { %v3863_v43 = vadd.f32 %v1756_v15, %v1532_v53 }
 0x1d1   : > { %v1536_v17 = vpop.f32.mrf.mxu0  ;;  %v1761_v60 = vpop.f32.mrf.mxu1 }
 0x1d3   : > { %v1538_v3 = vpop.f32.mrf.mxu0  ;;  %v1763_v29 = vpop.f32.mrf.mxu1 }
 0x1d5   : > { %v1541_v37 = vpop.f32.mrf.mxu0  ;;  %v3865_v61 = vpop.f32.mrf.mxu1 }
 0x1d6   : > { %v1542_v55 = vadd.f32 %v1541_v37, %v3783_v59 }
 0x1d7   : > { %v1543_v34 = vpop.f32.mrf.mxu0  ;;  %v1768_v10 = vpop.f32.mrf.mxu1 }
 0x1d9   : > { %v1546_v39 = vpop.f32.mrf.mxu0  ;;  %v3867_v45 = vpop.f32.mrf.mxu1 }
 0x1db   : > { %v1548_v47 = vpop.f32.mrf.mxu0  ;;  %v1773_v33 = vpop.f32.mrf.mxu1 }
 0x1dd   : > { %v3869_v56 = vpop.f32.mrf.mxu0  ;;  %v3871_v23 = vpop.f32.mrf.mxu1 }
 0x1df   : > { %v1553_v9 = vpop.f32.mrf.mxu0  ;;  %v1778_v30 = vpop.f32.mrf.mxu1 }
 0x1e1   : > { %v1556_v27 = vpop.f32.mrf.mxu0  ;;  %v3873_v63 = vpop.f32.mrf.mxu1 }
 0x1e3   : > { %v1558_v50 = vpop.f32.mrf.mxu0  ;;  %v1783_v25 = vpop.f32.mrf.mxu1 }
 0x1e5   : > { %v3875_v35 = vpop.f32.mrf.mxu0  ;;  %v3877_v57 = vpop.f32.mrf.mxu1 }
 0x1e7   : > { %v1563_v1 = vpop.f32.mrf.mxu0  ;;  %v1788_v31 = vpop.f32.mrf.mxu1 }
 0x1e9   : > { %v3879_v38 = vpop.f32.mrf.mxu0  ;;  %v3881_v40 = vpop.f32.mrf.mxu1 }
 0x1eb   : > { %v1568_v42 = vpop.f32.mrf.mxu0  ;;  %v1793_v52 = vpop.f32.mrf.mxu1 }
 0x1ed   : > { %v3883_v15 = vpop.f32.mrf.mxu0  ;;  %v3885_v53 = vpop.f32.mrf.mxu1 }
 0x1ef   : > { %v1573_v6 = vpop.f32.mrf.mxu0  ;;  %v1798_v20 = vpop.f32.mrf.mxu1 }
 0x1f1   : > { %v3887_v3 = vpop.f32.mrf.mxu0  ;;  %v3889_v29 = vpop.f32.mrf.mxu1 }
 0x1f3   : > { %v1578_v34 = vpop.f32.mrf.mxu0  ;;  %v1803_v10 = vpop.f32.mrf.mxu1 }
 0x1f5   : > { %v3891_v47 = vpop.f32.mrf.mxu0  ;;  %v3893_v33 = vpop.f32.mrf.mxu1 }
 0x1f7   : > { %v1583_v9 = vpop.f32.mrf.mxu0  ;;  %v1808_v30 = vpop.f32.mrf.mxu1 }
 0x1f9   : > { %v3895_v50 = vpop.f32.mrf.mxu0  ;;  %v3897_v25 = vpop.f32.mrf.mxu1 }
 0x1fb   : > { %v1588_v1 = vpop.f32.mrf.mxu0  ;;  %v1813_v31 = vpop.f32.mrf.mxu1 }
 0x1fc   : > { %v1537_v31 = vadd.f32 %v1536_v17, %v3779_v41 }
 0x1fd   : > { %v3899_v42 = vpop.f32.mrf.mxu0  ;;  %v3901_v52 = vpop.f32.mrf.mxu1 }
 0x1fe   : > { %4148 = vst [vmem:[#allocation9_spill] sm:$0xff] %v3901_v52  ;;  %v1762_v26 = vadd.f32 %v1761_v60, %v1537_v31 }
 0x1ff   : > { %v1593_v6 = vpop.f32.mrf.mxu0  ;;  %v1818_v20 = vpop.f32.mrf.mxu1 }
 0x201   : > { %v3903_v34 = vpop.f32.mrf.mxu0  ;;  %v3905_v10 = vpop.f32.mrf.mxu1 }
 0x203   : > { %v1598_v19 = vpop.f32.mrf.mxu0  ;;  %v1823_v9 = vpop.f32.mrf.mxu1 }
 0x204   : > { %v1547_v19 = vadd.f32 %v1546_v39, %v3785_v24  ;;  %v1767_v39 = vadd.f32 %v3865_v61, %v1542_v55  ;;  %v1552_v55 = vadd.f32 %v3869_v56, %v3787_v12 }
 0x205   : > { %v3907_v30 = vpop.f32.mrf.mxu0  ;;  %v3909_v32 = vpop.f32.mrf.mxu1 }
 0x207   : > { %v1603_v11 = vpop.f32.mrf.mxu0  ;;  %v1828_v1 = vpop.f32.mrf.mxu1 }
 0x208   : > { %v1772_v1 = vadd.f32 %v3867_v45, %v1547_v19 }
 0x209   : > { %v3912_v21 = vpop.f32.mrf.mxu0  ;;  %v3914_v52 = vpop.f32.mrf.mxu1 }
 0x20b   : > { %v1608_v6 = vpop.f32.mrf.mxu0  ;;  %v1833_v20 = vpop.f32.mrf.mxu1 }
 0x20d   : > { %v2416_v41 = vpop.f32.mrf.mxu0  ;;  %v2440_v11 = vpop.f32.mrf.mxu1 }
 0x20e   : > { %v1907_v17 = vadd.f32 %v2416_v41, %v3818_v13  ;;  %v3926_v9 = vadd.f32 %v2440_v11, %v1762_v26  ;;  %v1557_v13 = vadd.f32 %v1556_v27, %v3790_v4 }
 0x20f   : > { %v1901_v60 = vpop.f32.mrf.mxu0  ;;  %v1981_v59 = vpop.f32.mrf.mxu1 }
 0x210   : > { %2061 = vst [vmem:[%s3923_s29 + $0x8] sm:$0xff] %v1907_v17  ;;  %2077 = vst [vmem:[%s3923_s29 + $0x88] sm:$0xff] %v3926_v9  ;;  %v1902_v24 = vadd.f32 %v1901_v60, %v3815_v49  ;;  %v3933_v37 = vadd.f32 %v1981_v59, %v3863_v43  ;;  %v2130_v6 = vmul.f32 %v1907_v17, %v1907_v17 }
 0x211   : > { %v2419_v26 = vpop.f32.mrf.mxu0  ;;  %v2443_v31 = vpop.f32.mrf.mxu1  ;;  %v1782_v11 = vadd.f32 %v3873_v63, %v1557_v13  ;;  %v1777_v59 = vadd.f32 %v3871_v23, %v1552_v55  ;;  %v1562_v63 = vadd.f32 %v3875_v35, %v3794_v44 }
 0x212   : > { %2060 = vst [vmem:[%s3923_s29] sm:$0xff] %v1902_v24  ;;  %v2092_v20 = vadd.f32 %v1907_v17, %v1902_v24  ;;  %v2129_v41 = vmul.f32 %v1902_v24, %v1902_v24  ;;  %2076 = vst [vmem:[%s3923_s29 + $0x80] sm:$0xff] %v3933_v37  ;;  %v1917_v49 = vadd.f32 %v2419_v26, %v3824_v62 }
 0x213   : > { %v3944_v43 = vadd.f32 %v2443_v31, %v1772_v1  ;;  %v1911_v61 = vpop.f32.mrf.mxu0  ;;  %v1991_v4 = vpop.f32.mrf.mxu1  ;;  %v1567_v17 = vadd.f32 %v3879_v38, %v3796_v18 }
 0x214   : > { %v2161_v45 = vadd.f32 %v2130_v6, %v2129_v41  ;;  %2063 = vst [vmem:[%s3923_s29 + $0x18] sm:$0xff] %v1917_v49  ;;  %v1912_v27 = vadd.f32 %v1911_v61, %v3821_v16  ;;  %v3948_v19 = vadd.f32 %v1991_v4, %v1767_v39  ;;  %v2132_v39 = vmul.f32 %v1917_v49, %v1917_v49 }
 0x215   : > { %2079 = vst [vmem:[%s3923_s29 + $0x98] sm:$0xff] %v3944_v43  ;;  %v2422_v12 = vpop.f32.mrf.mxu0  ;;  %v2446_v62 = vpop.f32.mrf.mxu1  ;;  %v1792_v31 = vadd.f32 %v3881_v40, %v1567_v17  ;;  %v1572_v40 = vadd.f32 %v3883_v15, %v3798_v0 }
 0x216   : > { %2062 = vst [vmem:[%s3923_s29 + $0x10] sm:$0xff] %v1912_v27  ;;  %v2093_v56 = vadd.f32 %v2092_v20, %v1912_v27  ;;  %v2131_v60 = vmul.f32 %v1912_v27, %v1912_v27  ;;  %2078 = vst [vmem:[%s3923_s29 + $0x90] sm:$0xff] %v3948_v19  ;;  %v1927_v16 = vadd.f32 %v2422_v12, %v3830_v22 }
 0x217   : > { %v3962_v18 = vadd.f32 %v2446_v62, %v1782_v11  ;;  %v1921_v38 = vpop.f32.mrf.mxu0  ;;  %v2001_v24 = vpop.f32.mrf.mxu1  ;;  %v1577_v22 = vadd.f32 %v3887_v3, %v3800_v58 }
 0x218   : > { %v2162_v1 = vadd.f32 %v2161_v45, %v2131_v60  ;;  %2065 = vst [vmem:[%s3923_s29 + $0x28] sm:$0xff] %v1927_v16  ;;  %v1922_v13 = vadd.f32 %v1921_v38, %v3827_v48  ;;  %v2094_v26 = vadd.f32 %v2093_v56, %v1917_v49  ;;  %v3971_v23 = vadd.f32 %v2001_v24, %v1777_v59 }
 0x219   : > { %2081 = vst [vmem:[%s3923_s29 + $0xa8] sm:$0xff] %v3962_v18  ;;  %v2425_v44 = vpop.f32.mrf.mxu0  ;;  %v2449_v35 = vpop.f32.mrf.mxu1  ;;  %v1787_v49 = vadd.f32 %v3877_v57, %v1562_v63  ;;  %v2134_v61 = vmul.f32 %v1927_v16, %v1927_v16  ;;  %v1587_v57 = vadd.f32 %v3895_v50, %v3804_v46  ;;  %v1797_v56 = vadd.f32 %v3885_v53, %v1572_v40 }
 0x21a   : > { %2064 = vst [vmem:[%s3923_s29 + $0x20] sm:$0xff] %v1922_v13  ;;  %v2095_v6 = vadd.f32 %v2094_v26, %v1922_v13  ;;  %v2133_v20 = vmul.f32 %v1922_v13, %v1922_v13  ;;  %v2163_v41 = vadd.f32 %v2162_v1, %v2132_v39  ;;  %v1937_v48 = vadd.f32 %v2425_v44, %v3836_v2 }
 0x21b   : > { %2080 = vst [vmem:[%s3923_s29 + $0xa0] sm:$0xff] %v3971_v23  ;;  %v3980_v58 = vadd.f32 %v2449_v35, %v1792_v31  ;;  %v1931_v3 = vpop.f32.mrf.mxu0  ;;  %v2011_v55 = vpop.f32.mrf.mxu1  ;;  %v1802_v2 = vadd.f32 %v3889_v29, %v1577_v22  ;;  %v1582_v29 = vadd.f32 %v3891_v47, %v3802_v54  ;;  %v1597_v53 = vadd.f32 %v3903_v34, %v3808_v8 }
 0x21c   : > { %v2164_v4 = vadd.f32 %v2163_v41, %v2133_v20  ;;  %2067 = vst [vmem:[%s3923_s29 + $0x38] sm:$0xff] %v1937_v48  ;;  %v1932_v45 = vadd.f32 %v1931_v3, %v3833_v14  ;;  %v2096_v27 = vadd.f32 %v2095_v6, %v1927_v16  ;;  %v3989_v0 = vadd.f32 %v2011_v55, %v1787_v49  ;;  %v4150_v3 = vld [vmem:[#allocation6_spill] sm:$0xff]  ;;  %v4151_v55 = vld [vmem:[#allocation9_spill] sm:$0xff] }
 0x21d   : > { %2083 = vst [vmem:[%s3923_s29 + $0xb8] sm:$0xff] %v3980_v58  ;;  %v2428_v15 = vpop.f32.mrf.mxu0  ;;  %v2452_v11 = vpop.f32.mrf.mxu1  ;;  %v2136_v16 = vmul.f32 %v1937_v48, %v1937_v48  ;;  %v1807_v26 = vadd.f32 %v3893_v33, %v1582_v29  ;;  %v4149_v33 = vld [vmem:[#allocation4_spill] sm:$0xff] }
 0x21e   : > { %2066 = vst [vmem:[%s3923_s29 + $0x30] sm:$0xff] %v1932_v45  ;;  %v2097_v17 = vadd.f32 %v2096_v27, %v1932_v45  ;;  %v2135_v12 = vmul.f32 %v1932_v45, %v1932_v45  ;;  %v2165_v62 = vadd.f32 %v2164_v4, %v2134_v61  ;;  %v1947_v14 = vadd.f32 %v2428_v15, %v3842_v36  ;;  %v4153_v15 = vld [vmem:[#allocation5_spill] sm:$0xff] }
 0x21f   : > { %2082 = vst [vmem:[%s3923_s29 + $0xb0] sm:$0xff] %v3989_v0  ;;  %v3998_v46 = vadd.f32 %v2452_v11, %v1802_v2  ;;  %v1941_v50 = vpop.f32.mrf.mxu0  ;;  %v2021_v60 = vpop.f32.mrf.mxu1  ;;  %v1812_v36 = vadd.f32 %v3897_v25, %v1587_v57  ;;  %v1592_v25 = vadd.f32 %v3899_v42, %v3806_v5  ;;  %v1607_v20 = vadd.f32 %v3912_v21, %v4149_v33 }
 0x220   : > { %v2166_v59 = vadd.f32 %v2165_v62, %v2135_v12  ;;  %2069 = vst [vmem:[%s3923_s29 + $0x48] sm:$0xff] %v1947_v14  ;;  %v1942_v63 = vadd.f32 %v1941_v50, %v3839_v51  ;;  %v2098_v38 = vadd.f32 %v2097_v17, %v1937_v48  ;;  %v4007_v54 = vadd.f32 %v2021_v60, %v1797_v56  ;;  %v4154_v60 = vld [vmem:[#allocation8_spill] sm:$0xff] }
 0x221   : > { %2085 = vst [vmem:[%s3923_s29 + $0xc8] sm:$0xff] %v3998_v46  ;;  %v2431_v47 = vpop.f32.mrf.mxu0  ;;  %v2455_v24 = vpop.f32.mrf.mxu1  ;;  %v2138_v22 = vmul.f32 %v1947_v14, %v1947_v14  ;;  %v1817_v61 = vadd.f32 %v4151_v55, %v1592_v25  ;;  %v1832_v12 = vadd.f32 %v3914_v52, %v1607_v20  ;;  %v2147_v33 = vmul.f32 %v3948_v19, %v3948_v19 }
 0x222   : > { %2068 = vst [vmem:[%s3923_s29 + $0x40] sm:$0xff] %v1942_v63  ;;  %v2099_v39 = vadd.f32 %v2098_v38, %v1942_v63  ;;  %v2137_v1 = vmul.f32 %v1942_v63, %v1942_v63  ;;  %v2167_v13 = vadd.f32 %v2166_v59, %v2136_v16  ;;  %v1957_v51 = vadd.f32 %v2431_v47, %v3848_v7  ;;  %v4155_v47 = vld [vmem:[#allocation7_spill] sm:$0xff] }
 0x223   : > { %2084 = vst [vmem:[%s3923_s29 + $0xc0] sm:$0xff] %v4007_v54  ;;  %v4016_v8 = vadd.f32 %v2455_v24, %v1812_v36  ;;  %v1951_v34 = vpop.f32.mrf.mxu0  ;;  %v2031_v31 = vpop.f32.mrf.mxu1  ;;  %v1822_v7 = vadd.f32 %v3905_v10, %v1597_v53  ;;  %v4152_v10 = vld [vmem:[#allocation3_spill] sm:$0xff] }
 0x224   : > { %v2168_v44 = vadd.f32 %v2167_v13, %v2137_v1  ;;  %2071 = vst [vmem:[%s3923_s29 + $0x58] sm:$0xff] %v1957_v51  ;;  %v1952_v35 = vadd.f32 %v1951_v34, %v3845_v28  ;;  %v2100_v6 = vadd.f32 %v2099_v39, %v1947_v14  ;;  %v4025_v5 = vadd.f32 %v2031_v31, %v1807_v26 }
 0x225   : > { %2087 = vst [vmem:[%s3923_s29 + $0xd8] sm:$0xff] %v4016_v8  ;;  %v2434_v42 = vpop.f32.mrf.mxu0  ;;  %v2458_v41 = vpop.f32.mrf.mxu1  ;;  %v1602_v21 = vadd.f32 %v3907_v30, %v4152_v10  ;;  %v2140_v2 = vmul.f32 %v1957_v51, %v1957_v51  ;;  %v2145_v31 = vmul.f32 %v3933_v37, %v3933_v37 }
 0x226   : > { %2070 = vst [vmem:[%s3923_s29 + $0x50] sm:$0xff] %v1952_v35  ;;  %v2101_v48 = vadd.f32 %v2100_v6, %v1952_v35  ;;  %v2139_v49 = vmul.f32 %v1952_v35, %v1952_v35  ;;  %v2169_v40 = vadd.f32 %v2168_v44, %v2138_v22  ;;  %v1967_v28 = vadd.f32 %v2434_v42, %v4150_v3 }
 0x227   : > { %2086 = vst [vmem:[%s3923_s29 + $0xd0] sm:$0xff] %v4025_v5  ;;  %v4034_v4 = vadd.f32 %v2458_v41, %v1822_v7  ;;  %v1961_v45 = vpop.f32.mrf.mxu0  ;;  %v2041_v27 = vpop.f32.mrf.mxu1  ;;  %v1827_v59 = vadd.f32 %v3909_v32, %v1602_v21  ;;  %v2146_v35 = vmul.f32 %v3926_v9, %v3926_v9  ;;  %v2148_v41 = vmul.f32 %v3944_v43, %v3944_v43 }
 0x228   : > { %v2170_v57 = vadd.f32 %v2169_v40, %v2139_v49  ;;  %2073 = vst [vmem:[%s3923_s29 + $0x68] sm:$0xff] %v1967_v28  ;;  %v1962_v11 = vadd.f32 %v1961_v45, %v4153_v15  ;;  %v2102_v17 = vadd.f32 %v2101_v48, %v1957_v51  ;;  %v4041_v62 = vadd.f32 %v2041_v27, %v1817_v61 }
 0x229   : > { %2089 = vst [vmem:[%s3923_s29 + $0xe8] sm:$0xff] %v4034_v4  ;;  %v2437_v30 = vpop.f32.mrf.mxu0  ;;  %v2461_v14 = vpop.f32.mrf.mxu1  ;;  %v2142_v36 = vmul.f32 %v1967_v28, %v1967_v28 }
 0x22a   : > { %2072 = vst [vmem:[%s3923_s29 + $0x60] sm:$0xff] %v1962_v11  ;;  %v2103_v56 = vadd.f32 %v2102_v17, %v1962_v11  ;;  %v2141_v29 = vmul.f32 %v1962_v11, %v1962_v11  ;;  %v2171_v50 = vadd.f32 %v2170_v57, %v2140_v2  ;;  %v1977_v16 = vadd.f32 %v2437_v30, %v4154_v60 }
 0x22b   : > { %2088 = vst [vmem:[%s3923_s29 + $0xe0] sm:$0xff] %v4041_v62  ;;  %v4048_v52 = vadd.f32 %v2461_v14, %v1832_v12  ;;  %v1971_v63 = vpop.f32.mrf.mxu0  ;;  %v2051_v38 = vpop.f32.mrf.mxu1 }
 0x22c   : > { %v2172_v53 = vadd.f32 %v2171_v50, %v2141_v29  ;;  %2075 = vst [vmem:[%s3923_s29 + $0x78] sm:$0xff] %v1977_v16  ;;  %v1972_v24 = vadd.f32 %v1971_v63, %v4155_v47  ;;  %v2104_v39 = vadd.f32 %v2103_v56, %v1967_v28  ;;  %v2052_v1 = vadd.f32 %v2051_v38, %v1827_v59 }
 0x22d   : > { %2091 = vst [vmem:[%s3923_s29 + $0xf8] sm:$0xff] %v4048_v52  ;;  %v2144_v26 = vmul.f32 %v1977_v16, %v1977_v16 }
 0x22e   : > { %2074 = vst [vmem:[%s3923_s29 + $0x70] sm:$0xff] %v1972_v24  ;;  %v2105_v13 = vadd.f32 %v2104_v39, %v1972_v24  ;;  %v2143_v51 = vmul.f32 %v1972_v24, %v1972_v24  ;;  %v2173_v32 = vadd.f32 %v2172_v53, %v2142_v36  ;;  %2090 = vst [vmem:[%s3923_s29 + $0xf0] sm:$0xff] %v2052_v1 }
 0x22f   : > { %v2159_v60 = vmul.f32 %v2052_v1, %v2052_v1 }
 0x230   : > { %v2106_v25 = vadd.f32 %v2105_v13, %v1977_v16  ;;  %v2174_v34 = vadd.f32 %v2173_v32, %v2143_v51 }
 0x232   : > { %v2107_v22 = vadd.f32 %v2106_v25, %v3933_v37  ;;  %v2175_v44 = vadd.f32 %v2174_v34, %v2144_v26  ;;  %v2149_v37 = vmul.f32 %v3971_v23, %v3971_v23 }
 0x234   : > { %v2108_v6 = vadd.f32 %v2107_v22, %v3926_v9  ;;  %v2176_v7 = vadd.f32 %v2175_v44, %v2145_v31  ;;  %v2150_v9 = vmul.f32 %v3962_v18, %v3962_v18 }
 0x236   : > { %v2109_v20 = vadd.f32 %v2108_v6, %v3948_v19  ;;  %v2177_v42 = vadd.f32 %v2176_v7, %v2146_v35  ;;  %v2151_v19 = vmul.f32 %v3989_v0, %v3989_v0 }
 0x238   : > { %v2110_v48 = vadd.f32 %v2109_v20, %v3944_v43  ;;  %v2178_v49 = vadd.f32 %v2177_v42, %v2147_v33  ;;  %v2152_v43 = vmul.f32 %v3980_v58, %v3980_v58 }
 0x23a   : > { %v2111_v40 = vadd.f32 %v2110_v48, %v3971_v23  ;;  %v2179_v3 = vadd.f32 %v2178_v49, %v2148_v41  ;;  %v2153_v23 = vmul.f32 %v4007_v54, %v4007_v54 }
 0x23c   : > { %v2112_v28 = vadd.f32 %v2111_v40, %v3962_v18  ;;  %v2180_v55 = vadd.f32 %v2179_v3, %v2149_v37  ;;  %v2154_v18 = vmul.f32 %v3998_v46, %v3998_v46 }
 0x23e   : > { %v2181_v61 = vadd.f32 %v2180_v55, %v2150_v9  ;;  %v2113_v10 = vadd.f32 %v2112_v28, %v3989_v0  ;;  %v2155_v0 = vmul.f32 %v4025_v5, %v4025_v5 }
 0x240   : > { %v2114_v21 = vadd.f32 %v2113_v10, %v3980_v58  ;;  %v2182_v45 = vadd.f32 %v2181_v61, %v2151_v19  ;;  %v2156_v58 = vmul.f32 %v4016_v8, %v4016_v8 }
 0x242   : > { %v2115_v27 = vadd.f32 %v2114_v21, %v4007_v54  ;;  %v2183_v2 = vadd.f32 %v2182_v45, %v2152_v43  ;;  %v2157_v54 = vmul.f32 %v4041_v62, %v4041_v62 }
 0x244   : > { %v2116_v57 = vadd.f32 %v2115_v27, %v3998_v46  ;;  %v2184_v15 = vadd.f32 %v2183_v2, %v2153_v23  ;;  %v2158_v46 = vmul.f32 %v4034_v4, %v4034_v4 }
 0x246   : > { %v2117_v11 = vadd.f32 %v2116_v57, %v4025_v5  ;;  %v2185_v17 = vadd.f32 %v2184_v15, %v2154_v18 }
 0x248   : > { %v2118_v12 = vadd.f32 %v2117_v11, %v4016_v8  ;;  %v2186_v30 = vadd.f32 %v2185_v17, %v2155_v0  ;;  %v2160_v8 = vmul.f32 %v4048_v52, %v4048_v52 }
 0x24a   : > { %v2119_v14 = vadd.f32 %v2118_v12, %v4041_v62  ;;  %v2187_v56 = vadd.f32 %v2186_v30, %v2156_v58 }
 0x24c   : > { %v2120_v29 = vadd.f32 %v2119_v14, %v4034_v4  ;;  %v2188_v5 = vadd.f32 %v2187_v56, %v2157_v54 }
 0x24e   : > { %v2121_v50 = vadd.f32 %v2120_v29, %v2052_v1  ;;  %v2189_v16 = vadd.f32 %v2188_v5, %v2158_v46 }
 0x250   : > { %v2122_v59 = vadd.f32 %v2121_v50, %v4048_v52  ;;  %v2190_v63 = vadd.f32 %v2189_v16, %v2159_v60 }
 0x252   : > { %v2123_v38 = vrot.slane %v2122_v59, 4  ;;  %v2191_v36 = vadd.f32 %v2190_v63, %v2160_v8 }
 0x254   : > { %v2124_v62 = vadd.f32 %v2123_v38, %v2122_v59  ;;  %v2192_v53 = vrot.slane %v2191_v36, 4 }
 0x256   : > { %v2125_v47 = vrot.slane %v2124_v62, 2  ;;  %v2193_v24 = vadd.f32 %v2192_v53, %v2191_v36 }
 0x258   : > { %v2126_v39 = vadd.f32 %v2125_v47, %v2124_v62  ;;  %v2194_v13 = vrot.slane %v2193_v24, 2 }
 0x25a   : > { %v2127_v4 = vrot.slane %v2126_v39, 1  ;;  %v2195_v51 = vadd.f32 %v2194_v13, %v2193_v24 }
 0x25c   : > { %v2128_v1 = vadd.f32 %v2127_v4, %v2126_v39  ;;  %v2196_v32 = vrot.slane %v2195_v51, 1 }
 0x25e   : > { %v2197_v52 = vadd.f32 %v2196_v32, %v2195_v51  ;;  %2198 = vst [vmem:[%s268_s8] sm:$0xff] %v2128_v1 }
 0x260   : > { %2199 = vst [vmem:[%s272_s11] sm:$0xff] %v2197_v52 }
 0x261 PF: > { %s17_s21 = sadd.s32 1, %s2532_s21  }
 0x262   : > { %p14_p4 = scmp.ge.s32.totalorder %s17_s21, 4  }
 0x264   :  { %16 = sbr.rel (!%p14_p4) target bundleno = 1 (0x1), region = 92 }

</bundles_post_ra>
